<compile_context>
chip_gen: v7x
topology: tpu7x:2x2x1
jax: 0.10.0
libtpu: 0.0.40
codegen_flags: <defaults>
</compile_context>

<pallas_src>
import functools
import math

import jax
import jax.numpy as jnp
from jax import lax
from jax.experimental import pallas as pl
from jax.experimental.pallas import tpu as pltpu


def _mha_kernel(q_ref, k_ref, v_ref, wqkv_ref, wo_ref, b_ref, o_ref,
                qp_s, kp_s, vp_s, acc_s, *, num_heads, d_k, scale):
    """One (batch, q-block) grid point of fused multi-head attention.

    q_ref:    (1, TQ, D) f32   query block
    k_ref:    (1, S,  D) f32   full key   (constant across q-blocks)
    v_ref:    (1, S,  D) f32   full value (constant across q-blocks)
    wqkv_ref: (3, D, D)  bf16  stacked Wq/Wk/Wv ('x @ w' layout)
    wo_ref:   (D, D)     bf16  Wo
    b_ref:    (4, D)     f32   stacked bq/bk/bv/bo
    o_ref:    (1, TQ, D)       output block
    scratch:  qp_s (TQ,D) bf16, kp_s/vp_s (S,D) bf16, acc_s (TQ,D) f32
    """
    qi = pl.program_id(1)

    # K / V projections once per batch element; resident in VMEM scratch for
    # all subsequent q-blocks of this batch element (q axis is "arbitrary").
    @pl.when(qi == 0)
    def _():
        kb = k_ref[0].astype(jnp.bfloat16)
        vb = v_ref[0].astype(jnp.bfloat16)
        kp = jnp.dot(kb, wqkv_ref[1], preferred_element_type=jnp.float32)
        vp = jnp.dot(vb, wqkv_ref[2], preferred_element_type=jnp.float32)
        kp_s[...] = (kp + b_ref[1:2, :]).astype(jnp.bfloat16)
        vp_s[...] = (vp + b_ref[2:3, :]).astype(jnp.bfloat16)

    # Q projection for this query block; fold the 1/sqrt(d_k) scale into Q.
    qb = q_ref[0].astype(jnp.bfloat16)
    qp = jnp.dot(qb, wqkv_ref[0], preferred_element_type=jnp.float32)
    qp_s[...] = ((qp + b_ref[0:1, :]) * scale).astype(jnp.bfloat16)

    # Initialize the output accumulator with the output-projection bias so no
    # epilogue bias-add is needed.
    acc_s[...] = jnp.broadcast_to(b_ref[3:4, :], acc_s.shape)

    for hd in range(num_heads):                               # static unroll
        sl = pl.ds(hd * d_k, d_k)
        qh = qp_s[:, sl]                                      # (TQ, d_k) bf16
        kh = kp_s[:, sl]                                      # (S,  d_k) bf16
        vh = vp_s[:, sl]                                      # (S,  d_k) bf16

        # scores = (q / sqrt(d_k)) @ k^T   (NT matmul on the MXU, f32 acc)
        s = lax.dot_general(qh, kh, (((1,), (1,)), ((), ())),
                            preferred_element_type=jnp.float32)   # (TQ, S)
        # Softmax math kept in f32 (v5e has no bf16 VPU/EUP path).
        s = s - jnp.max(s, axis=-1, keepdims=True)
        p = jnp.exp(s)                                        # unnormalized
        denom = jnp.sum(p, axis=-1, keepdims=True)            # (TQ, 1)

        # Deferred normalization: normalize the (TQ, d_k) head output rather
        # than the (TQ, S) probability matrix; divide -> EUP approx reciprocal.
        acc_h = jnp.dot(p.astype(jnp.bfloat16), vh,
                        preferred_element_type=jnp.float32)   # (TQ, d_k)
        acc_h = acc_h * pl.reciprocal(denom, approx=True)

        # Per-head accumulation straight through the matching Wo row-slice --
        # no lane-dim head concat; output stays 128-lane dense.
        acc_s[...] += jnp.dot(acc_h.astype(jnp.bfloat16), wo_ref[sl, :],
                              preferred_element_type=jnp.float32)
        # TODO(synk): training-mode dropout on p would need pltpu.prng_seed /
        # prng_random_bits; eval mode (identity) is implemented here.

    o_ref[0] = acc_s[...].astype(o_ref.dtype)


def prepare_mha_params(params):
    """One-time packing (hoisted out of the per-call path).

    params = ((wq,bq),(wk,bk),(wv,bv),(wo,bo)); each w is (D, D) in 'x @ w'
    layout (transpose of PyTorch nn.Linear.weight), each b is (D,)."""
    (wq, bq), (wk, bk), (wv, bv), (wo, bo) = params
    wqkv = jnp.stack([wq, wk, wv], axis=0).astype(jnp.bfloat16)      # (3, D, D)
    wo_b = wo.astype(jnp.bfloat16)                                   # (D, D)
    b_all = jnp.stack([bq, bk, bv, bo], axis=0).astype(jnp.float32)  # (4, D)
    return wqkv, wo_b, b_all


def multi_headed_attention_forward(query, key, value, packed_params, num_heads,
                                   mask=None, block_q=256):
    # TODO(synk): attention mask path not implemented in-kernel (module default
    # mask=None is supported).
    assert mask is None
    wqkv, wo_b, b_all = packed_params
    B, S, D = query.shape
    assert D % num_heads == 0 and D % 128 == 0
    d_k = D // num_heads

    # Query-block tiling keeps (TQ, S) scores + (TQ, D) accumulator bounded for
    # long sequences while K/V projections stay resident in VMEM.
    if S <= block_q:
        tq = S
    else:
        tq = block_q
        while S % tq != 0:
            tq //= 2
    n_q = S // tq

    kernel = functools.partial(_mha_kernel, num_heads=num_heads, d_k=d_k,
                               scale=1.0 / math.sqrt(d_k))
    return pl.pallas_call(
        kernel,
        out_shape=jax.ShapeDtypeStruct((B, S, D), query.dtype),
        grid=(B, n_q),
        in_specs=[
            pl.BlockSpec((1, tq, D), lambda b, q: (b, q, 0)),   # query block
            pl.BlockSpec((1, S, D), lambda b, q: (b, 0, 0)),    # key   (full)
            pl.BlockSpec((1, S, D), lambda b, q: (b, 0, 0)),    # value (full)
            pl.BlockSpec((3, D, D), lambda b, q: (0, 0, 0)),    # Wq/Wk/Wv bf16
            pl.BlockSpec((D, D), lambda b, q: (0, 0)),          # Wo bf16
            pl.BlockSpec((4, D), lambda b, q: (0, 0)),          # biases f32
        ],
        out_specs=pl.BlockSpec((1, tq, D), lambda b, q: (b, q, 0)),
        scratch_shapes=[
            pltpu.VMEM((tq, D), jnp.bfloat16),   # scaled Q projection
            pltpu.VMEM((S, D), jnp.bfloat16),    # K projection (resident)
            pltpu.VMEM((S, D), jnp.bfloat16),    # V projection (resident)
            pltpu.VMEM((tq, D), jnp.float32),    # output accumulator
        ],
        compiler_params=pltpu.CompilerParams(
            # Batch axis shards across TensorCores; q-block axis is arbitrary
            # because K/V scratch is filled at q-block 0 and reused after.
            dimension_semantics=("parallel", "arbitrary")),
    )(query, key, value, wqkv, wo_b, b_all)


def reference_forward(query, key, value, params, num_heads, mask=None):
    """Pure-JAX f32 reference mirroring the PyTorch module (eval mode)."""
    (wq, bq), (wk, bk), (wv, bv), (wo, bo) = params
    B, S, D = query.shape
    d_k = D // num_heads

    def split_heads(x):
        return x.reshape(B, S, num_heads, d_k).transpose(0, 2, 1, 3)

    q = split_heads(query @ wq + bq)
    k = split_heads(key @ wk + bk)
    v = split_heads(value @ wv + bv)
    scores = jnp.einsum('bhqd,bhkd->bhqk', q, k) / math.sqrt(d_k)
    if mask is not None:
        scores = jnp.where(mask[:, None] == 0, -1e9, scores)
    scores = scores - jnp.max(scores, axis=-1, keepdims=True)
    p = jnp.exp(scores)
    p = p / jnp.sum(p, axis=-1, keepdims=True)
    ctx = jnp.einsum('bhqk,bhkd->bhqd', p, v)
    ctx = ctx.transpose(0, 2, 1, 3).reshape(B, S, D)
    return ctx @ wo + bo


if __name__ == "__main__":
    # Lane-dense small shapes: d_model and seq are multiples of 128.
    B, S, D, H = 2, 128, 128, 4

    key0 = jax.random.PRNGKey(0)
    keys = jax.random.split(key0, 11)
    q = jax.random.normal(keys[0], (B, S, D), jnp.float32)
    k = jax.random.normal(keys[1], (B, S, D), jnp.float32)
    v = jax.random.normal(keys[2], (B, S, D), jnp.float32)

    def init_linear(kw, kb):
        bound = 1.0 / math.sqrt(D)
        w = jax.random.uniform(kw, (D, D), jnp.float32, -bound, bound)
        b = jax.random.uniform(kb, (D,), jnp.float32, -bound, bound)
        return w, b

    params = (init_linear(keys[3], keys[4]),
              init_linear(keys[5], keys[6]),
              init_linear(keys[7], keys[8]),
              init_linear(keys[9], keys[10]))

    packed = prepare_mha_params(params)      # stacked/bf16 once, not per call
    out = multi_headed_attention_forward(q, k, v, packed, H)
    out = jax.block_until_ready(out)

    ref = jax.block_until_ready(reference_forward(q, k, v, params, H))
    assert out.shape == (B, S, D), out.shape
    max_err = float(jnp.max(jnp.abs(out - ref)))
    # bf16 MXU operands + approx reciprocal => slightly looser tolerance.
    assert jnp.allclose(out, ref, atol=3e-2, rtol=3e-2), max_err

    print("KERNEL_OK")
</pallas_src>

<mosaic_0001>
module attributes {stable_mosaic.version = 11 : i64} {
  func.func @_mha_kernel(%arg0: i32, %arg1: i32, %arg2: memref<1x128x128xf32, #tpu.memory_space<vmem>>, %arg3: memref<1x128x128xf32, #tpu.memory_space<vmem>>, %arg4: memref<1x128x128xf32, #tpu.memory_space<vmem>>, %arg5: memref<3x128x128xbf16, #tpu.memory_space<vmem>>, %arg6: memref<128x128xbf16, #tpu.memory_space<vmem>>, %arg7: memref<4x128xf32, #tpu.memory_space<vmem>>, %arg8: memref<1x128x128xf32, #tpu.memory_space<vmem>>, %arg9: memref<128x128xbf16, #tpu.memory_space<vmem>>, %arg10: memref<128x128xbf16, #tpu.memory_space<vmem>>, %arg11: memref<128x128xbf16, #tpu.memory_space<vmem>>, %arg12: memref<128x128xf32, #tpu.memory_space<vmem>>) attributes {dimension_semantics = [#tpu.dimension_semantics<parallel>, #tpu.dimension_semantics<arbitrary>], iteration_bounds = array<i64: 2, 1>, scalar_prefetch = 0 : i64, scratch_operands = 4 : i64, tpu.core_type = #tpu.core_type<tc>, window_params = [{transform_indices = @transform_0, window_bounds = array<i64: 1, 128, 128>}, {transform_indices = @transform_1, window_bounds = array<i64: 1, 128, 128>}, {transform_indices = @transform_2, window_bounds = array<i64: 1, 128, 128>}, {pipeline_mode = #tpu.pipeline_mode<synchronous>, transform_indices = @transform_3, window_bounds = array<i64: 3, 128, 128>}, {pipeline_mode = #tpu.pipeline_mode<synchronous>, transform_indices = @transform_4, window_bounds = array<i64: 128, 128>}, {pipeline_mode = #tpu.pipeline_mode<synchronous>, transform_indices = @transform_5, window_bounds = array<i64: 4, 128>}, {transform_indices = @transform_6, window_bounds = array<i64: 1, 128, 128>}]} {
    %c0_i32 = arith.constant 0 : i32
    %0 = arith.cmpi eq, %arg1, %c0_i32 : i32
    %1 = arith.extui %0 : i1 to i32
    %c0_i32_0 = arith.constant 0 : i32
    %2 = arith.cmpi ne, %1, %c0_i32_0 : i32
    scf.if %2 {
      %c0_84 = arith.constant 0 : index
      %c0_85 = arith.constant 0 : index
      %c0_86 = arith.constant 0 : index
      %112 = vector.load %arg3[%c0_84, %c0_85, %c0_86] : memref<1x128x128xf32, #tpu.memory_space<vmem>>, vector<1x128x128xf32>
      %113 = vector.shape_cast %112 : vector<1x128x128xf32> to vector<128x128xf32>
      %114 = arith.truncf %113 : vector<128x128xf32> to vector<128x128xbf16>
      %c0_87 = arith.constant 0 : index
      %c0_88 = arith.constant 0 : index
      %c0_89 = arith.constant 0 : index
      %115 = vector.load %arg4[%c0_87, %c0_88, %c0_89] : memref<1x128x128xf32, #tpu.memory_space<vmem>>, vector<1x128x128xf32>
      %116 = vector.shape_cast %115 : vector<1x128x128xf32> to vector<128x128xf32>
      %117 = arith.truncf %116 : vector<128x128xf32> to vector<128x128xbf16>
      %c1 = arith.constant 1 : index
      %c0_90 = arith.constant 0 : index
      %c0_91 = arith.constant 0 : index
      %118 = vector.load %arg5[%c1, %c0_90, %c0_91] : memref<3x128x128xbf16, #tpu.memory_space<vmem>>, vector<1x128x128xbf16>
      %119 = vector.shape_cast %118 : vector<1x128x128xbf16> to vector<128x128xbf16>
      %cst_92 = arith.constant dense<0.000000e+00> : vector<128x128xf32>
      %120 = tpu.matmul %114, %119, %cst_92 {dimension_numbers = #tpu.dot_dimension_numbers<[1], [0], [0], [1], [0, 0, 1, 1], [], []>} : vector<128x128xbf16>, vector<128x128xbf16>, vector<128x128xf32> -> vector<128x128xf32>
      %c2 = arith.constant 2 : index
      %c0_93 = arith.constant 0 : index
      %c0_94 = arith.constant 0 : index
      %121 = vector.load %arg5[%c2, %c0_93, %c0_94] : memref<3x128x128xbf16, #tpu.memory_space<vmem>>, vector<1x128x128xbf16>
      %122 = vector.shape_cast %121 : vector<1x128x128xbf16> to vector<128x128xbf16>
      %cst_95 = arith.constant dense<0.000000e+00> : vector<128x128xf32>
      %123 = tpu.matmul %117, %122, %cst_95 {dimension_numbers = #tpu.dot_dimension_numbers<[1], [0], [0], [1], [0, 0, 1, 1], [], []>} : vector<128x128xbf16>, vector<128x128xbf16>, vector<128x128xf32> -> vector<128x128xf32>
      %c1_96 = arith.constant 1 : index
      %c0_97 = arith.constant 0 : index
      %124 = vector.load %arg7[%c1_96, %c0_97] : memref<4x128xf32, #tpu.memory_space<vmem>>, vector<1x128xf32>
      %125 = vector.broadcast %124 : vector<1x128xf32> to vector<128x128xf32>
      %126 = arith.addf %120, %125 : vector<128x128xf32>
      %127 = arith.truncf %126 : vector<128x128xf32> to vector<128x128xbf16>
      %c0_98 = arith.constant 0 : index
      %c0_99 = arith.constant 0 : index
      %128 = vector.load %arg10[%c0_98, %c0_99] : memref<128x128xbf16, #tpu.memory_space<vmem>>, vector<128x128xbf16>
      tpu.vector_store %arg10[%c0_98, %c0_99], %127 {strides = array<i32>} : memref<128x128xbf16, #tpu.memory_space<vmem>>, vector<128x128xbf16>,
      %c2_100 = arith.constant 2 : index
      %c0_101 = arith.constant 0 : index
      %129 = vector.load %arg7[%c2_100, %c0_101] : memref<4x128xf32, #tpu.memory_space<vmem>>, vector<1x128xf32>
      %130 = vector.broadcast %129 : vector<1x128xf32> to vector<128x128xf32>
      %131 = arith.addf %123, %130 : vector<128x128xf32>
      %132 = arith.truncf %131 : vector<128x128xf32> to vector<128x128xbf16>
      %c0_102 = arith.constant 0 : index
      %c0_103 = arith.constant 0 : index
      %133 = vector.load %arg11[%c0_102, %c0_103] : memref<128x128xbf16, #tpu.memory_space<vmem>>, vector<128x128xbf16>
      tpu.vector_store %arg11[%c0_102, %c0_103], %132 {strides = array<i32>} : memref<128x128xbf16, #tpu.memory_space<vmem>>, vector<128x128xbf16>,
    } else {
    }
    %c0 = arith.constant 0 : index
    %c0_1 = arith.constant 0 : index
    %c0_2 = arith.constant 0 : index
    %3 = vector.load %arg2[%c0, %c0_1, %c0_2] : memref<1x128x128xf32, #tpu.memory_space<vmem>>, vector<1x128x128xf32>
    %4 = vector.shape_cast %3 : vector<1x128x128xf32> to vector<128x128xf32>
    %5 = arith.truncf %4 : vector<128x128xf32> to vector<128x128xbf16>
    %c0_3 = arith.constant 0 : index
    %c0_4 = arith.constant 0 : index
    %c0_5 = arith.constant 0 : index
    %6 = vector.load %arg5[%c0_3, %c0_4, %c0_5] : memref<3x128x128xbf16, #tpu.memory_space<vmem>>, vector<1x128x128xbf16>
    %7 = vector.shape_cast %6 : vector<1x128x128xbf16> to vector<128x128xbf16>
    %cst = arith.constant dense<0.000000e+00> : vector<128x128xf32>
    %8 = tpu.matmul %5, %7, %cst {dimension_numbers = #tpu.dot_dimension_numbers<[1], [0], [0], [1], [0, 0, 1, 1], [], []>} : vector<128x128xbf16>, vector<128x128xbf16>, vector<128x128xf32> -> vector<128x128xf32>
    %c0_6 = arith.constant 0 : index
    %c0_7 = arith.constant 0 : index
    %9 = vector.load %arg7[%c0_6, %c0_7] : memref<4x128xf32, #tpu.memory_space<vmem>>, vector<1x128xf32>
    %10 = vector.broadcast %9 : vector<1x128xf32> to vector<128x128xf32>
    %11 = arith.addf %8, %10 : vector<128x128xf32>
    %cst_8 = arith.constant 0.176776692 : f32
    %12 = vector.broadcast %cst_8 : f32 to vector<128x128xf32>
    %13 = arith.mulf %11, %12 : vector<128x128xf32>
    %14 = arith.truncf %13 : vector<128x128xf32> to vector<128x128xbf16>
    %c0_9 = arith.constant 0 : index
    %c0_10 = arith.constant 0 : index
    %15 = vector.load %arg9[%c0_9, %c0_10] : memref<128x128xbf16, #tpu.memory_space<vmem>>, vector<128x128xbf16>
    tpu.vector_store %arg9[%c0_9, %c0_10], %14 {strides = array<i32>} : memref<128x128xbf16, #tpu.memory_space<vmem>>, vector<128x128xbf16>,
    %c3 = arith.constant 3 : index
    %c0_11 = arith.constant 0 : index
    %16 = vector.load %arg7[%c3, %c0_11] : memref<4x128xf32, #tpu.memory_space<vmem>>, vector<1x128xf32>
    %17 = vector.shape_cast %16 : vector<1x128xf32> to vector<1x128xf32>
    %18 = vector.broadcast %17 : vector<1x128xf32> to vector<128x128xf32>
    %c0_12 = arith.constant 0 : index
    %c0_13 = arith.constant 0 : index
    %19 = vector.load %arg12[%c0_12, %c0_13] : memref<128x128xf32, #tpu.memory_space<vmem>>, vector<128x128xf32>
    tpu.vector_store %arg12[%c0_12, %c0_13], %18 {strides = array<i32>} : memref<128x128xf32, #tpu.memory_space<vmem>>, vector<128x128xf32>,
    %c0_14 = arith.constant 0 : index
    %c0_15 = arith.constant 0 : index
    %20 = vector.load %arg9[%c0_14, %c0_15] : memref<128x128xbf16, #tpu.memory_space<vmem>>, vector<128x32xbf16>
    %c0_16 = arith.constant 0 : index
    %c0_17 = arith.constant 0 : index
    %21 = vector.load %arg10[%c0_16, %c0_17] : memref<128x128xbf16, #tpu.memory_space<vmem>>, vector<128x32xbf16>
    %c0_18 = arith.constant 0 : index
    %c0_19 = arith.constant 0 : index
    %22 = vector.load %arg11[%c0_18, %c0_19] : memref<128x128xbf16, #tpu.memory_space<vmem>>, vector<128x32xbf16>
    %cst_20 = arith.constant dense<0.000000e+00> : vector<128x128xf32>
    %23 = tpu.matmul %20, %21, %cst_20 {dimension_numbers = #tpu.dot_dimension_numbers<[1], [1], [0], [0], [0, 0, 1, 0], [], []>} : vector<128x32xbf16>, vector<128x32xbf16>, vector<128x128xf32> -> vector<128x128xf32>
    %cst_21 = arith.constant dense<0xFF800000> : vector<128xf32>
    %24 = vector.multi_reduction <maximumf>, %23, %cst_21 [1] : vector<128x128xf32> to vector<128xf32>
    %25 = vector.shape_cast %24 : vector<128xf32> to vector<128x1xf32>
    %26 = vector.broadcast %25 : vector<128x1xf32> to vector<128x128xf32>
    %27 = arith.subf %23, %26 : vector<128x128xf32>
    %28 = math.exp %27 : vector<128x128xf32>
    %cst_22 = arith.constant dense<0.000000e+00> : vector<128xf32>
    %29 = vector.multi_reduction <add>, %28, %cst_22 [1] : vector<128x128xf32> to vector<128xf32>
    %30 = vector.shape_cast %29 : vector<128xf32> to vector<128x1xf32>
    %31 = arith.truncf %28 : vector<128x128xf32> to vector<128x128xbf16>
    %cst_23 = arith.constant dense<0.000000e+00> : vector<128x32xf32>
    %32 = tpu.matmul %31, %22, %cst_23 {dimension_numbers = #tpu.dot_dimension_numbers<[1], [0], [0], [1], [0, 0, 1, 1], [], []>} : vector<128x128xbf16>, vector<128x32xbf16>, vector<128x32xf32> -> vector<128x32xf32>
    %33 = tpu.reciprocal %30 {approx = true} : vector<128x1xf32> -> vector<128x1xf32>
    %34 = vector.broadcast %33 : vector<128x1xf32> to vector<128x32xf32>
    %35 = arith.mulf %32, %34 : vector<128x32xf32>
    %c0_24 = arith.constant 0 : index
    %c0_25 = arith.constant 0 : index
    %36 = vector.load %arg12[%c0_24, %c0_25] : memref<128x128xf32, #tpu.memory_space<vmem>>, vector<128x128xf32>
    %37 = arith.truncf %35 : vector<128x32xf32> to vector<128x32xbf16>
    %c0_26 = arith.constant 0 : index
    %c0_27 = arith.constant 0 : index
    %38 = vector.load %arg6[%c0_26, %c0_27] : memref<128x128xbf16, #tpu.memory_space<vmem>>, vector<32x128xbf16>
    %cst_28 = arith.constant dense<0.000000e+00> : vector<128x128xf32>
    %39 = tpu.matmul %37, %38, %cst_28 {dimension_numbers = #tpu.dot_dimension_numbers<[1], [0], [0], [1], [0, 0, 1, 1], [], []>} : vector<128x32xbf16>, vector<32x128xbf16>, vector<128x128xf32> -> vector<128x128xf32>
    %40 = arith.addf %36, %39 : vector<128x128xf32>
    %c0_29 = arith.constant 0 : index
    %c0_30 = arith.constant 0 : index
    %41 = vector.load %arg12[%c0_29, %c0_30] : memref<128x128xf32, #tpu.memory_space<vmem>>, vector<128x128xf32>
    tpu.vector_store %arg12[%c0_29, %c0_30], %40 {strides = array<i32>} : memref<128x128xf32, #tpu.memory_space<vmem>>, vector<128x128xf32>,
    %c0_31 = arith.constant 0 : index
    %c32 = arith.constant 32 : index
    %42 = vector.load %arg9[%c0_31, %c32] : memref<128x128xbf16, #tpu.memory_space<vmem>>, vector<128x32xbf16>
    %c0_32 = arith.constant 0 : index
    %c32_33 = arith.constant 32 : index
    %43 = vector.load %arg10[%c0_32, %c32_33] : memref<128x128xbf16, #tpu.memory_space<vmem>>, vector<128x32xbf16>
    %c0_34 = arith.constant 0 : index
    %c32_35 = arith.constant 32 : index
    %44 = vector.load %arg11[%c0_34, %c32_35] : memref<128x128xbf16, #tpu.memory_space<vmem>>, vector<128x32xbf16>
    %cst_36 = arith.constant dense<0.000000e+00> : vector<128x128xf32>
    %45 = tpu.matmul %42, %43, %cst_36 {dimension_numbers = #tpu.dot_dimension_numbers<[1], [1], [0], [0], [0, 0, 1, 0], [], []>} : vector<128x32xbf16>, vector<128x32xbf16>, vector<128x128xf32> -> vector<128x128xf32>
    %cst_37 = arith.constant dense<0xFF800000> : vector<128xf32>
    %46 = vector.multi_reduction <maximumf>, %45, %cst_37 [1] : vector<128x128xf32> to vector<128xf32>
    %47 = vector.shape_cast %46 : vector<128xf32> to vector<128x1xf32>
    %48 = vector.broadcast %47 : vector<128x1xf32> to vector<128x128xf32>
    %49 = arith.subf %45, %48 : vector<128x128xf32>
    %50 = math.exp %49 : vector<128x128xf32>
    %cst_38 = arith.constant dense<0.000000e+00> : vector<128xf32>
    %51 = vector.multi_reduction <add>, %50, %cst_38 [1] : vector<128x128xf32> to vector<128xf32>
    %52 = vector.shape_cast %51 : vector<128xf32> to vector<128x1xf32>
    %53 = arith.truncf %50 : vector<128x128xf32> to vector<128x128xbf16>
    %cst_39 = arith.constant dense<0.000000e+00> : vector<128x32xf32>
    %54 = tpu.matmul %53, %44, %cst_39 {dimension_numbers = #tpu.dot_dimension_numbers<[1], [0], [0], [1], [0, 0, 1, 1], [], []>} : vector<128x128xbf16>, vector<128x32xbf16>, vector<128x32xf32> -> vector<128x32xf32>
    %55 = tpu.reciprocal %52 {approx = true} : vector<128x1xf32> -> vector<128x1xf32>
    %56 = vector.broadcast %55 : vector<128x1xf32> to vector<128x32xf32>
    %57 = arith.mulf %54, %56 : vector<128x32xf32>
    %c0_40 = arith.constant 0 : index
    %c0_41 = arith.constant 0 : index
    %58 = vector.load %arg12[%c0_40, %c0_41] : memref<128x128xf32, #tpu.memory_space<vmem>>, vector<128x128xf32>
    %59 = arith.truncf %57 : vector<128x32xf32> to vector<128x32xbf16>
    %c32_42 = arith.constant 32 : index
    %c0_43 = arith.constant 0 : index
    %60 = vector.load %arg6[%c32_42, %c0_43] : memref<128x128xbf16, #tpu.memory_space<vmem>>, vector<32x128xbf16>
    %cst_44 = arith.constant dense<0.000000e+00> : vector<128x128xf32>
    %61 = tpu.matmul %59, %60, %cst_44 {dimension_numbers = #tpu.dot_dimension_numbers<[1], [0], [0], [1], [0, 0, 1, 1], [], []>} : vector<128x32xbf16>, vector<32x128xbf16>, vector<128x128xf32> -> vector<128x128xf32>
    %62 = arith.addf %58, %61 : vector<128x128xf32>
    %c0_45 = arith.constant 0 : index
    %c0_46 = arith.constant 0 : index
    %63 = vector.load %arg12[%c0_45, %c0_46] : memref<128x128xf32, #tpu.memory_space<vmem>>, vector<128x128xf32>
    tpu.vector_store %arg12[%c0_45, %c0_46], %62 {strides = array<i32>} : memref<128x128xf32, #tpu.memory_space<vmem>>, vector<128x128xf32>,
    %c0_47 = arith.constant 0 : index
    %c64 = arith.constant 64 : index
    %64 = vector.load %arg9[%c0_47, %c64] : memref<128x128xbf16, #tpu.memory_space<vmem>>, vector<128x32xbf16>
    %c0_48 = arith.constant 0 : index
    %c64_49 = arith.constant 64 : index
    %65 = vector.load %arg10[%c0_48, %c64_49] : memref<128x128xbf16, #tpu.memory_space<vmem>>, vector<128x32xbf16>
    %c0_50 = arith.constant 0 : index
    %c64_51 = arith.constant 64 : index
    %66 = vector.load %arg11[%c0_50, %c64_51] : memref<128x128xbf16, #tpu.memory_space<vmem>>, vector<128x32xbf16>
    %cst_52 = arith.constant dense<0.000000e+00> : vector<128x128xf32>
    %67 = tpu.matmul %64, %65, %cst_52 {dimension_numbers = #tpu.dot_dimension_numbers<[1], [1], [0], [0], [0, 0, 1, 0], [], []>} : vector<128x32xbf16>, vector<128x32xbf16>, vector<128x128xf32> -> vector<128x128xf32>
    %cst_53 = arith.constant dense<0xFF800000> : vector<128xf32>
    %68 = vector.multi_reduction <maximumf>, %67, %cst_53 [1] : vector<128x128xf32> to vector<128xf32>
    %69 = vector.shape_cast %68 : vector<128xf32> to vector<128x1xf32>
    %70 = vector.broadcast %69 : vector<128x1xf32> to vector<128x128xf32>
    %71 = arith.subf %67, %70 : vector<128x128xf32>
    %72 = math.exp %71 : vector<128x128xf32>
    %cst_54 = arith.constant dense<0.000000e+00> : vector<128xf32>
    %73 = vector.multi_reduction <add>, %72, %cst_54 [1] : vector<128x128xf32> to vector<128xf32>
    %74 = vector.shape_cast %73 : vector<128xf32> to vector<128x1xf32>
    %75 = arith.truncf %72 : vector<128x128xf32> to vector<128x128xbf16>
    %cst_55 = arith.constant dense<0.000000e+00> : vector<128x32xf32>
    %76 = tpu.matmul %75, %66, %cst_55 {dimension_numbers = #tpu.dot_dimension_numbers<[1], [0], [0], [1], [0, 0, 1, 1], [], []>} : vector<128x128xbf16>, vector<128x32xbf16>, vector<128x32xf32> -> vector<128x32xf32>
    %77 = tpu.reciprocal %74 {approx = true} : vector<128x1xf32> -> vector<128x1xf32>
    %78 = vector.broadcast %77 : vector<128x1xf32> to vector<128x32xf32>
    %79 = arith.mulf %76, %78 : vector<128x32xf32>
    %c0_56 = arith.constant 0 : index
    %c0_57 = arith.constant 0 : index
    %80 = vector.load %arg12[%c0_56, %c0_57] : memref<128x128xf32, #tpu.memory_space<vmem>>, vector<128x128xf32>
    %81 = arith.truncf %79 : vector<128x32xf32> to vector<128x32xbf16>
    %c64_58 = arith.constant 64 : index
    %c0_59 = arith.constant 0 : index
    %82 = vector.load %arg6[%c64_58, %c0_59] : memref<128x128xbf16, #tpu.memory_space<vmem>>, vector<32x128xbf16>
    %cst_60 = arith.constant dense<0.000000e+00> : vector<128x128xf32>
    %83 = tpu.matmul %81, %82, %cst_60 {dimension_numbers = #tpu.dot_dimension_numbers<[1], [0], [0], [1], [0, 0, 1, 1], [], []>} : vector<128x32xbf16>, vector<32x128xbf16>, vector<128x128xf32> -> vector<128x128xf32>
    %84 = arith.addf %80, %83 : vector<128x128xf32>
    %c0_61 = arith.constant 0 : index
    %c0_62 = arith.constant 0 : index
    %85 = vector.load %arg12[%c0_61, %c0_62] : memref<128x128xf32, #tpu.memory_space<vmem>>, vector<128x128xf32>
    tpu.vector_store %arg12[%c0_61, %c0_62], %84 {strides = array<i32>} : memref<128x128xf32, #tpu.memory_space<vmem>>, vector<128x128xf32>,
    %c0_63 = arith.constant 0 : index
    %c96 = arith.constant 96 : index
    %86 = vector.load %arg9[%c0_63, %c96] : memref<128x128xbf16, #tpu.memory_space<vmem>>, vector<128x32xbf16>
    %c0_64 = arith.constant 0 : index
    %c96_65 = arith.constant 96 : index
    %87 = vector.load %arg10[%c0_64, %c96_65] : memref<128x128xbf16, #tpu.memory_space<vmem>>, vector<128x32xbf16>
    %c0_66 = arith.constant 0 : index
    %c96_67 = arith.constant 96 : index
    %88 = vector.load %arg11[%c0_66, %c96_67] : memref<128x128xbf16, #tpu.memory_space<vmem>>, vector<128x32xbf16>
    %cst_68 = arith.constant dense<0.000000e+00> : vector<128x128xf32>
    %89 = tpu.matmul %86, %87, %cst_68 {dimension_numbers = #tpu.dot_dimension_numbers<[1], [1], [0], [0], [0, 0, 1, 0], [], []>} : vector<128x32xbf16>, vector<128x32xbf16>, vector<128x128xf32> -> vector<128x128xf32>
    %cst_69 = arith.constant dense<0xFF800000> : vector<128xf32>
    %90 = vector.multi_reduction <maximumf>, %89, %cst_69 [1] : vector<128x128xf32> to vector<128xf32>
    %91 = vector.shape_cast %90 : vector<128xf32> to vector<128x1xf32>
    %92 = vector.broadcast %91 : vector<128x1xf32> to vector<128x128xf32>
    %93 = arith.subf %89, %92 : vector<128x128xf32>
    %94 = math.exp %93 : vector<128x128xf32>
    %cst_70 = arith.constant dense<0.000000e+00> : vector<128xf32>
    %95 = vector.multi_reduction <add>, %94, %cst_70 [1] : vector<128x128xf32> to vector<128xf32>
    %96 = vector.shape_cast %95 : vector<128xf32> to vector<128x1xf32>
    %97 = arith.truncf %94 : vector<128x128xf32> to vector<128x128xbf16>
    %cst_71 = arith.constant dense<0.000000e+00> : vector<128x32xf32>
    %98 = tpu.matmul %97, %88, %cst_71 {dimension_numbers = #tpu.dot_dimension_numbers<[1], [0], [0], [1], [0, 0, 1, 1], [], []>} : vector<128x128xbf16>, vector<128x32xbf16>, vector<128x32xf32> -> vector<128x32xf32>
    %99 = tpu.reciprocal %96 {approx = true} : vector<128x1xf32> -> vector<128x1xf32>
    %100 = vector.broadcast %99 : vector<128x1xf32> to vector<128x32xf32>
    %101 = arith.mulf %98, %100 : vector<128x32xf32>
    %c0_72 = arith.constant 0 : index
    %c0_73 = arith.constant 0 : index
    %102 = vector.load %arg12[%c0_72, %c0_73] : memref<128x128xf32, #tpu.memory_space<vmem>>, vector<128x128xf32>
    %103 = arith.truncf %101 : vector<128x32xf32> to vector<128x32xbf16>
    %c96_74 = arith.constant 96 : index
    %c0_75 = arith.constant 0 : index
    %104 = vector.load %arg6[%c96_74, %c0_75] : memref<128x128xbf16, #tpu.memory_space<vmem>>, vector<32x128xbf16>
    %cst_76 = arith.constant dense<0.000000e+00> : vector<128x128xf32>
    %105 = tpu.matmul %103, %104, %cst_76 {dimension_numbers = #tpu.dot_dimension_numbers<[1], [0], [0], [1], [0, 0, 1, 1], [], []>} : vector<128x32xbf16>, vector<32x128xbf16>, vector<128x128xf32> -> vector<128x128xf32>
    %106 = arith.addf %102, %105 : vector<128x128xf32>
    %c0_77 = arith.constant 0 : index
    %c0_78 = arith.constant 0 : index
    %107 = vector.load %arg12[%c0_77, %c0_78] : memref<128x128xf32, #tpu.memory_space<vmem>>, vector<128x128xf32>
    tpu.vector_store %arg12[%c0_77, %c0_78], %106 {strides = array<i32>} : memref<128x128xf32, #tpu.memory_space<vmem>>, vector<128x128xf32>,
    %c0_79 = arith.constant 0 : index
    %c0_80 = arith.constant 0 : index
    %108 = vector.load %arg12[%c0_79, %c0_80] : memref<128x128xf32, #tpu.memory_space<vmem>>, vector<128x128xf32>
    %c0_81 = arith.constant 0 : index
    %c0_82 = arith.constant 0 : index
    %c0_83 = arith.constant 0 : index
    %109 = vector.load %arg8[%c0_81, %c0_82, %c0_83] : memref<1x128x128xf32, #tpu.memory_space<vmem>>, vector<1x128x128xf32>
    %110 = vector.shape_cast %109 : vector<1x128x128xf32> to vector<128x128xf32>
    %111 = vector.shape_cast %108 : vector<128x128xf32> to vector<1x128x128xf32>
    tpu.vector_store %arg8[%c0_81, %c0_82, %c0_83], %111 {strides = array<i32>} : memref<1x128x128xf32, #tpu.memory_space<vmem>>, vector<1x128x128xf32>,
    return
  }
  func.func @transform_0(%arg0: i32, %arg1: i32) -> (i32, i32, i32) {
    %c0_i32 = arith.constant 0 : i32
    %c0_i32_0 = arith.constant 0 : i32
    return %arg0, %arg1, %c0_i32 : i32, i32, i32
  }
  func.func @transform_1(%arg0: i32, %arg1: i32) -> (i32, i32, i32) {
    %c0_i32 = arith.constant 0 : i32
    %c0_i32_0 = arith.constant 0 : i32
    %c0_i32_1 = arith.constant 0 : i32
    return %arg0, %c0_i32, %c0_i32_0 : i32, i32, i32
  }
  func.func @transform_2(%arg0: i32, %arg1: i32) -> (i32, i32, i32) {
    %c0_i32 = arith.constant 0 : i32
    %c0_i32_0 = arith.constant 0 : i32
    %c0_i32_1 = arith.constant 0 : i32
    return %arg0, %c0_i32, %c0_i32_0 : i32, i32, i32
  }
  func.func @transform_3(%arg0: i32, %arg1: i32) -> (i32, i32, i32) {
    %c0_i32 = arith.constant 0 : i32
    %c0_i32_0 = arith.constant 0 : i32
    %c0_i32_1 = arith.constant 0 : i32
    %c0_i32_2 = arith.constant 0 : i32
    return %c0_i32, %c0_i32_0, %c0_i32_1 : i32, i32, i32
  }
  func.func @transform_4(%arg0: i32, %arg1: i32) -> (i32, i32) {
    %c0_i32 = arith.constant 0 : i32
    %c0_i32_0 = arith.constant 0 : i32
    %c0_i32_1 = arith.constant 0 : i32
    return %c0_i32, %c0_i32_0 : i32, i32
  }
  func.func @transform_5(%arg0: i32, %arg1: i32) -> (i32, i32) {
    %c0_i32 = arith.constant 0 : i32
    %c0_i32_0 = arith.constant 0 : i32
    %c0_i32_1 = arith.constant 0 : i32
    return %c0_i32, %c0_i32_0 : i32, i32
  }
  func.func @transform_6(%arg0: i32, %arg1: i32) -> (i32, i32, i32) {
    %c0_i32 = arith.constant 0 : i32
    %c0_i32_0 = arith.constant 0 : i32
    return %arg0, %arg1, %c0_i32 : i32, i32, i32
  }
}

</mosaic_0001>

<bundles_post_ra>
// kernel: tpu_custom_call.1
= control target key start
LH: loop header
LB: loop body
LE: loop exit
PB: predicated region body
PF: predicated region fallthrough
CT: control target
= control target key end

     0   :  { %s6883_s0 = inlined_call_operand.hbm [shape: f32[2,128,128], index: 0, kind: input, shape index: {}]   ;;  %s6884_s1 = inlined_call_operand.hbm [shape: f32[2,128,128], index: 1, kind: input, shape index: {}]   ;;  %s6885_s2 = inlined_call_operand.hbm [shape: f32[2,128,128], index: 2, kind: input, shape index: {}]   ;;  %s6886_s3 = inlined_call_operand.hbm [shape: bf16[3,128,128], index: 3, kind: input, shape index: {}]   ;;  %s6887_s4 = inlined_call_operand.hbm [shape: bf16[128,128], index: 4, kind: input, shape index: {}]   ;;  %s6888_s5 = inlined_call_operand.vmem [shape: f32[4,128], index: 5, kind: input, shape index: {}]   ;;  %s6889_s6 = inlined_call_operand.hbm [shape: f32[2,128,128], index: 6, kind: output, shape index: {}]  }
   0x1   :  { %6913 = sst [smem:[#allocation25_spill]] %s6884_s1 }
   0x2   :  { %6914 = sst [smem:[#allocation26_spill]] %s6886_s3 }
   0x3   :  { %11 = vsyncpa [#allocation7], 0 }
   0x4   :  { %13 = vsyncpa [#allocation7 + $0x1], 0 }
   0x5   :  { %14 = vsyncpa [#allocation10], 0 }
   0x6   :  { %16 = vsyncpa [#allocation10 + $0x1], 0 }
   0x7   :  { %17 = vsyncpa [#allocation13], 0 }
   0x8   :  { %18 = vsyncpa [#allocation8], 0 }
   0x9   :  { %20 = vsyncpa [#allocation8 + $0x1], 0  ;;  %s5509_s21 = smov 0   ;;  %s5511_s22 = smov 0  }
   0xa   :  { %s5513_s23 = smov 0   ;;  %s5515_s24 = smov 0  }
   0xb   :  { %s5517_s25 = smov 0   ;;  %s5519_s26 = smov 0  }
   0xc LB: > { %6915 = sst [smem:[#allocation20_spill]] %s5453_s25  ;;  %s5540_s27 = sadd.s32 4294967295, %s5457_s26   ;;  %s5457_s26 = sphi %s5519_s26, %s26_s26   ;;  %s5453_s25 = sphi %s5517_s25, %s6957_s25   ;;  %s5449_s24 = sphi %s5515_s24, %s6956_s24   ;;  %s5445_s23 = sphi %s5513_s23, %s6960_s23   ;;  %s5441_s22 = sphi %s5511_s22, %s6959_s22   ;;  %s5437_s21 = sphi %s5509_s21, %s6958_s21  }
   0xd   : > { %6916 = sst [smem:[#allocation21_spill]] %s5457_s26  ;;  %s3941_s28 = sadd.s32 4294967294, %s5457_s26  }
   0xe   : > { %p54_p0 = scmp.ne.s32.totalorder %s5445_s23, %s5441_s22  ;;  %p55_p1 = scmp.eq.s32.totalorder %s5457_s26, 0 }
   0xf   : > { %p60_p2 = scmp.ne.s32.totalorder %s5441_s22, %s5437_s21  ;;  %p6890_p3 = scmp.eq.s32.totalorder %s5540_s27, 0 }
  0x10   : > { %p5549_p4 = por %p55_p1, %p54_p0  ;;  %p201_p5 = scmp.eq.s32.totalorder %s5540_s27, 1 }
  0x11   : > { %p5556_p6 = por %p6890_p3, %p60_p2  ;;  %p207_p7 = scmp.eq.s32.totalorder %s3941_s28, 1 }
  0x12   : > { %p5560_p8 = por %p201_p5, %p54_p0  ;;  %p3942_p9 = scmp.ge.s32.totalorder %s5457_s26, 1 }
  0x13   : > { %s6918_s30 = scalar_select %p5556_p6, 1, 0 }
  0x14   : > { %s6919_s7 = scalar_select %p5560_p8, 1, 0 }
  0x15   : > { %p5565_p10 = por %p207_p7, %p60_p2  ;;  %p214_p11 = scmp.lt.s32.totalorder %s5457_s26, 3 }
  0x16   : > { %s5459_s10 = smov [#allocation12]   ;;  %s38_s13 = sadd.s32 1, %s5453_s25 }
  0x17   : > { %s6920_s8 = scalar_select %p5565_p10, 1, 0 }
  0x18   : > { %p5570_p12 = pnand %p3942_p9, %p214_p11  ;;  %s226_s11 = sshll.u32 %s5459_s10, 4  ;;  %s5574_s11 = int_to_ptr.vmem [resolvable:$true] %s226_s11 }
  0x19   : > { %6921 = sst [smem:[#allocation22_spill]] %s6920_s8  ;;  %p5587_p2 = scmp.ge.s32.totalorder %s38_s13, 2 }
  0x1a   : > { %s6922_s9 = scalar_select %p5570_p12, 1, 0 }
  0x1b   : > { %p4847_p13 = pneg %p5570_p12  ;;  %s6925_s3 = sld [smem:[#allocation26_spill]] }
  0x1d   : > { %p5581_p1 = pnand %p4847_p13, %p6890_p3 }
  0x1f   : > { %s6923_s12 = scalar_select %p5581_p1, 1, 0 }
  0x20   : > { %p6900_p7 = pneg %p5581_p1 }
  0x21   : > { %s5221_s18 = scalar_lea.hbm %s6925_s3, 3072 }
  0x22   : > { %p5222_p5 = scmp.ne.s32.totalorder %s6925_s3, %s5221_s18  ;;  %p5228_p13 = scmp.lt.u32.totalorder %s5221_s18, %s6925_s3 }
  0x24   : > { %p5224_p9 = pnand %p6900_p7, %p5222_p5 }
  0x26   : > { %p5225_p11 = pneg %p5224_p9 }
  0x28   : > { %p5230_p0 = pnand %p5228_p13, %p5225_p11 }
  0x2a   : > { %5233 = shalt.err (!%p5230_p0)
}
  0x2b   : > { %s5234_s16 = scalar_lea.vmem %s5574_s11, 3072  ;;  %p5242_p6 = scmp.lt.s32.totalorder %s5574_s11, %s5574_s11 }
  0x2c   : > { %p5235_p3 = scmp.ne.s32.totalorder %s5574_s11, %s5234_s16  ;;  %p5243_p5 = scmp.lt.s32.totalorder %s5234_s16, %s5234_s16 }
  0x2e   : > { %p5237_p10 = pnand %p5235_p3, %p6900_p7  ;;  %p5244_p9 = por %p5243_p5, %p5242_p6 }
  0x30   : > { %p5238_p8 = pneg %p5237_p10 }
  0x32   : > { %p5245_p12 = pnand %p5244_p9, %p5238_p8 }
  0x34   : > { %5248 = shalt.err (!%p5245_p12)
}
  0x35   : > { %s6895_s17 = smov 64   ;;  %s6897_s18 = smov 4  }
  0x36   : > { %4850 = dma.hbm_to_vmem [thread:$0]  (!%p5581_p1), %s6925_s3, 3072, %s5574_s11, [#allocation13], %s6895_s17, %s6895_s17, %s6897_s18  }
  0x37   : > { %s6962_s13 = smov (%p5587_p2, %s38_s13), 0  ;;  %p4870_p3 = scmp.lt.s32.totalorder %s5457_s26, 2 }
  0x38   : > { %6926 = sst [smem:[#allocation23_spill]] %s6962_s13  ;;  %s6896_s28 = sand.u32 1, %s5445_s23  }
  0x39   : > { %s42_s10 = ssub.s32 %s5453_s25, %s6962_s13  ;;  %s5631_s16 = sshll.u32 %s6896_s28, 7 }
  0x3a   : > { %p45_p6 = scmp.eq.s32.totalorder %s42_s10, 0  ;;  %s5634_s14 = sshll.u32 %s5453_s25, 11 }
  0x3b   : > { %p5638_p8 = pnand %p4870_p3, %p5549_p4  ;;  %s6928_s11 = sadd.s32 1, %s5445_s23 }
  0x3c   : > { %s5645_s15 = scalar_select %p45_p6, %s5445_s23, %s6928_s11  }
  0x3d   : > { %s6927_s8 = scalar_select %p5638_p8, 1, 0 }
  0x3e   : > { %6929 = sst [smem:[#allocation24_spill]] %s5645_s15  ;;  %s279_s19 = sand.u32 1, %s5457_s26  }
  0x3f   : > { %s6930_s1 = sld [smem:[#allocation25_spill]]  ;;  %s283_s29 = scalar_lea.vmem [#allocation9], %s5631_s16 }
  0x40   : > { %s290_s10 = sshll.u32 %s283_s29, 4  ;;  %s5462_s18 = smov [#allocation14]   ;;  %s5655_s10 = int_to_ptr.vmem [resolvable:$true] %s290_s10 }
  0x41   : > { %s5657_s3 = sshll.u32 %s5462_s18, 4  ;;  %s5659_s13 = scalar_lea.sflag [#allocation10], %s279_s19  ;;  %s240_s3 = int_to_ptr.vmem [resolvable:$true] %s5657_s3 }
  0x42   : > { %p5665_p10 = pneg %p5638_p8 }
  0x44   : > { %s6931_s17 = scalar_select %p5665_p10, 1, 0 }
  0x45   : > { %s5652_s28 = scalar_lea.hbm %s6930_s1, %s5634_s14  ;;  %s5254_s25 = scalar_lea.hbm %s6930_s1, 4096 }
  0x46   : > { %s5249_s11 = scalar_lea.hbm %s5652_s28, 2048  ;;  %p5255_p2 = scmp.lt.u32.totalorder %s5652_s28, %s6930_s1 }
  0x47   : > { %p5250_p4 = scmp.ne.s32.totalorder %s5652_s28, %s5249_s11  ;;  %p5256_p11 = scmp.lt.u32.totalorder %s5254_s25, %s5249_s11 }
  0x48   : > { %p5258_p5 = scmp.lt.u32.totalorder %s5249_s11, %s5652_s28 }
  0x49   : > { %p5252_p12 = pnand %p5665_p10, %p5250_p4  ;;  %p5257_p13 = por %p5256_p11, %p5255_p2 }
  0x4b   : > { %p5253_p0 = pneg %p5252_p12  ;;  %p5259_p9 = por %p5258_p5, %p5257_p13 }
  0x4d   : > { %p5260_p3 = pnand %p5259_p9, %p5253_p0 }
  0x4f   : > { %5263 = shalt.err (!%p5260_p3)
}
  0x50   : > { %s5264_s19 = scalar_lea.vmem %s5655_s10, 2048  ;;  %s5463_s20 = smov [#allocation9]  }
  0x51   : > { %p5265_p6 = scmp.ne.s32.totalorder %s5655_s10, %s5264_s19  ;;  %s5269_s29 = sshll.u32 %s5463_s20, 4  ;;  %s5270_s29 = int_to_ptr.vmem [resolvable:$false] %s5269_s29 }
  0x52   : > { %s5271_s15 = scalar_lea.vmem %s5270_s29, 4096  ;;  %p5272_p7 = scmp.lt.s32.totalorder %s5655_s10, %s5270_s29 }
  0x53   : > { %p5267_p4 = pnand %p5265_p6, %p5665_p10  ;;  %p5273_p1 = scmp.lt.s32.totalorder %s5271_s15, %s5264_s19 }
  0x55   : > { %p5268_p12 = pneg %p5267_p4  ;;  %p5274_p2 = por %p5273_p1, %p5272_p7 }
  0x57   : > { %p5275_p11 = pnand %p5274_p2, %p5268_p12 }
  0x59   : > { %5278 = shalt.err (!%p5275_p11)
}
  0x5a   : > { %s6909_s25 = smov 128   ;;  %s6911_s11 = smov 8  }
  0x5b   : > { %4860 = dma.hbm_to_vmem [thread:$0]  (!%p5638_p8), %s5652_s28, 2048, %s5655_s10, %s5659_s13, %s6909_s25, %s6909_s25, %s6911_s11  }
  0x5c   : > { %s5279_s19 = scalar_lea.hbm %s6887_s4, 1024  ;;  %p6932_p7 = scmp.ne.s32.totalorder %s6923_s12, 0 }
  0x5d   : > { %p5280_p1 = scmp.ne.s32.totalorder %s6887_s4, %s5279_s19  ;;  %p5286_p9 = scmp.lt.u32.totalorder %s5279_s19, %s6887_s4 }
  0x5e   : > { %p6933_p0 = pneg %p6932_p7 }
  0x60   : > { %p5282_p13 = pnand %p5280_p1, %p6933_p0 }
  0x62   : > { %p5283_p5 = pneg %p5282_p13 }
  0x64   : > { %p5288_p3 = pnand %p5286_p9, %p5283_p5 }
  0x66   : > { %5291 = shalt.err (!%p5288_p3)
}
  0x67   : > { %s5292_s28 = scalar_lea.vmem %s240_s3, 1024  ;;  %p6934_p4 = pmov %p6933_p0 }
  0x68   : > { %p5293_p6 = scmp.ne.s32.totalorder %s240_s3, %s5292_s28  ;;  %p5300_p11 = scmp.lt.s32.totalorder %s240_s3, %s240_s3 }
  0x69   : > { %p5301_p8 = scmp.lt.s32.totalorder %s5292_s28, %s5292_s28 }
  0x6a   : > { %p5295_p12 = pnand %p5293_p6, %p6934_p4 }
  0x6b   : > { %p5302_p10 = por %p5301_p8, %p5300_p11 }
  0x6c   : > { %p5296_p2 = pneg %p5295_p12 }
  0x6e   : > { %p5303_p0 = pnand %p5302_p10, %p5296_p2 }
  0x70   : > { %5306 = shalt.err (!%p5303_p0)
}
  0x71   : > { %s6935_s10 = smov 4   ;;  %s6936_s18 = smov 64  }
  0x72   : > { %4853 = dma.hbm_to_vmem [thread:$0]  (!%p6932_p7), %s6887_s4, 1024, %s240_s3, [#allocation13], %s6936_s18, %s6936_s18, %s6935_s10  }
  0x73   : > { %s5720_s29 = scalar_lea.hbm %s6883_s0, %s5634_s14  ;;  %s260_s12 = scalar_lea.vmem [#allocation6], %s5631_s16 }
  0x74   : > { %s269_s15 = sshll.u32 %s260_s12, 4  ;;  %s5729_s26 = scalar_lea.hbm %s6885_s2, %s5634_s14  ;;  %s5723_s15 = int_to_ptr.vmem [resolvable:$true] %s269_s15 }
  0x75   : > { %s6937_s25 = sand.u32 1, %s5445_s23   ;;  %s5307_s10 = scalar_lea.hbm %s5720_s29, 2048 }
  0x76   : > { %s5733_s3 = scalar_lea.sflag [#allocation7], %s6937_s25  ;;  %p5308_p8 = scmp.ne.s32.totalorder %s5720_s29, %s5307_s10 }
  0x77   : > { %p6938_p10 = scmp.ne.s32.totalorder %s6931_s17, 0  ;;  %s5312_s19 = scalar_lea.hbm %s6883_s0, 4096 }
  0x78   : > { %p5313_p13 = scmp.lt.u32.totalorder %s5720_s29, %s6883_s0  ;;  %p5314_p5 = scmp.lt.u32.totalorder %s5312_s19, %s5307_s10 }
  0x79   : > { %p5310_p1 = pnand %p5308_p8, %p6938_p10  ;;  %p5316_p3 = scmp.lt.u32.totalorder %s5307_s10, %s5720_s29 }
  0x7a   : > { %p5315_p9 = por %p5314_p5, %p5313_p13 }
  0x7b   : > { %p5311_p7 = pneg %p5310_p1 }
  0x7c   : > { %p5317_p6 = por %p5316_p3, %p5315_p9 }
  0x7e   : > { %p5318_p4 = pnand %p5317_p6, %p5311_p7 }
  0x80   : > { %5321 = shalt.err (!%p5318_p4)
}
  0x81   : > { %s5322_s14 = scalar_lea.vmem %s5723_s15, 2048  ;;  %s5466_s25 = smov [#allocation6]  }
  0x82   : > { %p5323_p12 = scmp.ne.s32.totalorder %s5723_s15, %s5322_s14  ;;  %s5327_s28 = sshll.u32 %s5466_s25, 4  ;;  %s5328_s28 = int_to_ptr.vmem [resolvable:$false] %s5327_s28 }
  0x83   : > { %s5329_s11 = scalar_lea.vmem %s5328_s28, 4096  ;;  %p5330_p0 = scmp.lt.s32.totalorder %s5723_s15, %s5328_s28 }
  0x84   : > { %p5325_p2 = pnand %p5323_p12, %p6938_p10  ;;  %p5331_p8 = scmp.lt.s32.totalorder %s5329_s11, %s5322_s14 }
  0x86   : > { %p5326_p11 = pneg %p5325_p2  ;;  %p5332_p1 = por %p5331_p8, %p5330_p0 }
  0x88   : > { %p5333_p13 = pnand %p5332_p1, %p5326_p11 }
  0x8a   : > { %5336 = shalt.err (!%p5333_p13)
}
  0x8b   : > { %p6939_p7 = scmp.ne.s32.totalorder %s6927_s8, 0  ;;  %s6940_s1 = smov 8  }
  0x8c   : > { %s6941_s10 = smov 128   ;;  %s304_s18 = scalar_lea.vmem [#allocation11], %s5631_s16 }
  0x8d   : > { %4857 = dma.hbm_to_vmem [thread:$0]  (!%p6939_p7), %s5720_s29, 2048, %s5723_s15, %s5733_s3, %s6941_s10, %s6941_s10, %s6940_s1  }
  0x8e   : > { %s311_s20 = sshll.u32 %s304_s18, 4  ;;  %s5337_s19 = scalar_lea.hbm %s5729_s26, 2048  ;;  %s5761_s20 = int_to_ptr.vmem [resolvable:$true] %s311_s20 }
  0x8f   : > { %p5338_p5 = scmp.ne.s32.totalorder %s5729_s26, %s5337_s19  ;;  %s5342_s25 = scalar_lea.hbm %s6885_s2, 4096 }
  0x90   : > { %p5343_p6 = scmp.lt.u32.totalorder %s5729_s26, %s6885_s2  ;;  %p5344_p4 = scmp.lt.u32.totalorder %s5342_s25, %s5337_s19 }
  0x91   : > { %p5340_p9 = pnand %p5338_p5, %p6938_p10  ;;  %p5346_p2 = scmp.lt.u32.totalorder %s5337_s19, %s5729_s26 }
  0x92   : > { %p5345_p12 = por %p5344_p4, %p5343_p6 }
  0x93   : > { %p5341_p3 = pneg %p5340_p9 }
  0x94   : > { %p5347_p11 = por %p5346_p2, %p5345_p12 }
  0x96   : > { %p5348_p0 = pnand %p5347_p11, %p5341_p3 }
  0x98   : > { %5351 = shalt.err (!%p5348_p0)
}
  0x99   : > { %s5352_s16 = scalar_lea.vmem %s5761_s20, 2048  ;;  %s5467_s29 = smov [#allocation11]  }
  0x9a   : > { %p5353_p8 = scmp.ne.s32.totalorder %s5761_s20, %s5352_s16  ;;  %s5357_s15 = sshll.u32 %s5467_s29, 4  ;;  %s5358_s15 = int_to_ptr.vmem [resolvable:$false] %s5357_s15 }
  0x9b   : > { %s5359_s3 = scalar_lea.vmem %s5358_s15, 4096  ;;  %p5360_p5 = scmp.lt.s32.totalorder %s5761_s20, %s5358_s15 }
  0x9c   : > { %p5355_p1 = pnand %p5353_p8, %p6938_p10  ;;  %p5361_p9 = scmp.lt.s32.totalorder %s5359_s3, %s5352_s16 }
  0x9e   : > { %p5356_p13 = pneg %p5355_p1  ;;  %p5362_p6 = por %p5361_p9, %p5360_p5 }
  0xa0   : > { %p5363_p4 = pnand %p5362_p6, %p5356_p13 }
  0xa2   : > { %5366 = shalt.err (!%p5363_p4)
}
  0xa3   : > { %4863 = dma.hbm_to_vmem [thread:$0]  (!%p6939_p7), %s5729_s26, 2048, %s5761_s20, %s5659_s13, %s6941_s10, %s6941_s10, %s6940_s1  }
  0xa4   : > { %p6942_p10 = scmp.ne.s32.totalorder %s6922_s9, 0 }
  0xa5   : > { %s5791_s17 = sand.u32 (!%p6942_p10), 1, %s5441_s22   ;;  %p6943_p3 = scmp.ne.s32.totalorder (!%p6942_p10), %s6918_s30, 0 }
  0xa6   : > { %323 = sbr.rel (%p6942_p10) target bundleno = 2347 (0x92b), region = 44  ;;  %s5794_s18 = sshll.u32 (!%p6942_p10), %s5791_s17, 7 }
  0xa7   : > { %s326_s8 = scalar_lea.sflag (!%p6942_p10), [#allocation7], %s5791_s17  ;;  %s5798_s19 = scalar_lea.vmem (!%p6942_p10), [#allocation6], %s5794_s18 }
  0xad   : > { %5420 = dma.done.wait (%p6943_p3), %s326_s8, 2048  }
  0xae   : > { %5422 = vsyncadd (%p6943_p3), %s326_s8, 4294965248  ;;  %s334_s9 = sand.u32 1, %s5540_s27   ;;  %s5806_s26 = scalar_lea.vmem [#allocation9], %s5794_s18 }
  0xaf   : > { %s335_s13 = scalar_lea.sflag [#allocation10], %s334_s9 }
  0xb0   : > { %5424 = dma.done.wait (%p6943_p3), %s335_s13, 4096  }
  0xb1   : > { %5426 = vsyncadd (%p6943_p3), %s335_s13, 4294963200  ;;  %s5813_s1 = scalar_lea.vmem [#allocation11], %s5794_s18  ;;  %p6944_p7 = scmp.eq.s32.totalorder %s5540_s27, 0 }
  0xb3   : > { %5428 = dma.done.wait (%p6944_p7), [#allocation13], 4096   ;;  %p6945_p12 = pmov %p6944_p7 }
  0xb4   : > { %v4933_v0 = vld [vmem:[#allocation12 + $0x40] sm:$0xff]   ;;  %v4934_v1 = vld [vmem:[#allocation12 + $0x48] sm:$0xff]   ;;  %v4935_v2 = vld [vmem:[#allocation12 + $0x50] sm:$0xff]   ;;  %vm1082_vm0 = vcmask 261120   ;;  %s5468_s10 = smov 96   ;;  %s5469_s28 = smov 64  }
  0xb5   : > { %5430 = vsyncadd (%p6945_p12), [#allocation13], 4294963200  ;;  %4287 = vmatprep.subr.bf16.mxu0 %v4933_v0  ;;  %v4936_v3 = vld [vmem:[#allocation12 + $0x58] sm:$0xff]   ;;  %v401_v4 = vld [vmem:[%s5806_s26] sm:$0xff]  ;;  %s5470_s11 = smov 32   ;;  %s6809_s15 = scalar_lea.vmem [#allocation15], %s5794_s18 }
  0xb6   : > { %4288 = vmatpush3.bf16.msra.mxu0 %v4933_v0  ;;  %v402_v5 = vld [vmem:[%s5806_s26 + $0x8] sm:$0xff]  ;;  %v4937_v7 = vld [vmem:[#allocation12 + $0x60] sm:$0xff]   ;;  %v4939_v9 = vld [vmem:[#allocation12 + $0x70] sm:$0xff]   ;;  %s4070_s3 = sshll.u32 %s5449_s24, 11  ;;  %s3791_s18 = sshll.u32 %s6809_s15, 4  ;;  %s6831_s18 = int_to_ptr.vmem [resolvable:$true] %s3791_s18 }
  0xb7   : > { %4289 = vmatprep.subr.bf16.mxu0 %v4934_v1  ;;  %v417_v6 = vpack.c.bf16 %v402_v5, %v401_v4  ;;  %v4938_v8 = vld [vmem:[#allocation12 + $0x68] sm:$0xff]   ;;  %v4940_v10 = vld [vmem:[#allocation12 + $0x78] sm:$0xff]   ;;  %v403_v11 = vld [vmem:[%s5806_s26 + $0x10] sm:$0xff]  ;;  %s6829_s9 = scalar_lea.hbm %s6889_s6, %s4070_s3  ;;  %s3776_s24 = scalar_lea.sflag [#allocation8], %s5791_s17 }
  0xb8   : > { %v404_v12 = vld [vmem:[%s5806_s26 + $0x18] sm:$0xff]  ;;  %v405_v13 = vld [vmem:[%s5806_s26 + $0x20] sm:$0xff]  ;;  %v406_v14 = vld [vmem:[%s5806_s26 + $0x28] sm:$0xff]  ;;  %s5367_s13 = scalar_lea.vmem %s6831_s18, 2048  ;;  %p6950_p11 = scmp.ne.s32.totalorder %s6919_s7, 0 }
  0xb9   : > { %4303 = vmatprep.mubr.bf16.mxu0 %v417_v6  ;;  %v4941_v15 = vld [vmem:[#allocation12] sm:$0xff]   ;;  %v4950_v17 = vld [vmem:[#allocation12 + $0x88] sm:$0xff]   ;;  %v418_v18 = vpack.c.bf16 %v404_v12, %v403_v11  ;;  %v419_v19 = vpack.c.bf16 %v406_v14, %v405_v13  ;;  %v4951_v21 = vld [vmem:[#allocation12 + $0x90] sm:$0xff]   ;;  %p5368_p2 = scmp.ne.s32.totalorder %s6831_s18, %s5367_s13 }
  0xba   : > { %4290 = vmatpush3.bf16.msra.mxu0 %v4934_v1  ;;  %v4949_v16 = vld [vmem:[#allocation12 + $0x80] sm:$0xff]   ;;  %v4942_v20 = vld [vmem:[#allocation12 + $0x8] sm:$0xff]   ;;  %v407_v22 = vld [vmem:[%s5806_s26 + $0x30] sm:$0xff] }
  0xbb   : > { %4291 = vmatprep.subr.bf16.mxu0 %v4935_v2  ;;  %4319 = vmatprep.subr.bf16.mxu1 %v4949_v16  ;;  %v408_v23 = vld [vmem:[%s5806_s26 + $0x38] sm:$0xff]  ;;  %v409_v24 = vld [vmem:[%s5806_s26 + $0x40] sm:$0xff]  ;;  %v410_v25 = vld [vmem:[%s5806_s26 + $0x48] sm:$0xff]  ;;  %p5369_p0 = pnand %p5368_p2, %p6950_p11 }
  0xbc   : > { %4320 = vmatpush3.bf16.msra.mxu1 %v4949_v16  ;;  %v4943_v26 = vld [vmem:[#allocation12 + $0x10] sm:$0xff]   ;;  %v4952_v27 = vld [vmem:[#allocation12 + $0x98] sm:$0xff]   ;;  %v420_v28 = vpack.c.bf16 %v408_v23, %v407_v22  ;;  %v421_v29 = vpack.c.bf16 %v410_v25, %v409_v24  ;;  %v4953_v31 = vld [vmem:[#allocation12 + $0xa0] sm:$0xff]  }
  0xbd   : > { %4321 = vmatprep.subr.bf16.mxu1 %v4950_v17  ;;  %v4944_v30 = vld [vmem:[#allocation12 + $0x18] sm:$0xff]   ;;  %v411_v32 = vld [vmem:[%s5806_s26 + $0x50] sm:$0xff]  ;;  %v4954_v34 = vld [vmem:[#allocation12 + $0xa8] sm:$0xff]   ;;  %p5370_p8 = pneg %p5369_p0 }
  0xbe   : > { %4292 = vmatpush3.bf16.msra.mxu0 %v4935_v2  ;;  %v412_v33 = vld [vmem:[%s5806_s26 + $0x58] sm:$0xff]  ;;  %v4945_v35 = vld [vmem:[#allocation12 + $0x20] sm:$0xff]   ;;  %v414_v37 = vld [vmem:[%s5806_s26 + $0x68] sm:$0xff] }
  0xbf   : > { %4293 = vmatprep.subr.bf16.mxu0 %v4936_v3  ;;  %v413_v36 = vld [vmem:[%s5806_s26 + $0x60] sm:$0xff]  ;;  %v422_v38 = vpack.c.bf16 %v412_v33, %v411_v32  ;;  %v4946_v40 = vld [vmem:[#allocation12 + $0x28] sm:$0xff]   ;;  %v4955_v41 = vld [vmem:[#allocation12 + $0xb0] sm:$0xff]  }
  0xc0   : > { %4322 = vmatpush3.bf16.msra.mxu1 %v4950_v17  ;;  %v423_v39 = vpack.c.bf16 %v414_v37, %v413_v36  ;;  %v415_v42 = vld [vmem:[%s5806_s26 + $0x70] sm:$0xff]  ;;  %v416_v43 = vld [vmem:[%s5806_s26 + $0x78] sm:$0xff]  ;;  %v815_v46 = vld [vmem:[%s5798_s19] sm:$0xff]  ;;  %s5471_s26 = smov [#allocation15]  }
  0xc1   : > { %4323 = vmatprep.subr.bf16.mxu1 %v4951_v21  ;;  %v4956_v44 = vld [vmem:[#allocation12 + $0xb8] sm:$0xff]   ;;  %v4947_v45 = vld [vmem:[#allocation12 + $0x30] sm:$0xff]   ;;  %v816_v47 = vld [vmem:[%s5798_s19 + $0x8] sm:$0xff]  ;;  %v424_v48 = vpack.c.bf16 %v416_v43, %v415_v42 }
  0xc2   : > { %4294 = vmatpush3.bf16.msra.mxu0 %v4936_v3  ;;  %v831_v49 = vpack.c.bf16 %v816_v47, %v815_v46  ;;  %v4948_v50 = vld [vmem:[#allocation12 + $0x38] sm:$0xff]   ;;  %v817_v51 = vld [vmem:[%s5798_s19 + $0x10] sm:$0xff]  ;;  %v819_v53 = vld [vmem:[%s5798_s19 + $0x20] sm:$0xff] }
  0xc3   : > { %4295 = vmatprep.subr.bf16.mxu0 %v4937_v7  ;;  %v818_v52 = vld [vmem:[%s5798_s19 + $0x18] sm:$0xff]  ;;  %v820_v54 = vld [vmem:[%s5798_s19 + $0x28] sm:$0xff]  ;;  %v821_v57 = vld [vmem:[%s5798_s19 + $0x30] sm:$0xff] }
  0xc4   : > { %4324 = vmatpush3.bf16.msra.mxu1 %v4951_v21  ;;  %v832_v55 = vpack.c.bf16 %v818_v52, %v817_v51  ;;  %v833_v56 = vpack.c.bf16 %v820_v54, %v819_v53  ;;  %v822_v58 = vld [vmem:[%s5798_s19 + $0x38] sm:$0xff]  ;;  %v823_v59 = vld [vmem:[%s5798_s19 + $0x40] sm:$0xff]  ;;  %v824_v60 = vld [vmem:[%s5798_s19 + $0x48] sm:$0xff] }
  0xc5   : > { %4325 = vmatprep.subr.bf16.mxu1 %v4952_v27  ;;  %v834_v61 = vpack.c.bf16 %v822_v58, %v821_v57  ;;  %v835_v62 = vpack.c.bf16 %v824_v60, %v823_v59  ;;  %v825_v63 = vld [vmem:[%s5798_s19 + $0x50] sm:$0xff]  ;;  %v826_v0 = vld [vmem:[%s5798_s19 + $0x58] sm:$0xff]  ;;  %v827_v1 = vld [vmem:[%s5798_s19 + $0x60] sm:$0xff] }
  0xc6   : > { %4296 = vmatpush3.bf16.msra.mxu0 %v4937_v7  ;;  %v828_v2 = vld [vmem:[%s5798_s19 + $0x68] sm:$0xff]  ;;  %v836_v3 = vpack.c.bf16 %v826_v0, %v825_v63  ;;  %v829_v5 = vld [vmem:[%s5798_s19 + $0x70] sm:$0xff]  ;;  %v830_v6 = vld [vmem:[%s5798_s19 + $0x78] sm:$0xff] }
  0xc7   : > { %4297 = vmatprep.subr.bf16.mxu0 %v4938_v8  ;;  %v837_v4 = vpack.c.bf16 %v828_v2, %v827_v1  ;;  %v838_v7 = vpack.c.bf16 %v830_v6, %v829_v5  ;;  %v427_v11 = vld [vmem:[%s5813_s1 + $0x10] sm:$0xff]  ;;  %v428_v12 = vld [vmem:[%s5813_s1 + $0x18] sm:$0xff]  ;;  %v429_v14 = vld [vmem:[%s5813_s1 + $0x20] sm:$0xff] }
  0xc8   : > { %4326 = vmatpush3.bf16.msra.mxu1 %v4952_v27  ;;  %v442_v13 = vpack.c.bf16 %v428_v12, %v427_v11  ;;  %v431_v16 = vld [vmem:[%s5813_s1 + $0x30] sm:$0xff]  ;;  %v434_v21 = vld [vmem:[%s5813_s1 + $0x48] sm:$0xff]  ;;  %v436_v24 = vld [vmem:[%s5813_s1 + $0x58] sm:$0xff] }
  0xc9   : > { %4327 = vmatprep.subr.bf16.mxu1 %v4953_v31  ;;  %v435_v22 = vld [vmem:[%s5813_s1 + $0x50] sm:$0xff]  ;;  %v438_v27 = vld [vmem:[%s5813_s1 + $0x68] sm:$0xff]  ;;  %v3962_v33 = vld [vmem:[%s6888_s5 + $0x1] ss:$0 sm:$0xff] }
  0xca   : > { %4298 = vmatpush3.bf16.msra.mxu0 %v4938_v8  ;;  %v425_v8 = vld [vmem:[%s5813_s1] sm:$0xff]  ;;  %v446_v25 = vpack.c.bf16 %v436_v24, %v435_v22 }
  0xcb   : > { %4299 = vmatprep.subr.bf16.mxu0 %v4939_v9  ;;  %v5915_v12 = vld [vmem:[%s6888_s5] ss:$0 sm:$0xff] }
  0xcc   : > { %4328 = vmatpush3.bf16.msra.mxu1 %v4953_v31 }
  0xcd   : > { %4329 = vmatprep.subr.bf16.mxu1 %v4954_v34 }
  0xce   : > { %4300 = vmatpush3.bf16.msra.mxu0 %v4939_v9  ;;  %v426_v9 = vld [vmem:[%s5813_s1 + $0x8] sm:$0xff] }
  0xcf   : > { %4301 = vmatprep.subr.bf16.mxu0 %v4940_v10 }
  0xd0   : > { %4330 = vmatpush3.bf16.msra.mxu1 %v4954_v34 }
  0xd1   : > { %4331 = vmatprep.subr.bf16.mxu1 %v4955_v41 }
  0xd2   : > { %4302 = vmatpush3.bf16.msra.mxu0 %v4940_v10  ;;  %v441_v10 = vpack.c.bf16 %v426_v9, %v425_v8 }
  0xd3   : > { %4351 = vmatprep.subr.bf16.mxu0 %v4941_v15 }
  0xd4   : > { %4332 = vmatpush3.bf16.msra.mxu1 %v4955_v41  ;;  %4335 = vmatprep.mubr.bf16.mxu1 %v441_v10 }
  0xd5   : > { %4304 = vmatmul.mubr.bf16.vlgmr.msra.gmra.mrb[0].mxu0 %v418_v18  ;;  %4333 = vmatprep.subr.bf16.mxu1 %v4956_v44  ;;  %v432_v18 = vld [vmem:[%s5813_s1 + $0x38] sm:$0xff] }
  0xd6   : > { %4307 = vmatprep.mubr.bf16.mxu0 %v419_v19  ;;  %4352 = vmatpush3.bf16.msra.mxu0 %v4941_v15  ;;  %v430_v15 = vld [vmem:[%s5813_s1 + $0x28] sm:$0xff]  ;;  %v444_v19 = vpack.c.bf16 %v432_v18, %v431_v16 }
  0xd7   : > { %4353 = vmatprep.subr.bf16.mxu0 %v4942_v20  ;;  %v443_v17 = vpack.c.bf16 %v430_v15, %v429_v14 }
  0xd8   : > { %4334 = vmatpush3.bf16.msra.mxu1 %v4956_v44 }
  0xda   : > { %4354 = vmatpush3.bf16.msra.mxu0 %v4942_v20  ;;  %v433_v20 = vld [vmem:[%s5813_s1 + $0x40] sm:$0xff] }
  0xdb   : > { %4355 = vmatprep.subr.bf16.mxu0 %v4943_v26  ;;  %4336 = vmatmul.mubr.bf16.vlgmr.msra.gmra.mrb[0].mxu1 %v442_v13  ;;  %v445_v23 = vpack.c.bf16 %v434_v21, %v433_v20 }
  0xdc   : > { %4339 = vmatprep.mubr.bf16.mxu1 %v443_v17 }
  0xdd   : > { %4308 = vmatmul.mubr.bf16.gmra.mrb[4].mxu0 %v420_v28  ;;  %v439_v28 = vld [vmem:[%s5813_s1 + $0x70] sm:$0xff] }
  0xde   : > { %4311 = vmatprep.mubr.bf16.mxu0 %v421_v29  ;;  %4356 = vmatpush3.bf16.msra.mxu0 %v4943_v26  ;;  %v437_v26 = vld [vmem:[%s5813_s1 + $0x60] sm:$0xff] }
  0xdf   : > { %4357 = vmatprep.subr.bf16.mxu0 %v4944_v30  ;;  %v447_v29 = vpack.c.bf16 %v438_v27, %v437_v26 }
  0xe2   : > { %4358 = vmatpush3.bf16.msra.mxu0 %v4944_v30  ;;  %v440_v30 = vld [vmem:[%s5813_s1 + $0x78] sm:$0xff]  ;;  %s5371_s1 = sshll.u32 %s5471_s26, 4  ;;  %s5372_s1 = int_to_ptr.vmem [resolvable:$false] %s5371_s1 }
  0xe3   : > { %4359 = vmatprep.subr.bf16.mxu0 %v4945_v35  ;;  %4340 = vmatmul.mubr.bf16.gmra.mrb[4].mxu1 %v444_v19  ;;  %v448_v31 = vpack.c.bf16 %v440_v30, %v439_v28  ;;  %s5373_s27 = scalar_lea.vmem %s5372_s1, 4096  ;;  %p5374_p1 = scmp.lt.s32.totalorder %s6831_s18, %s5372_s1 }
  0xe4   : > { %4343 = vmatprep.mubr.bf16.mxu1 %v445_v23  ;;  %p5375_p13 = scmp.lt.s32.totalorder %s5373_s27, %s5367_s13 }
  0xe5   : > { %4312 = vmatmul.mubr.bf16.gmra.mrb[8].mxu0 %v422_v38 }
  0xe6   : > { %4360 = vmatpush3.bf16.msra.mxu0 %v4945_v35  ;;  %4315 = vmatprep.mubr.bf16.mxu0 %v423_v39  ;;  %p5376_p5 = por %p5375_p13, %p5374_p1 }
  0xe7   : > { %4361 = vmatprep.subr.bf16.mxu0 %v4946_v40 }
  0xe8   : > { %p5377_p9 = pnand %p5376_p5, %p5370_p8 }
  0xea   : > { %4362 = vmatpush3.bf16.msra.mxu0 %v4946_v40 }
  0xeb   : > { %4363 = vmatprep.subr.bf16.mxu0 %v4947_v45  ;;  %4344 = vmatmul.mubr.bf16.gmra.mrb[8].mxu1 %v446_v25 }
  0xec   : > { %4347 = vmatprep.mubr.bf16.mxu1 %v447_v29 }
  0xed   : > { %4316 = vmatmul.mubr.bf16.gmra.mrb[12].mxu0 %v424_v48 }
  0xee   : > { %4364 = vmatpush3.bf16.msra.mxu0 %v4947_v45  ;;  %4367 = vmatprep.mubr.bf16.mxu0 %v831_v49 }
  0xef   : > { %4365 = vmatprep.subr.bf16.mxu0 %v4948_v50 }
  0xf2   : > { %4366 = vmatpush3.bf16.msra.mxu0 %v4948_v50 }
  0xf3   : > { %4348 = vmatmul.mubr.bf16.gmra.mrb[12].mxu1 %v448_v31 }
  0xf5   : > { %4368 = vmatmul.mubr.bf16.vlgmr.msra.gmra.mrb[16].mxu0 %v832_v55 }
  0xf6   : > { %4371 = vmatprep.mubr.bf16.mxu0 %v833_v56 }
  0xfd   : > { %4372 = vmatmul.mubr.bf16.gmra.mrb[20].mxu0 %v834_v61 }
  0xfe   : > { %4375 = vmatprep.mubr.bf16.mxu0 %v835_v62 }
 0x105   : > { %4376 = vmatmul.mubr.bf16.gmra.mrb[24].mxu0 %v836_v3 }
 0x106   : > { %4379 = vmatprep.mubr.bf16.mxu0 %v837_v4 }
 0x10d   : > { %4380 = vmatmul.mubr.bf16.gmra.mrb[28].mxu0 %v838_v7 }
 0x1a8   : > { %v4305_v32 = vpop.f32.mrb[0].mxu0 }
 0x1a9   : > { %v570_v34 = vpop.f32.mrb[1].mxu0  ;;  %v579_v36 = vadd.f32 %v4305_v32, %v3962_v33 }
 0x1aa   : > { %v4306_v35 = vpop.f32.mrb[2].mxu0  ;;  %v571_v39 = vadd.f32 %v3962_v33, %v570_v34 }
 0x1ab   : > { %v582_v37 = vadd.f32 %v4306_v35, %v3962_v33  ;;  %v573_v38 = vpop.f32.mrb[3].mxu0 }
 0x1ac   : > { %v574_v40 = vadd.f32 %v3962_v33, %v573_v38 }
 0x1ad   : > { %v5870_v41 = vpack.c.bf16 %v582_v37, %v579_v36 }
 0x1ae   : > { %v5872_v42 = vpack.c.bf16 %v574_v40, %v571_v39 }
 0x1af   : > { %v1111_v54 = vsel %vm1082_vm0, %v5870_v41, 0 }
 0x1b0   : > { %1726 = vrot.lane.b32.xlu0 %v5872_v42, %s5468_s10  ;;  %4799 = vmatprep.subr.msk.bf16.mxu1 %vm1082_vm0, %v5872_v42  ;;  %v4309_v43 = vpop.f32.mrb[4].mxu0  ;;  %v1108_v44 = vsel %vm1082_vm0, %v5872_v42, 0 }
 0x1b1   : > { %v595_v45 = vadd.f32 %v4309_v43, %v3962_v33  ;;  %4384 = vmatpush3.bf16.xpose.msra.mxu1 %v1108_v44  ;;  %v586_v46 = vpop.f32.mrb[5].mxu0 }
 0x1b2   : > { %v587_v47 = vadd.f32 %v3962_v33, %v586_v46  ;;  %4800 = vmatprep.subr.msk.bf16.mxu1 %vm1082_vm0, %v5870_v41  ;;  %v4310_v48 = vpop.f32.mrb[6].mxu0 }
 0x1b3   : > { %v598_v49 = vadd.f32 %v4310_v48, %v3962_v33  ;;  %v589_v50 = vpop.f32.mrb[7].mxu0 }
 0x1b4   : > { %v590_v51 = vadd.f32 %v3962_v33, %v589_v50  ;;  %1728 = vrot.lane.b32.xlu0 %v5870_v41, %s5468_s10 }
 0x1b5   : > { %v5884_v52 = vpack.c.bf16 %v598_v49, %v595_v45 }
 0x1b6   : > { %v5886_v53 = vpack.c.bf16 %v590_v51, %v587_v47 }
 0x1b7   : > { %v1117_v13 = vsel %vm1082_vm0, %v5884_v52, 0 }
 0x1b8   : > { %1730 = vrot.lane.b32.xlu1 %v5886_v53, %s5468_s10  ;;  %v4313_v55 = vpop.f32.mrb[8].mxu0  ;;  %v1114_v1 = vsel %vm1082_vm0, %v5886_v53, 0 }
 0x1b9   : > { %4386 = vmatpush3.bf16.xpose.msra.mxu1 %v1111_v54  ;;  %v611_v56 = vadd.f32 %v4313_v55, %v3962_v33  ;;  %v602_v57 = vpop.f32.mrb[9].mxu0 }
 0x1ba   : > { %4801 = vmatprep.subr.msk.bf16.mxu1 %vm1082_vm0, %v5886_v53  ;;  %v603_v58 = vadd.f32 %v3962_v33, %v602_v57  ;;  %v4314_v59 = vpop.f32.mrb[10].mxu0 }
 0x1bb   : > { %v614_v60 = vadd.f32 %v4314_v59, %v3962_v33  ;;  %v605_v61 = vpop.f32.mrb[11].mxu0 }
 0x1bc   : > { %1732 = vrot.lane.b32.xlu1 %v5884_v52, %s5468_s10  ;;  %v606_v62 = vadd.f32 %v3962_v33, %v605_v61 }
 0x1bd   : > { %v5896_v63 = vpack.c.bf16 %v614_v60, %v611_v56 }
 0x1be   : > { %v5898_v0 = vpack.c.bf16 %v606_v62, %v603_v58 }
 0x1bf   : > { %v1123_v44 = vsel %vm1082_vm0, %v5896_v63, 0 }
 0x1c0   : > { %1736 = vrot.lane.b32.xlu1 %v5896_v63, %s5468_s10  ;;  %1734 = vrot.lane.b32.xlu0 %v5898_v0, %s5468_s10  ;;  %v4317_v2 = vpop.f32.mrb[12].mxu0  ;;  %v1120_v27 = vsel %vm1082_vm0, %v5898_v0, 0 }
 0x1c1   : > { %4388 = vmatpush3.bf16.xpose.msra.mxu1 %v1114_v1  ;;  %v627_v3 = vadd.f32 %v4317_v2, %v3962_v33  ;;  %v618_v4 = vpop.f32.mrb[13].mxu0 }
 0x1c2   : > { %4802 = vmatprep.subr.msk.bf16.mxu1 %vm1082_vm0, %v5884_v52  ;;  %v619_v5 = vadd.f32 %v3962_v33, %v618_v4  ;;  %v4318_v6 = vpop.f32.mrb[14].mxu0 }
 0x1c3   : > { %v630_v7 = vadd.f32 %v4318_v6, %v3962_v33  ;;  %v621_v8 = vpop.f32.mrb[15].mxu0 }
 0x1c4   : > { %v622_v9 = vadd.f32 %v3962_v33, %v621_v8 }
 0x1c5   : > { %v5908_v10 = vpack.c.bf16 %v630_v7, %v627_v3 }
 0x1c6   : > { %v5910_v11 = vpack.c.bf16 %v622_v9, %v619_v5 }
 0x1c7   : > { %1740 = vrot.lane.b32.xlu1 %v5908_v10, %s5468_s10 }
 0x1c8   : > { %1738 = vrot.lane.b32.xlu0 %v5910_v11, %s5468_s10  ;;  %v4369_v14 = vpop.f32.mrb[16].mxu0  ;;  %v1126_v61 = vsel %vm1082_vm0, %v5910_v11, 0 }
 0x1c9   : > { %4390 = vmatpush3.bf16.xpose.msra.mxu1 %v1117_v13  ;;  %v951_v15 = vadd.f32 %v4369_v14, %v5915_v12  ;;  %v942_v16 = vpop.f32.mrb[17].mxu0 }
 0x1ca   : > { %4803 = vmatprep.subr.msk.bf16.mxu1 %vm1082_vm0, %v5898_v0  ;;  %v943_v17 = vadd.f32 %v5915_v12, %v942_v16  ;;  %v4370_v18 = vpop.f32.mrb[18].mxu0 }
 0x1cb   : > { %v1007_v19 = vmul.f32 0.17677669, %v951_v15  ;;  %v954_v20 = vadd.f32 %v4370_v18, %v5915_v12  ;;  %v945_v21 = vpop.f32.mrb[19].mxu0 }
 0x1cc   : > { %v1005_v22 = vmul.f32 0.17677669, %v943_v17  ;;  %v946_v23 = vadd.f32 %v5915_v12, %v945_v21  ;;  %v1129_v17 = vsel %vm1082_vm0, %v5908_v10, 0 }
 0x1cd   : > { %v1008_v24 = vmul.f32 0.17677669, %v954_v20 }
 0x1ce   : > { %v1006_v25 = vmul.f32 0.17677669, %v946_v23 }
 0x1cf   : > { %v5929_v26 = vpack.c.bf16 %v1008_v24, %v1007_v19  ;;  %v4337_v19 = vpop.f32.mrb[0].mxu1 }
 0x1d0   : > { %v5933_v28 = vpack.c.bf16 %v1006_v25, %v1005_v22  ;;  %v4373_v29 = vpop.f32.mrb[20].mxu0  ;;  %v736_v21 = vpop.f32.mrb[1].mxu1 }
 0x1d1   : > { %4392 = vmatpush3.bf16.xpose.msra.mxu1 %v1120_v27  ;;  %v967_v30 = vadd.f32 %v4373_v29, %v5915_v12  ;;  %v958_v31 = vpop.f32.mrb[21].mxu0  ;;  %1704 = vrot.lane.b32.xlu1 %v5929_v26, %s5468_s10  ;;  %v4338_v23 = vpop.f32.mrb[2].mxu1 }
 0x1d2   : > { %4804 = vmatprep.subr.msk.bf16.mxu1 %vm1082_vm0, %v5896_v63  ;;  %v959_v32 = vadd.f32 %v5915_v12, %v958_v31  ;;  %v4374_v33 = vpop.f32.mrb[22].mxu0  ;;  %4399 = vmatprep.mubr.msk.bf16.mxu1 %vm1082_vm0, %v5933_v28  ;;  %v739_v25 = vpop.f32.mrb[3].mxu1 }
 0x1d3   : > { %v1011_v34 = vmul.f32 0.17677669, %v967_v30  ;;  %v970_v35 = vadd.f32 %v4374_v33, %v5915_v12  ;;  %1702 = vrot.lane.b32.xlu0 %v5933_v28, %s5468_s10  ;;  %v961_v36 = vpop.f32.mrb[23].mxu0  ;;  %v4341_v31 = vpop.f32.mrb[4].mxu1 }
 0x1d4   : > { %v1009_v37 = vmul.f32 0.17677669, %v959_v32  ;;  %v962_v38 = vadd.f32 %v5915_v12, %v961_v36 }
 0x1d5   : > { %v1012_v39 = vmul.f32 0.17677669, %v970_v35 }
 0x1d6   : > { %v1010_v40 = vmul.f32 0.17677669, %v962_v38 }
 0x1d7   : > { %v5947_v43 = vpack.c.bf16 %v1012_v39, %v1011_v34  ;;  %v752_v34 = vpop.f32.mrb[5].mxu1 }
 0x1d8   : > { %v5951_v45 = vpack.c.bf16 %v1010_v40, %v1009_v37  ;;  %v4377_v46 = vpop.f32.mrb[24].mxu0  ;;  %v4342_v37 = vpop.f32.mrb[6].mxu1 }
 0x1d9   : > { %4394 = vmatpush3.bf16.xpose.msra.mxu1 %v1123_v44  ;;  %v983_v47 = vadd.f32 %v4377_v46, %v5915_v12  ;;  %v974_v48 = vpop.f32.mrb[25].mxu0  ;;  %1708 = vrot.lane.b32.xlu1 %v5947_v43, %s5468_s10  ;;  %v755_v39 = vpop.f32.mrb[7].mxu1 }
 0x1da   : > { %4805 = vmatprep.subr.msk.bf16.mxu1 %vm1082_vm0, %v5910_v11  ;;  %v975_v49 = vadd.f32 %v5915_v12, %v974_v48  ;;  %v4378_v50 = vpop.f32.mrb[26].mxu0  ;;  %1706 = vrot.lane.b32.xlu0 %v5951_v45, %s5468_s10  ;;  %v4345_v48 = vpop.f32.mrb[8].mxu1 }
 0x1db   : > { %v1015_v51 = vmul.f32 0.17677669, %v983_v47  ;;  %v986_v54 = vadd.f32 %v4378_v50, %v5915_v12  ;;  %v977_v55 = vpop.f32.mrb[27].mxu0  ;;  %v768_v50 = vpop.f32.mrb[9].mxu1 }
 0x1dc   : > { %v1013_v56 = vmul.f32 0.17677669, %v975_v49  ;;  %v978_v57 = vadd.f32 %v5915_v12, %v977_v55  ;;  %v4346_v55 = vpop.f32.mrb[10].mxu1 }
 0x1dd   : > { %v1016_v58 = vmul.f32 0.17677669, %v986_v54 }
 0x1de   : > { %v1014_v59 = vmul.f32 0.17677669, %v978_v57 }
 0x1df   : > { %v5963_v60 = vpack.c.bf16 %v1016_v58, %v1015_v51  ;;  %v771_v58 = vpop.f32.mrb[11].mxu1 }
 0x1e0   : > { %v5967_v62 = vpack.c.bf16 %v1014_v59, %v1013_v56  ;;  %v4381_v1 = vpop.f32.mrb[28].mxu0 }
 0x1e1   : > { %4396 = vmatpush3.bf16.xpose.msra.mxu1 %v1126_v61  ;;  %v999_v2 = vadd.f32 %v4381_v1, %v5915_v12  ;;  %v990_v3 = vpop.f32.mrb[29].mxu0  ;;  %1712 = vrot.lane.b32.xlu1 %v5963_v60, %s5468_s10 }
 0x1e2   : > { %4806 = vmatprep.subr.msk.bf16.mxu1 %vm1082_vm0, %v5908_v10  ;;  %v991_v4 = vadd.f32 %v5915_v12, %v990_v3  ;;  %v4382_v5 = vpop.f32.mrb[30].mxu0  ;;  %1710 = vrot.lane.b32.xlu0 %v5967_v62, %s5468_s10 }
 0x1e3   : > { %v1019_v6 = vmul.f32 0.17677669, %v999_v2  ;;  %v1002_v7 = vadd.f32 %v4382_v5, %v5915_v12  ;;  %v993_v8 = vpop.f32.mrb[31].mxu0  ;;  %v4349_v2 = vpop.f32.mrb[12].mxu1 }
 0x1e4   : > { %v1017_v9 = vmul.f32 0.17677669, %v991_v4  ;;  %v994_v13 = vadd.f32 %v5915_v12, %v993_v8  ;;  %v6000_v12 = vld [vmem:[%s6888_s5 + $0x2] ss:$0 sm:$0xff]  ;;  %v784_v5 = vpop.f32.mrb[13].mxu1 }
 0x1e5   : > { %v1020_v14 = vmul.f32 0.17677669, %v1002_v7  ;;  %v745_v20 = vadd.f32 %v4337_v19, %v6000_v12  ;;  %v737_v22 = vadd.f32 %v6000_v12, %v736_v21  ;;  %v748_v24 = vadd.f32 %v4338_v23, %v6000_v12  ;;  %v4350_v8 = vpop.f32.mrb[14].mxu1 }
 0x1e6   : > { %v1018_v15 = vmul.f32 0.17677669, %v994_v13  ;;  %v740_v27 = vadd.f32 %v6000_v12, %v739_v25  ;;  %v761_v33 = vadd.f32 %v4341_v31, %v6000_v12  ;;  %v753_v36 = vadd.f32 %v6000_v12, %v752_v34  ;;  %v787_v13 = vpop.f32.mrb[15].mxu1 }
 0x1e7   : > { %v5979_v16 = vpack.c.bf16 %v1020_v14, %v1019_v6  ;;  %v6010_v29 = vpack.c.bf16 %v748_v24, %v745_v20  ;;  %v764_v38 = vadd.f32 %v4342_v37, %v6000_v12  ;;  %v756_v40 = vadd.f32 %v6000_v12, %v755_v39 }
 0x1e8   : > { %v5983_v18 = vpack.c.bf16 %v1018_v15, %v1017_v9  ;;  %v6012_v30 = vpack.c.bf16 %v740_v27, %v737_v22  ;;  %v777_v49 = vadd.f32 %v4345_v48, %v6000_v12  ;;  %v769_v54 = vadd.f32 %v6000_v12, %v768_v50 }
 0x1e9   : > { %4398 = vmatpush3.bf16.xpose.msra.mxu1 %v1129_v17  ;;  %1716 = vrot.lane.b32.xlu0 %v5979_v16, %s5468_s10  ;;  %v6026_v46 = vpack.c.bf16 %v764_v38, %v761_v33  ;;  %v6029_v47 = vpack.c.bf16 %v756_v40, %v753_v36  ;;  %v780_v57 = vadd.f32 %v4346_v55, %v6000_v12 }
 0x1ea   : > { %1714 = vrot.lane.b32.xlu1 %v5983_v18, %s5468_s10  ;;  %4415 = vmatprep.subr.bf16.mxu0 %v6012_v30  ;;  %v772_v59 = vadd.f32 %v6000_v12, %v771_v58  ;;  %v793_v4 = vadd.f32 %v4349_v2, %v6000_v12  ;;  %v785_v7 = vadd.f32 %v6000_v12, %v784_v5  ;;  %v6152_v5 = vld [vmem:[#allocation14] sm:$0xff]  }
 0x1eb   : > { %4416 = vmatpush3.bf16.msra.mxu0 %v6012_v30  ;;  %v6040_v61 = vpack.c.bf16 %v780_v57, %v777_v49  ;;  %v796_v9 = vadd.f32 %v4350_v8, %v6000_v12  ;;  %v788_v14 = vadd.f32 %v6000_v12, %v787_v13 }
 0x1ec   : > { %4417 = vmatprep.subr.bf16.mxu0 %v6010_v29  ;;  %v6043_v1 = vpack.c.bf16 %v772_v59, %v769_v54 }
 0x1ed   : > { %v6055_v15 = vpack.c.bf16 %v796_v9, %v793_v4  ;;  %v6057_v17 = vpack.c.bf16 %v788_v14, %v785_v7 }
 0x1ef   : > { %4418 = vmatpush3.bf16.msra.mxu0 %v6010_v29 }
 0x1f0   : > { %4400 = vmatmul.mubr.msk.bf16.vlgmr.msra.gmra.mrb[16].mxu1 %vm1082_vm0, %v5929_v26  ;;  %4419 = vmatprep.subr.bf16.mxu0 %v6029_v47 }
 0x1f1   : > { %4403 = vmatprep.mubr.msk.bf16.mxu1 %vm1082_vm0, %v5951_v45 }
 0x1f3   : > { %4420 = vmatpush3.bf16.msra.mxu0 %v6029_v47 }
 0x1f4   : > { %4421 = vmatprep.subr.bf16.mxu0 %v6026_v46 }
 0x1f7   : > { %4422 = vmatpush3.bf16.msra.mxu0 %v6026_v46 }
 0x1f8   : > { %4404 = vmatmul.mubr.msk.bf16.gmra.mrb[20].mxu1 %vm1082_vm0, %v5947_v43  ;;  %4423 = vmatprep.subr.bf16.mxu0 %v6043_v1 }
 0x1f9   : > { %4407 = vmatprep.mubr.msk.bf16.mxu1 %vm1082_vm0, %v5967_v62 }
 0x1fb   : > { %4424 = vmatpush3.bf16.msra.mxu0 %v6043_v1 }
 0x1fc   : > { %4425 = vmatprep.subr.bf16.mxu0 %v6040_v61 }
 0x1ff   : > { %4426 = vmatpush3.bf16.msra.mxu0 %v6040_v61 }
 0x200   : > { %4408 = vmatmul.mubr.msk.bf16.gmra.mrb[24].mxu1 %vm1082_vm0, %v5963_v60  ;;  %4427 = vmatprep.subr.bf16.mxu0 %v6057_v17 }
 0x201   : > { %4411 = vmatprep.mubr.msk.bf16.mxu1 %vm1082_vm0, %v5983_v18 }
 0x203   : > { %4428 = vmatpush3.bf16.msra.mxu0 %v6057_v17 }
 0x204   : > { %4429 = vmatprep.subr.bf16.mxu0 %v6055_v15 }
 0x207   : > { %4430 = vmatpush3.bf16.msra.mxu0 %v6055_v15 }
 0x208   : > { %4412 = vmatmul.mubr.msk.bf16.gmra.mrb[28].mxu1 %vm1082_vm0, %v5979_v16  ;;  %4447 = vmatprep.subr.bf16.mxu0 %v6152_v5 }
 0x222   : > { %v1727_v32 = vpop.permute.xlu0 %1726 }
 0x223   : > { %4807 = vmatprep.subr.msk.bf16.mxu1 %vm1082_vm0, %v1727_v32  ;;  %v1767_v35 = vsel %vm1082_vm0, %v1727_v32, 0 }
 0x224   : > { %4468 = vmatpush3.bf16.xpose.msra.mxu1 %v1767_v35 }
 0x226   : > { %v1729_v44 = vpop.permute.xlu0 %1728 }
 0x227   : > { %4808 = vmatprep.subr.msk.bf16.mxu1 %vm1082_vm0, %v1729_v44  ;;  %v1770_v51 = vsel %vm1082_vm0, %v1729_v44, 0 }
 0x22a   : > { %v1731_v56 = vpop.permute.xlu1 %1730 }
 0x22b   : > { %v1773_v3 = vsel %vm1082_vm0, %v1731_v56, 0 }
 0x22c   : > { %4470 = vmatpush3.bf16.xpose.msra.mxu1 %v1770_v51 }
 0x22d   : > { %4809 = vmatprep.subr.msk.bf16.mxu1 %vm1082_vm0, %v1731_v56 }
 0x22e   : > { %v1733_v6 = vpop.permute.xlu1 %1732 }
 0x22f   : > { %v1776_v20 = vsel %vm1082_vm0, %v1733_v6, 0 }
 0x232   : > { %v1735_v19 = vpop.permute.xlu0 %1734  ;;  %v1737_v22 = vpop.permute.xlu1 %1736 }
 0x233   : > { %v1779_v21 = vsel %vm1082_vm0, %v1735_v19, 0  ;;  %v1782_v24 = vsel %vm1082_vm0, %v1737_v22, 0 }
 0x234   : > { %4472 = vmatpush3.bf16.xpose.msra.mxu1 %v1773_v3 }
 0x235   : > { %4810 = vmatprep.subr.msk.bf16.mxu1 %vm1082_vm0, %v1733_v6 }
 0x239   : > { %v1741_v27 = vpop.permute.xlu1 %1740 }
 0x23a   : > { %v1739_v12 = vpop.permute.xlu0 %1738  ;;  %v1788_v31 = vsel %vm1082_vm0, %v1741_v27, 0 }
 0x23b   : > { %v1785_v25 = vsel %vm1082_vm0, %v1739_v12, 0 }
 0x23c   : > { %4474 = vmatpush3.bf16.xpose.msra.mxu1 %v1776_v20 }
 0x23d   : > { %4811 = vmatprep.subr.msk.bf16.mxu1 %vm1082_vm0, %v1735_v19 }
 0x243   : > { %v1705_v33 = vpop.permute.xlu1 %1704 }
 0x244   : > { %4476 = vmatpush3.bf16.xpose.msra.mxu1 %v1779_v21 }
 0x245   : > { %4812 = vmatprep.subr.msk.bf16.mxu1 %vm1082_vm0, %v1737_v22  ;;  %v1703_v23 = vpop.permute.xlu0 %1702 }
 0x246   : > { %4483 = vmatprep.mubr.msk.bf16.mxu1 %vm1082_vm0, %v1703_v23 }
 0x24b   : > { %v1709_v34 = vpop.permute.xlu1 %1708 }
 0x24c   : > { %4478 = vmatpush3.bf16.xpose.msra.mxu1 %v1782_v24  ;;  %v1707_v32 = vpop.permute.xlu0 %1706 }
 0x24d   : > { %4813 = vmatprep.subr.msk.bf16.mxu1 %vm1082_vm0, %v1739_v12 }
 0x253   : > { %v1713_v36 = vpop.permute.xlu1 %1712 }
 0x254   : > { %4480 = vmatpush3.bf16.xpose.msra.mxu1 %v1785_v25  ;;  %v1711_v35 = vpop.permute.xlu0 %1710 }
 0x255   : > { %4814 = vmatprep.subr.msk.bf16.mxu1 %vm1082_vm0, %v1741_v27 }
 0x25b   : > { %v1717_v38 = vpop.permute.xlu0 %1716 }
 0x25c   : > { %4482 = vmatpush3.bf16.xpose.msra.mxu1 %v1788_v31  ;;  %v1715_v37 = vpop.permute.xlu1 %1714 }
 0x263   : > { %4484 = vmatmul.mubr.msk.bf16.vlgmr.msra.gmra.mrb[32].mxu1 %vm1082_vm0, %v1705_v33 }
 0x264   : > { %4487 = vmatprep.mubr.msk.bf16.mxu1 %vm1082_vm0, %v1707_v32 }
 0x26b   : > { %4488 = vmatmul.mubr.msk.bf16.gmra.mrb[36].mxu1 %vm1082_vm0, %v1709_v34 }
 0x26c   : > { %4491 = vmatprep.mubr.msk.bf16.mxu1 %vm1082_vm0, %v1711_v35 }
 0x273   : > { %4492 = vmatmul.mubr.msk.bf16.gmra.mrb[40].mxu1 %vm1082_vm0, %v1713_v36 }
 0x274   : > { %4495 = vmatprep.mubr.msk.bf16.mxu1 %vm1082_vm0, %v1715_v37 }
 0x27b   : > { %4496 = vmatmul.mubr.msk.bf16.gmra.mrb[44].mxu1 %vm1082_vm0, %v1717_v38 }
 0x2c3   : > { %v6080_v39 = vpop.f32.mrb[16].mxu1 }
 0x2c4   : > { %1232 = vmax.xlane.f32.xlu0 %v6080_v39  ;;  %v6083_v40 = vpop.f32.mrb[17].mxu1 }
 0x2c5   : > { %v6085_v44 = vpop.f32.mrb[18].mxu1 }
 0x2c6   : > { %v6087_v48 = vpop.f32.mrb[19].mxu1 }
 0x2c7   : > { %1230 = vmax.xlane.f32.xlu1 %v6087_v48 }
 0x2c8   : > { %1228 = vmax.xlane.f32.xlu0 %v6083_v40 }
 0x2cb   : > { %v6091_v49 = vpop.f32.mrb[20].mxu1 }
 0x2cc   : > { %1234 = vmax.xlane.f32.xlu0 %v6085_v44  ;;  %1240 = vmax.xlane.f32.xlu1 %v6091_v49  ;;  %v6095_v50 = vpop.f32.mrb[21].mxu1 }
 0x2cd   : > { %v6097_v51 = vpop.f32.mrb[22].mxu1 }
 0x2ce   : > { %v6099_v54 = vpop.f32.mrb[23].mxu1 }
 0x2d0   : > { %1236 = vmax.xlane.f32.xlu1 %v6095_v50  ;;  %1238 = vmax.xlane.f32.xlu0 %v6099_v54 }
 0x2d3   : > { %v6103_v55 = vpop.f32.mrb[24].mxu1 }
 0x2d4   : > { %1242 = vmax.xlane.f32.xlu0 %v6097_v51  ;;  %1248 = vmax.xlane.f32.xlu1 %v6103_v55  ;;  %v6107_v56 = vpop.f32.mrb[25].mxu1 }
 0x2d5   : > { %v6109_v57 = vpop.f32.mrb[26].mxu1 }
 0x2d6   : > { %v6111_v58 = vpop.f32.mrb[27].mxu1 }
 0x2d8   : > { %1244 = vmax.xlane.f32.xlu1 %v6107_v56  ;;  %1246 = vmax.xlane.f32.xlu0 %v6111_v58 }
 0x2db   : > { %v6115_v59 = vpop.f32.mrb[28].mxu1 }
 0x2dc   : > { %1250 = vmax.xlane.f32.xlu0 %v6109_v57  ;;  %1256 = vmax.xlane.f32.xlu1 %v6115_v59  ;;  %v6119_v2 = vpop.f32.mrb[29].mxu1 }
 0x2dd   : > { %v6121_v3 = vpop.f32.mrb[30].mxu1 }
 0x2de   : > { %v6123_v4 = vpop.f32.mrb[31].mxu1 }
 0x2e0   : > { %1252 = vmax.xlane.f32.xlu1 %v6119_v2  ;;  %1254 = vmax.xlane.f32.xlu0 %v6123_v4 }
 0x2e4   : > { %1258 = vmax.xlane.f32.xlu0 %v6121_v3 }
 0x2f1   : > { %2417 = vrot.lane.b32.xlu1 %v5872_v42, %s5469_s28 }
 0x2f5   : > { %2421 = vrot.lane.b32.xlu1 %v5886_v53, %s5469_s28 }
 0x2f9   : > { %2423 = vrot.lane.b32.xlu1 %v5884_v52, %s5469_s28 }
 0x2fa   : > { %2419 = vrot.lane.b32.xlu0 %v5870_v41, %s5469_s28 }
 0x2fd   : > { %2427 = vrot.lane.b32.xlu1 %v5896_v63, %s5469_s28 }
 0x2fe   : > { %2425 = vrot.lane.b32.xlu0 %v5898_v0, %s5469_s28 }
 0x301   : > { %2393 = vrot.lane.b32.xlu1 %v5933_v28, %s5469_s28 }
 0x302   : > { %2429 = vrot.lane.b32.xlu0 %v5910_v11, %s5469_s28 }
 0x305   : > { %2397 = vrot.lane.b32.xlu1 %v5951_v45, %s5469_s28 }
 0x306   : > { %2431 = vrot.lane.b32.xlu0 %v5908_v10, %s5469_s28 }
 0x309   : > { %2403 = vrot.lane.b32.xlu1 %v5963_v60, %s5469_s28 }
 0x30a   : > { %2395 = vrot.lane.b32.xlu0 %v5929_v26, %s5469_s28 }
 0x30d   : > { %2405 = vrot.lane.b32.xlu1 %v5983_v18, %s5469_s28 }
 0x30e   : > { %2399 = vrot.lane.b32.xlu0 %v5947_v43, %s5469_s28 }
 0x311   : > { %2407 = vrot.lane.b32.xlu1 %v5979_v16, %s5469_s28 }
 0x312   : > { %2401 = vrot.lane.b32.xlu0 %v5967_v62, %s5469_s28 }
 0x315   : > { %2017 = vrot.lane.b32.xlu1 %v6010_v29, %s5468_s10 }
 0x316   : > { %2015 = vrot.lane.b32.xlu0 %v6012_v30, %s5468_s10 }
 0x319   : > { %2021 = vrot.lane.b32.xlu1 %v6026_v46, %s5468_s10 }
 0x31a   : > { %2019 = vrot.lane.b32.xlu0 %v6029_v47, %s5468_s10 }
 0x31d   : > { %2025 = vrot.lane.b32.xlu1 %v6040_v61, %s5468_s10 }
 0x31e   : > { %2023 = vrot.lane.b32.xlu0 %v6043_v1, %s5468_s10 }
 0x321   : > { %2029 = vrot.lane.b32.xlu1 %v6055_v15, %s5468_s10 }
 0x322   : > { %2027 = vrot.lane.b32.xlu0 %v6057_v17, %s5468_s10 }
 0x325   : > { %3108 = vrot.lane.b32.xlu1 %v5872_v42, %s5470_s11 }
 0x326   : > { %3110 = vrot.lane.b32.xlu0 %v5870_v41, %s5470_s11 }
 0x329   : > { %3112 = vrot.lane.b32.xlu1 %v5886_v53, %s5470_s11 }
 0x32a   : > { %3084 = vrot.lane.b32.xlu0 %v5933_v28, %s5470_s11 }
 0x32d   : > { %3114 = vrot.lane.b32.xlu1 %v5884_v52, %s5470_s11 }
 0x32e   : > { %3090 = vrot.lane.b32.xlu0 %v5947_v43, %s5470_s11 }
 0x331   : > { %3116 = vrot.lane.b32.xlu1 %v5898_v0, %s5470_s11 }
 0x335   : > { %3118 = vrot.lane.b32.xlu1 %v5896_v63, %s5470_s11 }
 0x336   : > { %v6195_v42 = vpop.f32.mrb[32].mxu1 }
 0x337   : > { %v6197_v41 = vpop.f32.mrb[33].mxu1 }
 0x338   : > { %v6199_v53 = vpop.f32.mrb[34].mxu1 }
 0x339   : > { %3120 = vrot.lane.b32.xlu1 %v5910_v11, %s5470_s11  ;;  %v6203_v28 = vpop.f32.mrb[35].mxu1 }
 0x33d   : > { %3122 = vrot.lane.b32.xlu1 %v5908_v10, %s5470_s11 }
 0x33e   : > { %v6207_v52 = vpop.f32.mrb[36].mxu1 }
 0x33f   : > { %v6209_v0 = vpop.f32.mrb[37].mxu1 }
 0x340   : > { %v6211_v43 = vpop.f32.mrb[38].mxu1 }
 0x341   : > { %3086 = vrot.lane.b32.xlu1 %v5929_v26, %s5470_s11  ;;  %v6215_v63 = vpop.f32.mrb[39].mxu1 }
 0x345   : > { %3088 = vrot.lane.b32.xlu1 %v5951_v45, %s5470_s11 }
 0x346   : > { %v6219_v11 = vpop.f32.mrb[40].mxu1 }
 0x347   : > { %v6221_v6 = vpop.f32.mrb[41].mxu1 }
 0x348   : > { %v6223_v7 = vpop.f32.mrb[42].mxu1 }
 0x349   : > { %v6225_v10 = vpop.f32.mrb[43].mxu1 }
 0x34d   : > { %1893 = vmax.xlane.f32.xlu0 %v6199_v53 }
 0x34e   : > { %v6228_v8 = vpop.f32.mrb[44].mxu1 }
 0x34f   : > { %v6230_v9 = vpop.f32.mrb[45].mxu1 }
 0x350   : > { %v6232_v26 = vpop.f32.mrb[46].mxu1 }
 0x351   : > { %v1233_v13 = vpop.xlane.xlu0 %1232  ;;  %1889 = vmax.xlane.f32.xlu0 %v6203_v28  ;;  %v6235_v45 = vpop.f32.mrb[47].mxu1 }
 0x352   : > { %v1262_v19 = vsub.f32 %v6080_v39, %v1233_v13 }
 0x354   : > { %v1231_v14 = vpop.xlane.xlu1 %1230  ;;  %v1280_v24 = vmul.f32 1.442695, %v1262_v19 }
 0x355   : > { %v1261_v20 = vsub.f32 %v6087_v48, %v1231_v14  ;;  %v1229_v12 = vpop.xlane.xlu0 %1228  ;;  %1899 = vmax.xlane.f32.xlu0 %v6207_v52 }
 0x356   : > { %v1260_v21 = vsub.f32 %v6083_v40, %v1229_v12 }
 0x357   : > { %v1278_v22 = vmul.f32 1.442695, %v1261_v20 }
 0x358   : > { %v1276_v23 = vmul.f32 1.442695, %v1260_v21 }
 0x359   : > { %4965 = vpow2.f32 %v1278_v22  ;;  %v1235_v25 = vpop.xlane.xlu0 %1234  ;;  %v1241_v27 = vpop.xlane.xlu1 %1240  ;;  %1897 = vmax.xlane.f32.xlu0 %v6215_v63 }
 0x35a   : > { %4967 = vpow2.f32 %v1276_v23  ;;  %v1263_v31 = vsub.f32 %v6085_v44, %v1235_v25  ;;  %v1266_v33 = vsub.f32 %v6091_v49, %v1241_v27 }
 0x35b   : > { %4969 = vpow2.f32 %v1280_v24 }
 0x35c   : > { %v1282_v32 = vmul.f32 1.442695, %v1263_v31  ;;  %v1288_v40 = vmul.f32 1.442695, %v1266_v33  ;;  %v4958_v33 = vld [vmem:[#allocation14 + $0x8] sm:$0xff]  }
 0x35d   : > { %v1237_v34 = vpop.xlane.xlu1 %1236  ;;  %v1239_v35 = vpop.xlane.xlu0 %1238  ;;  %1907 = vmax.xlane.f32.xlu0 %v6219_v11 }
 0x35e   : > { %4971 = vpow2.f32 %v1282_v32  ;;  %v1264_v36 = vsub.f32 %v6095_v50, %v1237_v34  ;;  %v1265_v37 = vsub.f32 %v6099_v54, %v1239_v35 }
 0x360   : > { %v1284_v38 = vmul.f32 1.442695, %v1264_v36  ;;  %v1286_v39 = vmul.f32 1.442695, %v1265_v37 }
 0x361   : > { %v1243_v48 = vpop.xlane.xlu0 %1242  ;;  %v1249_v13 = vpop.xlane.xlu1 %1248  ;;  %1905 = vmax.xlane.f32.xlu0 %v6225_v10 }
 0x362   : > { %4973 = vpow2.f32 %v1284_v38  ;;  %v1267_v44 = vsub.f32 %v6097_v51, %v1243_v48  ;;  %v1270_v50 = vsub.f32 %v6103_v55, %v1249_v13 }
 0x363   : > { %v4966_v49 = vpop.eup %4965  ;;  %4975 = vpow2.f32 %v1286_v39 }
 0x364   : > { %v6249_v14 = vpop.eup %4967  ;;  %v1290_v19 = vmul.f32 1.442695, %v1267_v44  ;;  %4977 = vpow2.f32 %v1288_v40  ;;  %v1296_v27 = vmul.f32 1.442695, %v1270_v50 }
 0x365   : > { %v1245_v20 = vpop.xlane.xlu1 %1244  ;;  %v1247_v54 = vpop.xlane.xlu0 %1246  ;;  %1915 = vmax.xlane.f32.xlu0 %v6228_v8  ;;  %v1340_v12 = vpack.c.bf16 %v4966_v49, %v6249_v14 }
 0x366   : > { %4979 = vpow2.f32 %v1290_v19  ;;  %v1268_v21 = vsub.f32 %v6107_v56, %v1245_v20  ;;  %v1269_v22 = vsub.f32 %v6111_v58, %v1247_v54  ;;  %v4970_v51 = vpop.eup %4969 }
 0x367   : > { %4431 = vmatprep.mubr.bf16.mxu0 %v1340_v12 }
 0x368   : > { %v6256_v23 = vpop.eup %4971  ;;  %v1292_v24 = vmul.f32 1.442695, %v1268_v21  ;;  %v1294_v25 = vmul.f32 1.442695, %v1269_v22 }
 0x369   : > { %v1251_v31 = vpop.xlane.xlu0 %1250  ;;  %v1257_v55 = vpop.xlane.xlu1 %1256  ;;  %1891 = vmax.xlane.f32.xlu1 %v6195_v42  ;;  %1913 = vmax.xlane.f32.xlu0 %v6235_v45  ;;  %v1341_v32 = vpack.c.bf16 %v6256_v23, %v4970_v51 }
 0x36a   : > { %4981 = vpow2.f32 %v1292_v24  ;;  %v1271_v56 = vsub.f32 %v6109_v57, %v1251_v31  ;;  %v1274_v36 = vsub.f32 %v6115_v59, %v1257_v55 }
 0x36b   : > { %4983 = vpow2.f32 %v1294_v25  ;;  %4432 = vmatmul.mubr.bf16.vlgmr.msra.gmra.mrb[32].mxu0 %v1341_v32 }
 0x36c   : > { %v6262_v58 = vpop.eup %4973  ;;  %v1298_v34 = vmul.f32 1.442695, %v1271_v56  ;;  %4448 = vmatpush3.bf16.msra.mxu0 %v6152_v5  ;;  %4985 = vpow2.f32 %v1296_v27  ;;  %v1304_v59 = vmul.f32 1.442695, %v1274_v36 }
 0x36d   : > { %v6265_v35 = vpop.eup %4975  ;;  %v1253_v37 = vpop.xlane.xlu1 %1252  ;;  %1887 = vmax.xlane.f32.xlu1 %v6197_v41  ;;  %1312 = vadd.xlane.f32.xlu0 %v4970_v51 }
 0x36e   : > { %v1255_v38 = vpop.xlane.xlu0 %1254  ;;  %4987 = vpow2.f32 %v1298_v34  ;;  %v1272_v57 = vsub.f32 %v6119_v2, %v1253_v37  ;;  %v1342_v40 = vpack.c.bf16 %v6265_v35, %v6262_v58  ;;  %4449 = vmatprep.subr.bf16.mxu0 %v4958_v33  ;;  %v4978_v5 = vpop.eup %4977 }
 0x36f   : > { %v1273_v39 = vsub.f32 %v6123_v4, %v1255_v38 }
 0x370   : > { %v6273_v48 = vpop.eup %4979  ;;  %v1300_v13 = vmul.f32 1.442695, %v1272_v57  ;;  %4435 = vmatprep.mubr.bf16.mxu0 %v1342_v40  ;;  %4450 = vmatpush3.bf16.msra.mxu0 %v4958_v33 }
 0x371   : > { %v1302_v44 = vmul.f32 1.442695, %v1273_v39  ;;  %v2418_v19 = vpop.permute.xlu1 %2417  ;;  %1895 = vmax.xlane.f32.xlu1 %v6209_v0  ;;  %1310 = vadd.xlane.f32.xlu0 %v4966_v49  ;;  %v1343_v2 = vpack.c.bf16 %v6273_v48, %v4978_v5 }
 0x372   : > { %v1259_v50 = vpop.xlane.xlu0 %1258  ;;  %4989 = vpow2.f32 %v1300_v13  ;;  %4815 = vmatprep.subr.msk.bf16.mxu1 %vm1082_vm0, %v2418_v19  ;;  %v2458_v20 = vsel %vm1082_vm0, %v2418_v19, 0 }
 0x373   : > { %v1275_v4 = vsub.f32 %v6121_v3, %v1259_v50  ;;  %4991 = vpow2.f32 %v1302_v44  ;;  %4436 = vmatmul.mubr.bf16.gmra.mrb[36].mxu0 %v1343_v2  ;;  %4552 = vmatpush3.bf16.xpose.msra.mxu1 %v2458_v20 }
 0x374   : > { %v6280_v54 = vpop.eup %4981  ;;  %4993 = vpow2.f32 %v1304_v59 }
 0x375   : > { %v1306_v12 = vmul.f32 1.442695, %v1275_v4  ;;  %v6282_v21 = vpop.eup %4983  ;;  %v2422_v22 = vpop.permute.xlu1 %2421  ;;  %1901 = vmax.xlane.f32.xlu1 %v6211_v43  ;;  %1320 = vadd.xlane.f32.xlu0 %v4978_v5 }
 0x376   : > { %v2420_v49 = vpop.permute.xlu0 %2419  ;;  %v1344_v3 = vpack.c.bf16 %v6282_v21, %v6280_v54  ;;  %v4986_v51 = vpop.eup %4985  ;;  %v2464_v5 = vsel %vm1082_vm0, %v2422_v22, 0 }
 0x377   : > { %4995 = vpow2.f32 %v1306_v12  ;;  %4816 = vmatprep.subr.msk.bf16.mxu1 %vm1082_vm0, %v2420_v49  ;;  %v2461_v55 = vsel %vm1082_vm0, %v2420_v49, 0 }
 0x378   : > { %v4988_v24 = vpop.eup %4987  ;;  %4439 = vmatprep.mubr.bf16.mxu0 %v1344_v3 }
 0x379   : > { %v2424_v25 = vpop.permute.xlu1 %2423  ;;  %1903 = vmax.xlane.f32.xlu1 %v6221_v6  ;;  %1328 = vadd.xlane.f32.xlu0 %v4986_v51  ;;  %v1345_v31 = vpack.c.bf16 %v4988_v24, %v4986_v51 }
 0x37a   : > { %v2426_v27 = vpop.permute.xlu0 %2425  ;;  %v2467_v50 = vsel %vm1082_vm0, %v2424_v25, 0 }
 0x37b   : > { %4440 = vmatmul.mubr.bf16.gmra.mrb[40].mxu0 %v1345_v31  ;;  %4554 = vmatpush3.bf16.xpose.msra.mxu1 %v2461_v55 }
 0x37c   : > { %v4990_v32 = vpop.eup %4989  ;;  %4817 = vmatprep.subr.msk.bf16.mxu1 %vm1082_vm0, %v2422_v22  ;;  %v2470_v22 = vsel %vm1082_vm0, %v2426_v27, 0 }
 0x37d   : > { %v4992_v56 = vpop.eup %4991  ;;  %v2428_v33 = vpop.permute.xlu1 %2427  ;;  %1909 = vmax.xlane.f32.xlu1 %v6223_v7 }
 0x37e   : > { %v2430_v34 = vpop.permute.xlu0 %2429  ;;  %v1346_v36 = vpack.c.bf16 %v4992_v56, %v4990_v32  ;;  %v4994_v37 = vpop.eup %4993 }
 0x380   : > { %4443 = vmatprep.mubr.bf16.mxu0 %v1346_v36 }
 0x381   : > { %v4996_v38 = vpop.eup %4995  ;;  %v2394_v57 = vpop.permute.xlu1 %2393  ;;  %1911 = vmax.xlane.f32.xlu1 %v6230_v9 }
 0x382   : > { %v2432_v39 = vpop.permute.xlu0 %2431  ;;  %1338 = vadd.xlane.f32.xlu0 %v4996_v38  ;;  %v1347_v40 = vpack.c.bf16 %v4996_v38, %v4994_v37  ;;  %4567 = vmatprep.mubr.msk.bf16.mxu1 %vm1082_vm0, %v2394_v57 }
 0x383   : > { %4556 = vmatpush3.bf16.xpose.msra.mxu1 %v2464_v5  ;;  %v2479_v51 = vsel %vm1082_vm0, %v2432_v39, 0 }
 0x384   : > { %4444 = vmatmul.mubr.bf16.gmra.mrb[44].mxu0 %v1347_v40  ;;  %4818 = vmatprep.subr.msk.bf16.mxu1 %vm1082_vm0, %v2424_v25 }
 0x385   : > { %v2398_v13 = vpop.permute.xlu1 %2397  ;;  %1917 = vmax.xlane.f32.xlu1 %v6232_v26 }
 0x386   : > { %v2396_v44 = vpop.permute.xlu0 %2395 }
 0x389   : > { %v2404_v59 = vpop.permute.xlu1 %2403  ;;  %1308 = vadd.xlane.f32.xlu1 %v6249_v14 }
 0x38a   : > { %v2400_v19 = vpop.permute.xlu0 %2399 }
 0x38b   : > { %4558 = vmatpush3.bf16.xpose.msra.mxu1 %v2467_v50 }
 0x38c   : > { %4819 = vmatprep.subr.msk.bf16.mxu1 %vm1082_vm0, %v2426_v27 }
 0x38d   : > { %v2406_v2 = vpop.permute.xlu1 %2405  ;;  %1314 = vadd.xlane.f32.xlu1 %v6256_v23 }
 0x38e   : > { %v2402_v4 = vpop.permute.xlu0 %2401 }
 0x391   : > { %v2408_v20 = vpop.permute.xlu1 %2407  ;;  %1316 = vadd.xlane.f32.xlu1 %v6262_v58  ;;  %v2473_v58 = vsel %vm1082_vm0, %v2428_v33, 0 }
 0x392   : > { %v6301_v12 = vpop.permute.xlu0 %2015 }
 0x393   : > { %4499 = vmatprep.subr.bf16.mxu0 %v6301_v12  ;;  %4560 = vmatpush3.bf16.xpose.msra.mxu1 %v2470_v22 }
 0x394   : > { %4820 = vmatprep.subr.msk.bf16.mxu1 %vm1082_vm0, %v2428_v33 }
 0x395   : > { %v6307_v14 = vpop.permute.xlu1 %2017  ;;  %1322 = vadd.xlane.f32.xlu1 %v6273_v48  ;;  %v2476_v48 = vsel %vm1082_vm0, %v2430_v34, 0 }
 0x396   : > { %v6320_v3 = vpop.permute.xlu0 %2019 }
 0x398   : > { %3094 = vrot.lane.b32.xlu0 %v5963_v60, %s5470_s11 }
 0x399   : > { %v6312_v23 = vpop.permute.xlu1 %2021  ;;  %1318 = vadd.xlane.f32.xlu1 %v6265_v35 }
 0x39a   : > { %v6327_v35 = vpop.permute.xlu0 %2023 }
 0x39b   : > { %4562 = vmatpush3.bf16.xpose.msra.mxu1 %v2473_v58 }
 0x39c   : > { %4821 = vmatprep.subr.msk.bf16.mxu1 %vm1082_vm0, %v2430_v34 }
 0x39d   : > { %1324 = vadd.xlane.f32.xlu1 %v6280_v54  ;;  %v6318_v49 = vpop.permute.xlu1 %2025 }
 0x39e   : > { %v6331_v25 = vpop.permute.xlu0 %2027 }
 0x3a1   : > { %1330 = vadd.xlane.f32.xlu1 %v4988_v24  ;;  %v6324_v60 = vpop.permute.xlu1 %2029 }
 0x3a2   : > { %v3111_v27 = vpop.permute.xlu0 %3110 }
 0x3a3   : > { %4564 = vmatpush3.bf16.xpose.msra.mxu1 %v2476_v48 }
 0x3a4   : > { %4822 = vmatprep.subr.msk.bf16.mxu1 %vm1082_vm0, %v2432_v39 }
 0x3a5   : > { %1326 = vadd.xlane.f32.xlu1 %v6282_v21  ;;  %v3109_v54 = vpop.permute.xlu1 %3108  ;;  %v3152_v21 = vsel %vm1082_vm0, %v3111_v27, 0 }
 0x3a6   : > { %v3149_v24 = vsel %vm1082_vm0, %v3109_v54, 0 }
 0x3a9   : > { %1336 = vadd.xlane.f32.xlu1 %v4994_v37  ;;  %v3113_v31 = vpop.permute.xlu1 %3112 }
 0x3aa   : > { %v3155_v55 = vsel %vm1082_vm0, %v3113_v31, 0 }
 0x3ab   : > { %4566 = vmatpush3.bf16.xpose.msra.mxu1 %v2479_v51 }
 0x3ac   : > { %4823 = vmatprep.subr.msk.bf16.mxu1 %vm1082_vm0, %v3109_v54 }
 0x3ad   : > { %1332 = vadd.xlane.f32.xlu1 %v4990_v32  ;;  %v3115_v32 = vpop.permute.xlu1 %3114 }
 0x3ae   : > { %v3158_v33 = vsel %vm1082_vm0, %v3115_v32, 0 }
 0x3b1   : > { %1334 = vadd.xlane.f32.xlu1 %v4992_v56  ;;  %v3085_v56 = vpop.permute.xlu0 %3084  ;;  %v3117_v34 = vpop.permute.xlu1 %3116 }
 0x3b2   : > { %4568 = vmatmul.mubr.msk.bf16.vlgmr.msra.gmra.mrb[48].mxu1 %vm1082_vm0, %v2396_v44 }
 0x3b3   : > { %4571 = vmatprep.mubr.msk.bf16.mxu1 %vm1082_vm0, %v2398_v13  ;;  %4636 = vmatpush3.bf16.xpose.msra.mxu1 %v3149_v24 }
 0x3b4   : > { %4824 = vmatprep.subr.msk.bf16.mxu1 %vm1082_vm0, %v3111_v27 }
 0x3b5   : > { %v3119_v36 = vpop.permute.xlu1 %3118  ;;  %v3091_v37 = vpop.permute.xlu0 %3090 }
 0x3b6   : > { %v3164_v38 = vsel %vm1082_vm0, %v3119_v36, 0 }
 0x3b9   : > { %v3121_v57 = vpop.permute.xlu1 %3120 }
 0x3ba   : > { %4572 = vmatmul.mubr.msk.bf16.gmra.mrb[52].mxu1 %vm1082_vm0, %v2400_v19  ;;  %v3167_v40 = vsel %vm1082_vm0, %v3121_v57, 0 }
 0x3bb   : > { %4575 = vmatprep.mubr.msk.bf16.mxu1 %vm1082_vm0, %v2402_v4  ;;  %4638 = vmatpush3.bf16.xpose.msra.mxu1 %v3152_v21 }
 0x3bc   : > { %4825 = vmatprep.subr.msk.bf16.mxu1 %vm1082_vm0, %v3113_v31 }
 0x3bd   : > { %v3123_v5 = vpop.permute.xlu1 %3122 }
 0x3c1   : > { %v3087_v19 = vpop.permute.xlu1 %3086 }
 0x3c2   : > { %4576 = vmatmul.mubr.msk.bf16.gmra.mrb[56].mxu1 %vm1082_vm0, %v2404_v59  ;;  %3092 = vrot.lane.b32.xlu1 %v5967_v62, %s5470_s11  ;;  %v3161_v62 = vsel %vm1082_vm0, %v3117_v34, 0  ;;  %v3170_v59 = vsel %vm1082_vm0, %v3123_v5, 0 }
 0x3c3   : > { %4579 = vmatprep.mubr.msk.bf16.mxu1 %vm1082_vm0, %v2406_v2  ;;  %4640 = vmatpush3.bf16.xpose.msra.mxu1 %v3155_v55 }
 0x3c4   : > { %4826 = vmatprep.subr.msk.bf16.mxu1 %vm1082_vm0, %v3115_v32 }
 0x3c5   : > { %v3089_v2 = vpop.permute.xlu1 %3088 }
 0x3ca   : > { %4580 = vmatmul.mubr.msk.bf16.gmra.mrb[60].mxu1 %vm1082_vm0, %v2408_v20 }
 0x3cb   : > { %4642 = vmatpush3.bf16.xpose.msra.mxu1 %v3158_v33  ;;  %4651 = vmatprep.mubr.msk.bf16.mxu1 %vm1082_vm0, %v3085_v56 }
 0x3cc   : > { %4827 = vmatprep.subr.msk.bf16.mxu1 %vm1082_vm0, %v3117_v34 }
 0x3d3   : > { %4644 = vmatpush3.bf16.xpose.msra.mxu1 %v3161_v62 }
 0x3d4   : > { %4828 = vmatprep.subr.msk.bf16.mxu1 %vm1082_vm0, %v3119_v36 }
 0x3da   : > { %v1894_v39 = vpop.xlane.xlu0 %1893 }
 0x3db   : > { %4646 = vmatpush3.bf16.xpose.msra.mxu1 %v3164_v38  ;;  %v1922_v4 = vsub.f32 %v6199_v53, %v1894_v39 }
 0x3dc   : > { %4829 = vmatprep.subr.msk.bf16.mxu1 %vm1082_vm0, %v3121_v57 }
 0x3dd   : > { %v1941_v22 = vmul.f32 1.442695, %v1922_v4 }
 0x3de   : > { %v1890_v13 = vpop.xlane.xlu0 %1889 }
 0x3df   : > { %v1920_v58 = vsub.f32 %v6203_v28, %v1890_v13  ;;  %4997 = vpow2.f32 %v1941_v22 }
 0x3e1   : > { %v1937_v27 = vmul.f32 1.442695, %v1920_v58 }
 0x3e2   : > { %v1900_v44 = vpop.xlane.xlu0 %1899 }
 0x3e3   : > { %4648 = vmatpush3.bf16.xpose.msra.mxu1 %v3167_v40  ;;  %v1925_v54 = vsub.f32 %v6207_v52, %v1900_v44 }
 0x3e4   : > { %4830 = vmatprep.subr.msk.bf16.mxu1 %vm1082_vm0, %v3123_v5 }
 0x3e5   : > { %v1947_v32 = vmul.f32 1.442695, %v1925_v54 }
 0x3e6   : > { %v1898_v50 = vpop.xlane.xlu0 %1897 }
 0x3e7   : > { %v1924_v21 = vsub.f32 %v6215_v63, %v1898_v50 }
 0x3e9   : > { %v1945_v28 = vmul.f32 1.442695, %v1924_v21 }
 0x3ea   : > { %v1908_v20 = vpop.xlane.xlu0 %1907 }
 0x3eb   : > { %4650 = vmatpush3.bf16.xpose.msra.mxu1 %v3170_v59  ;;  %v1929_v57 = vsub.f32 %v6219_v11, %v1908_v20 }
 0x3ed   : > { %v1955_v59 = vmul.f32 1.442695, %v1929_v57 }
 0x3ee   : > { %v1906_v31 = vpop.xlane.xlu0 %1905 }
 0x3ef   : > { %v1928_v63 = vsub.f32 %v6225_v10, %v1906_v31 }
 0x3f1   : > { %v1953_v39 = vmul.f32 1.442695, %v1928_v63 }
 0x3f2   : > { %4652 = vmatmul.mubr.msk.bf16.vlgmr.msra.gmra.mrb[64].mxu1 %vm1082_vm0, %v3087_v19  ;;  %v1916_v52 = vpop.xlane.xlu0 %1915 }
 0x3f3   : > { %4655 = vmatprep.mubr.msk.bf16.mxu1 %vm1082_vm0, %v3089_v2 }
 0x3f6   : > { %v1892_v48 = vpop.xlane.xlu1 %1891  ;;  %v1914_v5 = vpop.xlane.xlu0 %1913 }
 0x3f7   : > { %v1921_v51 = vsub.f32 %v6195_v42, %v1892_v48  ;;  %v1932_v11 = vsub.f32 %v6235_v45, %v1914_v5  ;;  %v1933_v45 = vsub.f32 %v6228_v8, %v1916_v52 }
 0x3f9   : > { %v1939_v24 = vmul.f32 1.442695, %v1921_v51  ;;  %v1961_v58 = vmul.f32 1.442695, %v1932_v11 }
 0x3fa   : > { %4656 = vmatmul.mubr.msk.bf16.gmra.mrb[68].mxu1 %vm1082_vm0, %v3091_v37  ;;  %v1888_v53 = vpop.xlane.xlu1 %1887  ;;  %v6370_v37 = vpop.eup %4997 }
 0x3fb   : > { %4999 = vpow2.f32 %v1939_v24  ;;  %v1919_v55 = vsub.f32 %v6197_v41, %v1888_v53  ;;  %v1313_v5 = vpop.xlane.xlu0 %1312 }
 0x3fc   : > { %5001 = vpow2.f32 %v1937_v27  ;;  %v1963_v27 = vmul.f32 1.442695, %v1933_v45 }
 0x3fd   : > { %v1935_v56 = vmul.f32 1.442695, %v1919_v55 }
 0x3fe   : > { %v1896_v33 = vpop.xlane.xlu1 %1895 }
 0x3ff   : > { %5003 = vpow2.f32 %v1935_v56  ;;  %v1923_v42 = vsub.f32 %v6209_v0, %v1896_v33 }
 0x400   : > { %5005 = vpow2.f32 %v1947_v32 }
 0x401   : > { %v1943_v34 = vmul.f32 1.442695, %v1923_v42  ;;  %5007 = vpow2.f32 %v1945_v28 }
 0x402   : > { %v1902_v62 = vpop.xlane.xlu1 %1901 }
 0x403   : > { %5009 = vpow2.f32 %v1943_v34  ;;  %v1926_v36 = vsub.f32 %v6211_v43, %v1902_v62 }
 0x405   : > { %v6372_v41 = vpop.eup %4999  ;;  %v1949_v38 = vmul.f32 1.442695, %v1926_v36 }
 0x406   : > { %v1904_v40 = vpop.xlane.xlu1 %1903  ;;  %1971 = vadd.xlane.f32.xlu0 %v6372_v41  ;;  %v2000_v0 = vpack.c.bf16 %v6370_v37, %v6372_v41  ;;  %v6379_v13 = vpop.eup %5001 }
 0x407   : > { %5011 = vpow2.f32 %v1949_v38  ;;  %v1927_v10 = vsub.f32 %v6221_v6, %v1904_v40 }
 0x408   : > { %5013 = vpow2.f32 %v1953_v39 }
 0x409   : > { %v6381_v43 = vpop.eup %5003  ;;  %v1951_v44 = vmul.f32 1.442695, %v1927_v10 }
 0x40a   : > { %v1910_v19 = vpop.xlane.xlu1 %1909  ;;  %1967 = vadd.xlane.f32.xlu1 %v6381_v43  ;;  %1973 = vadd.xlane.f32.xlu0 %v6370_v37  ;;  %v1999_v50 = vpack.c.bf16 %v6379_v13, %v6381_v43  ;;  %v6388_v2 = vpop.eup %5005 }
 0x40b   : > { %5015 = vpow2.f32 %v1951_v44  ;;  %v1930_v6 = vsub.f32 %v6223_v7, %v1910_v19  ;;  %v6391_v4 = vpop.eup %5007  ;;  %v1311_v44 = vpop.xlane.xlu0 %1310 }
 0x40c   : > { %5017 = vpow2.f32 %v1955_v59 }
 0x40d   : > { %v6393_v20 = vpop.eup %5009  ;;  %v1957_v22 = vmul.f32 1.442695, %v1930_v6 }
 0x40e   : > { %v1912_v48 = vpop.xlane.xlu1 %1911  ;;  %1979 = vadd.xlane.f32.xlu1 %v6388_v2  ;;  %1969 = vadd.xlane.f32.xlu0 %v6379_v13  ;;  %v2001_v51 = vpack.c.bf16 %v6391_v4, %v6393_v20 }
 0x40f   : > { %5019 = vpow2.f32 %v1957_v22  ;;  %v1931_v7 = vsub.f32 %v6230_v9, %v1912_v48  ;;  %v1321_v19 = vpop.xlane.xlu0 %1320 }
 0x410   : > { %5021 = vpow2.f32 %v1961_v58 }
 0x411   : > { %v6401_v54 = vpop.eup %5011  ;;  %v1959_v24 = vmul.f32 1.442695, %v1931_v7 }
 0x412   : > { %v1918_v21 = vpop.xlane.xlu1 %1917  ;;  %1975 = vadd.xlane.f32.xlu0 %v6393_v20  ;;  %v2002_v8 = vpack.c.bf16 %v6401_v54, %v6388_v2  ;;  %v6407_v31 = vpop.eup %5013 }
 0x413   : > { %5023 = vpow2.f32 %v1959_v24  ;;  %v1934_v53 = vsub.f32 %v6232_v26, %v1918_v21  ;;  %v1329_v22 = vpop.xlane.xlu0 %1328 }
 0x414   : > { %5025 = vpow2.f32 %v1963_v27 }
 0x415   : > { %v6409_v55 = vpop.eup %5015  ;;  %v1965_v32 = vmul.f32 1.442695, %v1934_v53 }
 0x416   : > { %v1309_v9 = vpop.xlane.xlu1 %1308  ;;  %1981 = vadd.xlane.f32.xlu0 %v6401_v54  ;;  %v6414_v28 = vpop.eup %5017 }
 0x417   : > { %5027 = vpow2.f32 %v1965_v32  ;;  %v1339_v58 = vpop.xlane.xlu0 %1338 }
 0x418   : > { %5029 = vrcp.f32 %v1313_v5 }
 0x419   : > { %v6416_v33 = vpop.eup %5019  ;;  %5031 = vrcp.f32 %v1311_v44 }
 0x41a   : > { %1989 = vadd.xlane.f32.xlu1 %v6416_v33  ;;  %v1315_v26 = vpop.xlane.xlu1 %1314  ;;  %1977 = vadd.xlane.f32.xlu0 %v6391_v4  ;;  %v6422_v52 = vpop.eup %5021 }
 0x41b   : > { %5033 = vrcp.f32 %v1315_v26  ;;  %v3095_v56 = vpop.permute.xlu0 %3094 }
 0x41c   : > { %5035 = vrcp.f32 %v1309_v9 }
 0x41d   : > { %v6424_v34 = vpop.eup %5023  ;;  %5037 = vrcp.f32 %v1321_v19 }
 0x41e   : > { %v1317_v63 = vpop.xlane.xlu1 %1316  ;;  %1987 = vadd.xlane.f32.xlu0 %v6414_v28  ;;  %v6429_v36 = vpop.eup %5025 }
 0x41f   : > { %5039 = vrcp.f32 %v1317_v63 }
 0x421   : > { %v6431_v38 = vpop.eup %5027 }
 0x422   : > { %v1323_v57 = vpop.xlane.xlu1 %1322  ;;  %1983 = vadd.xlane.f32.xlu0 %v6409_v55  ;;  %v5030_v48 = vpop.eup %5029 }
 0x423   : > { %5041 = vrcp.f32 %v1323_v57  ;;  %v5032_v27 = vpop.eup %5031 }
 0x425   : > { %v5034_v53 = vpop.eup %5033 }
 0x426   : > { %v1319_v40 = vpop.xlane.xlu1 %1318  ;;  %1985 = vadd.xlane.f32.xlu0 %v6407_v31  ;;  %v5036_v39 = vpop.eup %5035 }
 0x427   : > { %5043 = vrcp.f32 %v1319_v40  ;;  %v5038_v57 = vpop.eup %5037 }
 0x428   : > { %5045 = vrcp.f32 %v1329_v22 }
 0x42a   : > { %v1325_v10 = vpop.xlane.xlu1 %1324  ;;  %1995 = vadd.xlane.f32.xlu0 %v6429_v36 }
 0x42b   : > { %5047 = vrcp.f32 %v1325_v10 }
 0x42e   : > { %v1331_v59 = vpop.xlane.xlu1 %1330  ;;  %1991 = vadd.xlane.f32.xlu0 %v6424_v34 }
 0x42f   : > { %5049 = vrcp.f32 %v1331_v59 }
 0x432   : > { %v1327_v11 = vpop.xlane.xlu1 %1326 }
 0x433   : > { %5051 = vrcp.f32 %v1327_v11 }
 0x434   : > { %5053 = vrcp.f32 %v1339_v58 }
 0x436   : > { %v1337_v6 = vpop.xlane.xlu1 %1336 }
 0x437   : > { %5055 = vrcp.f32 %v1337_v6 }
 0x43a   : > { %v1333_v45 = vpop.xlane.xlu1 %1332 }
 0x43b   : > { %5057 = vrcp.f32 %v1333_v45 }
 0x43e   : > { %v4433_v7 = vpop.f32.mrb[32].mxu0  ;;  %v1335_v24 = vpop.xlane.xlu1 %1334 }
 0x43f   : > { %v1382_v21 = vpop.f32.mrb[33].mxu0  ;;  %v1463_v5 = vmul.f32 %v5030_v48, %v4433_v7  ;;  %v5040_v48 = vpop.eup %5039  ;;  %5059 = vrcp.f32 %v1335_v24 }
 0x440   : > { %v4434_v32 = vpop.f32.mrb[34].mxu0  ;;  %v1461_v62 = vmul.f32 %v5036_v39, %v1382_v21  ;;  %v5042_v39 = vpop.eup %5041 }
 0x441   : > { %v1464_v44 = vmul.f32 %v5034_v53, %v4434_v32  ;;  %v1385_v26 = vpop.f32.mrb[35].mxu0 }
 0x442   : > { %v1462_v9 = vmul.f32 %v5032_v27, %v1385_v26  ;;  %v3093_v42 = vpop.permute.xlu1 %3092 }
 0x443   : > { %v1494_v19 = vpack.c.bf16 %v1464_v44, %v1463_v5  ;;  %4659 = vmatprep.mubr.msk.bf16.mxu1 %vm1082_vm0, %v3093_v42  ;;  %v5044_v42 = vpop.eup %5043 }
 0x444   : > { %v1493_v63 = vpack.c.bf16 %v1462_v9, %v1461_v62  ;;  %4660 = vmatmul.mubr.msk.bf16.gmra.mrb[72].mxu1 %vm1082_vm0, %v3095_v56  ;;  %v5046_v11 = vpop.eup %5045 }
 0x445   : > { %v5048_v32 = vpop.eup %5047 }
 0x446   : > { %v4437_v40 = vpop.f32.mrb[36].mxu0  ;;  %4451 = vmatprep.mubr.msk.bf16.mxu0 %vm1082_vm0, %v1493_v63  ;;  %v5050_v44 = vpop.eup %5049 }
 0x447   : > { %v1398_v7 = vpop.f32.mrb[37].mxu0  ;;  %4452 = vmatmul.mubr.msk.bf16.vlgmr.msra.gmra.mrb[48].mxu0 %vm1082_vm0, %v1494_v19  ;;  %v1467_v22 = vmul.f32 %v5038_v57, %v4437_v40  ;;  %v5052_v26 = vpop.eup %5051 }
 0x448   : > { %4500 = vmatpush3.bf16.msra.mxu0 %v6301_v12  ;;  %v4438_v27 = vpop.f32.mrb[38].mxu0  ;;  %v1465_v10 = vmul.f32 %v5040_v48, %v1398_v7  ;;  %v5054_v24 = vpop.eup %5053 }
 0x449   : > { %v1468_v62 = vmul.f32 %v5042_v39, %v4438_v27  ;;  %4501 = vmatprep.subr.bf16.mxu0 %v6307_v14  ;;  %v1401_v56 = vpop.f32.mrb[39].mxu0 }
 0x44a   : > { %v1466_v59 = vmul.f32 %v5044_v42, %v1401_v56 }
 0x44b   : > { %v1496_v21 = vpack.c.bf16 %v1468_v62, %v1467_v22 }
 0x44c   : > { %v1495_v53 = vpack.c.bf16 %v1466_v59, %v1465_v10  ;;  %4502 = vmatpush3.bf16.msra.mxu0 %v6307_v14 }
 0x44d   : > { %4503 = vmatprep.subr.bf16.mxu0 %v6320_v3 }
 0x44e   : > { %v4441_v12 = vpop.f32.mrb[40].mxu0  ;;  %4455 = vmatprep.mubr.msk.bf16.mxu0 %vm1082_vm0, %v1495_v53 }
 0x44f   : > { %v1414_v5 = vpop.f32.mrb[41].mxu0  ;;  %4456 = vmatmul.mubr.msk.bf16.gmra.mrb[52].mxu0 %vm1082_vm0, %v1496_v21  ;;  %v1471_v9 = vmul.f32 %v5046_v11, %v4441_v12 }
 0x450   : > { %4504 = vmatpush3.bf16.msra.mxu0 %v6320_v3  ;;  %v4442_v58 = vpop.f32.mrb[42].mxu0  ;;  %v1469_v19 = vmul.f32 %v5048_v32, %v1414_v5  ;;  %v5056_v3 = vpop.eup %5055 }
 0x451   : > { %v1472_v14 = vmul.f32 %v5050_v44, %v4442_v58  ;;  %4505 = vmatprep.subr.bf16.mxu0 %v6312_v23  ;;  %v1417_v6 = vpop.f32.mrb[43].mxu0  ;;  %v5058_v7 = vpop.eup %5057 }
 0x452   : > { %v1470_v45 = vmul.f32 %v5052_v26, %v1417_v6  ;;  %v5060_v27 = vpop.eup %5059 }
 0x453   : > { %v1498_v63 = vpack.c.bf16 %v1472_v14, %v1471_v9 }
 0x454   : > { %v1497_v57 = vpack.c.bf16 %v1470_v45, %v1469_v19  ;;  %4506 = vmatpush3.bf16.msra.mxu0 %v6312_v23 }
 0x455   : > { %4507 = vmatprep.subr.bf16.mxu0 %v6327_v35 }
 0x456   : > { %4459 = vmatprep.mubr.msk.bf16.mxu0 %vm1082_vm0, %v1497_v57 }
 0x457   : > { %v4445_v40 = vpop.f32.mrb[44].mxu0  ;;  %4460 = vmatmul.mubr.msk.bf16.gmra.mrb[56].mxu0 %vm1082_vm0, %v1498_v63 }
 0x458   : > { %v1430_v48 = vpop.f32.mrb[45].mxu0  ;;  %4508 = vmatpush3.bf16.msra.mxu0 %v6327_v35  ;;  %v1475_v42 = vmul.f32 %v5056_v3, %v4445_v40  ;;  %v6947_v35 = vpack.c.bf16 %v6416_v33, %v6414_v28 }
 0x459   : > { %v4446_v39 = vpop.f32.mrb[46].mxu0  ;;  %4509 = vmatprep.subr.bf16.mxu0 %v6318_v49  ;;  %v1473_v62 = vmul.f32 %v5058_v7, %v1430_v48 }
 0x45a   : > { %v1476_v22 = vmul.f32 %v5054_v24, %v4446_v39  ;;  %v1433_v23 = vpop.f32.mrb[47].mxu0 }
 0x45b   : > { %v1474_v56 = vmul.f32 %v5060_v27, %v1433_v23 }
 0x45c   : > { %v1500_v10 = vpack.c.bf16 %v1476_v22, %v1475_v42  ;;  %4510 = vmatpush3.bf16.msra.mxu0 %v6318_v49  ;;  %v6946_v49 = vpack.c.bf16 %v6407_v31, %v6409_v55  ;;  %v4959_v55 = vld [vmem:[#allocation14 + $0x10] sm:$0xff]  }
 0x45d   : > { %v1499_v59 = vpack.c.bf16 %v1474_v56, %v1473_v62  ;;  %4511 = vmatprep.subr.bf16.mxu0 %v6331_v25 }
 0x45f   : > { %4463 = vmatprep.mubr.msk.bf16.mxu0 %vm1082_vm0, %v1499_v59 }
 0x460   : > { %4464 = vmatmul.mubr.msk.bf16.gmra.mrb[60].mxu0 %vm1082_vm0, %v1500_v10 }
 0x461   : > { %4512 = vmatpush3.bf16.msra.mxu0 %v6331_v25  ;;  %4515 = vmatprep.mubr.bf16.mxu0 %v1999_v50  ;;  %v6949_v25 = vpack.c.bf16 %v6431_v38, %v6429_v36 }
 0x462   : > { %4513 = vmatprep.subr.bf16.mxu0 %v6324_v60 }
 0x465   : > { %4514 = vmatpush3.bf16.msra.mxu0 %v6324_v60  ;;  %v6948_v60 = vpack.c.bf16 %v6422_v52, %v6424_v34 }
 0x466   : > { %4531 = vmatprep.subr.bf16.mxu0 %v4959_v55 }
 0x468   : > { %4516 = vmatmul.mubr.bf16.vlgmr.msra.gmra.mrb[64].mxu0 %v2000_v0 }
 0x469   : > { %4519 = vmatprep.mubr.bf16.mxu0 %v2001_v51  ;;  %4532 = vmatpush3.bf16.msra.mxu0 %v4959_v55 }
 0x470   : > { %4520 = vmatmul.mubr.bf16.gmra.mrb[68].mxu0 %v2002_v8 }
 0x471   : > { %4523 = vmatprep.mubr.bf16.mxu0 %v6946_v49 }
 0x478   : > { %4524 = vmatmul.mubr.bf16.gmra.mrb[72].mxu0 %v6947_v35 }
 0x479   : > { %4527 = vmatprep.mubr.bf16.mxu0 %v6948_v60 }
 0x480   : > { %4528 = vmatmul.mubr.bf16.gmra.mrb[76].mxu0 %v6949_v25 }
 0x485   : > { %v6488_v37 = vpop.f32.mrb[48].mxu1 }
 0x486   : > { %v6490_v41 = vpop.f32.mrb[49].mxu1 }
 0x487   : > { %2578 = vmax.xlane.f32.xlu0 %v6490_v41  ;;  %v6493_v0 = vpop.f32.mrb[50].mxu1 }
 0x488   : > { %v6495_v13 = vpop.f32.mrb[51].mxu1 }
 0x489   : > { %2580 = vmax.xlane.f32.xlu1 %v6495_v13 }
 0x48b   : > { %2582 = vmax.xlane.f32.xlu0 %v6488_v37 }
 0x48d   : > { %1997 = vadd.xlane.f32.xlu1 %v6431_v38  ;;  %v6500_v43 = vpop.f32.mrb[52].mxu1 }
 0x48e   : > { %v6502_v50 = vpop.f32.mrb[53].mxu1 }
 0x48f   : > { %v6504_v2 = vpop.f32.mrb[54].mxu1 }
 0x490   : > { %v6506_v4 = vpop.f32.mrb[55].mxu1 }
 0x491   : > { %1993 = vadd.xlane.f32.xlu1 %v6422_v52  ;;  %v4960_v52 = vld [vmem:[#allocation14 + $0x18] sm:$0xff]  }
 0x492   : > { %4533 = vmatprep.subr.bf16.mxu0 %v4960_v52 }
 0x493   : > { %4534 = vmatpush3.bf16.msra.mxu0 %v4960_v52  ;;  %v1972_v32 = vpop.xlane.xlu0 %1971 }
 0x495   : > { %v6509_v20 = vpop.f32.mrb[56].mxu1 }
 0x496   : > { %v6511_v51 = vpop.f32.mrb[57].mxu1 }
 0x497   : > { %v6513_v54 = vpop.f32.mrb[58].mxu1  ;;  %v1974_v5 = vpop.xlane.xlu0 %1973 }
 0x498   : > { %v6515_v8 = vpop.f32.mrb[59].mxu1  ;;  %v1968_v45 = vpop.xlane.xlu1 %1967 }
 0x49b   : > { %v1970_v44 = vpop.xlane.xlu0 %1969 }
 0x49c   : > { %v1980_v57 = vpop.xlane.xlu1 %1979 }
 0x49d   : > { %v6517_v31 = vpop.f32.mrb[60].mxu1 }
 0x49e   : > { %v6519_v28 = vpop.f32.mrb[61].mxu1 }
 0x49f   : > { %v6521_v33 = vpop.f32.mrb[62].mxu1  ;;  %v1976_v58 = vpop.xlane.xlu0 %1975 }
 0x4a0   : > { %v6523_v34 = vpop.f32.mrb[63].mxu1 }
 0x4a1   : > { %3096 = vrot.lane.b32.xlu0 %v5983_v18, %s5470_s11 }
 0x4a2   : > { %2706 = vrot.lane.b32.xlu1 %v6012_v30, %s5469_s28 }
 0x4a3   : > { %v1982_v26 = vpop.xlane.xlu0 %1981 }
 0x4a5   : > { %3098 = vrot.lane.b32.xlu0 %v5979_v16, %s5470_s11 }
 0x4a7   : > { %v1978_v9 = vpop.xlane.xlu0 %1977  ;;  %v1990_v40 = vpop.xlane.xlu1 %1989 }
 0x4a9   : > { %2708 = vrot.lane.b32.xlu0 %v6010_v29, %s5469_s28 }
 0x4ab   : > { %v6557_v14 = vpop.xlane.xlu0 %1987 }
 0x4af   : > { %v6559_v6 = vpop.xlane.xlu0 %1983 }
 0x4b3   : > { %v6564_v19 = vpop.xlane.xlu0 %1985 }
 0x4b7   : > { %v6567_v63 = vpop.xlane.xlu0 %1995 }
 0x4bb   : > { %v6569_v24 = vpop.xlane.xlu0 %1991 }
 0x4c5   : > { %v6533_v36 = vpop.f32.mrb[64].mxu1 }
 0x4c6   : > { %2584 = vmax.xlane.f32.xlu1 %v6493_v0  ;;  %v6536_v38 = vpop.f32.mrb[65].mxu1 }
 0x4c7   : > { %v6538_v21 = vpop.f32.mrb[66].mxu1 }
 0x4c8   : > { %2586 = vmax.xlane.f32.xlu0 %v6502_v50  ;;  %v6541_v18 = vpop.f32.mrb[67].mxu1 }
 0x4ca   : > { %2588 = vmax.xlane.f32.xlu1 %v6506_v4 }
 0x4cc   : > { %2592 = vmax.xlane.f32.xlu0 %v6504_v2 }
 0x4cd   : > { %v6545_v16 = vpop.f32.mrb[68].mxu1 }
 0x4ce   : > { %v6547_v53 = vpop.f32.mrb[69].mxu1 }
 0x4cf   : > { %v6549_v11 = vpop.f32.mrb[70].mxu1 }
 0x4d0   : > { %v6551_v12 = vpop.f32.mrb[71].mxu1 }
 0x4db   : > { %2710 = vrot.lane.b32.xlu1 %v6029_v47, %s5469_s28 }
 0x4e2   : > { %2712 = vrot.lane.b32.xlu0 %v6026_v46, %s5469_s28 }
 0x4ff   : > { %2590 = vmax.xlane.f32.xlu1 %v6500_v43 }
 0x501   : > { %2594 = vmax.xlane.f32.xlu0 %v6511_v51 }
 0x503   : > { %2596 = vmax.xlane.f32.xlu1 %v6515_v8 }
 0x505   : > { %2600 = vmax.xlane.f32.xlu0 %v6513_v54 }
 0x514   : > { %v2579_v3 = vpop.xlane.xlu0 %2578  ;;  %2714 = vrot.lane.b32.xlu1 %v6043_v1, %s5469_s28 }
 0x515   : > { %v2610_v48 = vsub.f32 %v6490_v41, %v2579_v3 }
 0x516   : > { %v2581_v7 = vpop.xlane.xlu1 %2580 }
 0x517   : > { %v2626_v39 = vmul.f32 1.442695, %v2610_v48  ;;  %v2611_v27 = vsub.f32 %v6495_v13, %v2581_v7  ;;  %v6575_v42 = vpop.f32.mrb[72].mxu1 }
 0x518   : > { %v6577_v22 = vpop.xlane.xlu0 %2582  ;;  %v6579_v23 = vpop.f32.mrb[73].mxu1 }
 0x519   : > { %v2628_v62 = vmul.f32 1.442695, %v2611_v27  ;;  %v2612_v56 = vsub.f32 %v6488_v37, %v6577_v22  ;;  %v6583_v10 = vpop.f32.mrb[74].mxu1  ;;  %5061 = vpow2.f32 %v2626_v39 }
 0x51a   : > { %v6585_v59 = vpop.xlane.xlu1 %1997  ;;  %v6587_v49 = vpop.f32.mrb[75].mxu1 }
 0x51b   : > { %5063 = vpow2.f32 %v2628_v62  ;;  %2716 = vrot.lane.b32.xlu0 %v6040_v61, %s5469_s28 }
 0x51c   : > { %v3097_v35 = vpop.permute.xlu0 %3096  ;;  %5065 = vrcp.f32 %v1972_v32 }
 0x51d   : > { %4663 = vmatprep.mubr.msk.bf16.mxu1 %vm1082_vm0, %v3097_v35  ;;  %5067 = vrcp.f32 %v1968_v45 }
 0x51e   : > { %v6592_v60 = vpop.xlane.xlu1 %1993  ;;  %5069 = vrcp.f32 %v1974_v5 }
 0x51f   : > { %5071 = vrcp.f32 %v1970_v44 }
 0x520   : > { %v3099_v25 = vpop.permute.xlu0 %3098  ;;  %5073 = vrcp.f32 %v1980_v57 }
 0x521   : > { %4664 = vmatmul.mubr.msk.bf16.gmra.mrb[76].mxu1 %vm1082_vm0, %v3099_v25  ;;  %5075 = vrcp.f32 %v1976_v58 }
 0x522   : > { %v2707_v41 = vpop.permute.xlu1 %2706  ;;  %5077 = vrcp.f32 %v1982_v26 }
 0x523   : > { %4583 = vmatprep.subr.bf16.mxu0 %v2707_v41  ;;  %v6595_v13 = vpop.eup %5061  ;;  %5079 = vrcp.f32 %v1978_v9 }
 0x524   : > { %5081 = vrcp.f32 %v6557_v14 }
 0x525   : > { %v6597_v55 = vpop.eup %5063  ;;  %5083 = vrcp.f32 %v1990_v40 }
 0x526   : > { %v2690_v52 = vpack.c.bf16 %v6597_v55, %v6595_v13  ;;  %v5066_v3 = vpop.eup %5065  ;;  %5085 = vrcp.f32 %v6559_v6 }
 0x527   : > { %v5068_v7 = vpop.eup %5067  ;;  %5087 = vrcp.f32 %v6564_v19 }
 0x528   : > { %v5070_v62 = vpop.eup %5069  ;;  %5089 = vrcp.f32 %v6567_v63 }
 0x529   : > { %v5072_v32 = vpop.eup %5071  ;;  %5091 = vrcp.f32 %v6569_v24 }
 0x52a   : > { %v5074_v25 = vpop.eup %5073  ;;  %5093 = vrcp.f32 %v6585_v59 }
 0x52b   : > { %5095 = vrcp.f32 %v6592_v60 }
 0x538   : > { %2598 = vmax.xlane.f32.xlu1 %v6509_v20 }
 0x53a   : > { %2602 = vmax.xlane.f32.xlu0 %v6519_v28 }
 0x53b   : > { %v4517_v48 = vpop.f32.mrb[64].mxu0 }
 0x53c   : > { %v2154_v39 = vmul.f32 %v5066_v3, %v4517_v48  ;;  %v2073_v27 = vpop.f32.mrb[65].mxu0  ;;  %2604 = vmax.xlane.f32.xlu1 %v6523_v34  ;;  %v5076_v3 = vpop.eup %5075 }
 0x53d   : > { %v4518_v35 = vpop.f32.mrb[66].mxu0  ;;  %v2152_v45 = vmul.f32 %v5068_v7, %v2073_v27  ;;  %v5078_v7 = vpop.eup %5077 }
 0x53e   : > { %v2155_v5 = vmul.f32 %v5070_v62, %v4518_v35  ;;  %v2076_v44 = vpop.f32.mrb[67].mxu0  ;;  %2608 = vmax.xlane.f32.xlu0 %v6521_v33  ;;  %v2709_v27 = vpop.permute.xlu0 %2708 }
 0x53f   : > { %v2153_v57 = vmul.f32 %v5072_v32, %v2076_v44  ;;  %v5080_v14 = vpop.eup %5079 }
 0x540   : > { %v2185_v58 = vpack.c.bf16 %v2155_v5, %v2154_v39  ;;  %v5082_v19 = vpop.eup %5081 }
 0x541   : > { %v2184_v26 = vpack.c.bf16 %v2153_v57, %v2152_v45 }
 0x543   : > { %v4521_v9 = vpop.f32.mrb[68].mxu0  ;;  %4535 = vmatprep.mubr.msk.bf16.mxu0 %vm1082_vm0, %v2184_v26 }
 0x544   : > { %v2089_v48 = vpop.f32.mrb[69].mxu0  ;;  %4536 = vmatmul.mubr.msk.bf16.vlgmr.msra.gmra.mrb[48].mxu0 %vm1082_vm0, %v2185_v58  ;;  %v2158_v35 = vmul.f32 %v5074_v25, %v4521_v9 }
 0x545   : > { %v2156_v62 = vmul.f32 %v5076_v3, %v2089_v48  ;;  %4584 = vmatpush3.bf16.msra.mxu0 %v2707_v41  ;;  %v4522_v39 = vpop.f32.mrb[70].mxu0  ;;  %v5084_v41 = vpop.eup %5083 }
 0x546   : > { %v2159_v40 = vmul.f32 %v5078_v7, %v4522_v39  ;;  %4585 = vmatprep.subr.bf16.mxu0 %v2709_v27  ;;  %v2092_v32 = vpop.f32.mrb[71].mxu0  ;;  %v5086_v26 = vpop.eup %5085  ;;  %v2630_v39 = vmul.f32 1.442695, %v2612_v56 }
 0x547   : > { %v2157_v6 = vmul.f32 %v5080_v14, %v2092_v32  ;;  %v5088_v63 = vpop.eup %5087 }
 0x548   : > { %v2187_v5 = vpack.c.bf16 %v2159_v40, %v2158_v35  ;;  %5097 = vpow2.f32 %v2630_v39 }
 0x549   : > { %v2186_v44 = vpack.c.bf16 %v2157_v6, %v2156_v62  ;;  %4586 = vmatpush3.bf16.msra.mxu0 %v2709_v27  ;;  %v5090_v27 = vpop.eup %5089 }
 0x54a   : > { %v5092_v60 = vpop.eup %5091 }
 0x54b   : > { %v4525_v45 = vpop.f32.mrb[72].mxu0  ;;  %4539 = vmatprep.mubr.msk.bf16.mxu0 %vm1082_vm0, %v2186_v44  ;;  %v5094_v40 = vpop.eup %5093 }
 0x54c   : > { %v2162_v57 = vmul.f32 %v5082_v19, %v4525_v45  ;;  %v2105_v58 = vpop.f32.mrb[73].mxu0  ;;  %4540 = vmatmul.mubr.msk.bf16.gmra.mrb[52].mxu0 %vm1082_vm0, %v2187_v5  ;;  %v5096_v5 = vpop.eup %5095 }
 0x54d   : > { %v4526_v25 = vpop.f32.mrb[74].mxu0  ;;  %2718 = vrot.lane.b32.xlu1 %v6057_v17, %s5469_s28  ;;  %v2160_v24 = vmul.f32 %v5086_v26, %v2105_v58 }
 0x54e   : > { %v2163_v9 = vmul.f32 %v5084_v41, %v4526_v25  ;;  %v2108_v3 = vpop.f32.mrb[75].mxu0 }
 0x54f   : > { %v2161_v59 = vmul.f32 %v5088_v63, %v2108_v3 }
 0x550   : > { %v2189_v48 = vpack.c.bf16 %v2163_v9, %v2162_v57 }
 0x551   : > { %v2188_v7 = vpack.c.bf16 %v2161_v59, %v2160_v24 }
 0x552   : > { %v6633_v59 = vpop.eup %5097 }
 0x553   : > { %v4529_v62 = vpop.f32.mrb[76].mxu0  ;;  %4543 = vmatprep.mubr.msk.bf16.mxu0 %vm1082_vm0, %v2188_v7  ;;  %v2585_v35 = vpop.xlane.xlu1 %2584 }
 0x554   : > { %v2121_v14 = vpop.f32.mrb[77].mxu0  ;;  %4544 = vmatmul.mubr.msk.bf16.gmra.mrb[56].mxu0 %vm1082_vm0, %v2189_v48  ;;  %v2613_v32 = vsub.f32 %v6493_v0, %v2585_v35  ;;  %2720 = vrot.lane.b32.xlu0 %v6055_v15, %s5469_s28  ;;  %v2166_v44 = vmul.f32 %v5090_v27, %v4529_v62 }
 0x555   : > { %v4530_v6 = vpop.f32.mrb[78].mxu0  ;;  %v2587_v41 = vpop.xlane.xlu0 %2586  ;;  %v2164_v57 = vmul.f32 %v5092_v60, %v2121_v14 }
 0x556   : > { %v2167_v19 = vmul.f32 %v5094_v40, %v4530_v6  ;;  %v2124_v45 = vpop.f32.mrb[79].mxu0  ;;  %v2632_v58 = vmul.f32 1.442695, %v2613_v32  ;;  %v2614_v22 = vsub.f32 %v6502_v50, %v2587_v41 }
 0x557   : > { %v2165_v37 = vmul.f32 %v5096_v5, %v2124_v45  ;;  %v2589_v26 = vpop.xlane.xlu1 %2588 }
 0x558   : > { %v2191_v56 = vpack.c.bf16 %v2167_v19, %v2166_v44  ;;  %5099 = vpow2.f32 %v2632_v58  ;;  %v2634_v0 = vmul.f32 1.442695, %v2614_v22  ;;  %v2615_v63 = vsub.f32 %v6506_v4, %v2589_v26 }
 0x559   : > { %v2190_v25 = vpack.c.bf16 %v2165_v37, %v2164_v57  ;;  %v2593_v9 = vpop.xlane.xlu0 %2592 }
 0x55a   : > { %v2636_v3 = vmul.f32 1.442695, %v2615_v63  ;;  %5101 = vpow2.f32 %v2634_v0 }
 0x55b   : > { %4547 = vmatprep.mubr.msk.bf16.mxu0 %vm1082_vm0, %v2190_v25  ;;  %v2711_v24 = vpop.permute.xlu1 %2710 }
 0x55c   : > { %4548 = vmatmul.mubr.msk.bf16.gmra.mrb[60].mxu0 %vm1082_vm0, %v2191_v56  ;;  %5103 = vpow2.f32 %v2636_v3  ;;  %4587 = vmatprep.subr.bf16.mxu0 %v2711_v24 }
 0x55d   : > { %4599 = vmatprep.mubr.bf16.mxu0 %v2690_v52  ;;  %v2713_v50 = vpop.permute.xlu0 %2712  ;;  %4588 = vmatpush3.bf16.msra.mxu0 %v2711_v24  ;;  %v2617_v52 = vsub.f32 %v6504_v2, %v2593_v9 }
 0x55e   : > { %4589 = vmatprep.subr.bf16.mxu0 %v2713_v50 }
 0x55f   : > { %v2640_v60 = vmul.f32 1.442695, %v2617_v52 }
 0x561   : > { %4590 = vmatpush3.bf16.msra.mxu0 %v2713_v50  ;;  %5105 = vpow2.f32 %v2640_v60 }
 0x562   : > { %v6635_v4 = vpop.eup %5099 }
 0x563   : > { %v2691_v48 = vpack.c.bf16 %v6635_v4, %v6633_v59 }
 0x564   : > { %v6639_v7 = vpop.eup %5101 }
 0x566   : > { %v6641_v27 = vpop.eup %5103 }
 0x567   : > { %v2692_v62 = vpack.c.bf16 %v6641_v27, %v6639_v7 }
 0x56b   : > { %v5106_v41 = vpop.eup %5105 }
 0x571   : > { %2606 = vmax.xlane.f32.xlu1 %v6517_v31 }
 0x573   : > { %2658 = vadd.xlane.f32.xlu0 %v6595_v13 }
 0x575   : > { %2660 = vadd.xlane.f32.xlu1 %v6597_v55 }
 0x579   : > { %2662 = vadd.xlane.f32.xlu1 %v6633_v59 }
 0x57d   : > { %2664 = vadd.xlane.f32.xlu1 %v6635_v4 }
 0x581   : > { %2666 = vadd.xlane.f32.xlu1 %v6639_v7 }
 0x585   : > { %2668 = vadd.xlane.f32.xlu1 %v6641_v27 }
 0x58c   : > { %v2591_v39 = vpop.xlane.xlu1 %2590 }
 0x58d   : > { %v2616_v14 = vsub.f32 %v6500_v43, %v2591_v39 }
 0x58e   : > { %v2595_v35 = vpop.xlane.xlu0 %2594 }
 0x58f   : > { %v2638_v40 = vmul.f32 1.442695, %v2616_v14  ;;  %v2618_v13 = vsub.f32 %v6511_v51, %v2595_v35 }
 0x590   : > { %v2597_v55 = vpop.xlane.xlu1 %2596 }
 0x591   : > { %5107 = vpow2.f32 %v2638_v40  ;;  %v2642_v32 = vmul.f32 1.442695, %v2618_v13  ;;  %v2619_v6 = vsub.f32 %v6515_v8, %v2597_v55 }
 0x592   : > { %v2601_v5 = vpop.xlane.xlu0 %2600 }
 0x593   : > { %5109 = vpow2.f32 %v2642_v32  ;;  %v2644_v44 = vmul.f32 1.442695, %v2619_v6  ;;  %v2621_v2 = vsub.f32 %v6513_v54, %v2601_v5  ;;  %v4961_v6 = vld [vmem:[#allocation14 + $0x20] sm:$0xff]   ;;  %v4962_v5 = vld [vmem:[#allocation14 + $0x28] sm:$0xff]  }
 0x594   : > { %v2715_v19 = vpop.permute.xlu1 %2714 }
 0x595   : > { %5111 = vpow2.f32 %v2644_v44  ;;  %4591 = vmatprep.subr.bf16.mxu0 %v2715_v19  ;;  %v2648_v43 = vmul.f32 1.442695, %v2621_v2 }
 0x596   : > { %v2717_v45 = vpop.permute.xlu0 %2716  ;;  %4592 = vmatpush3.bf16.msra.mxu0 %v2715_v19 }
 0x597   : > { %4593 = vmatprep.subr.bf16.mxu0 %v2717_v45  ;;  %5113 = vpow2.f32 %v2648_v43 }
 0x59a   : > { %4594 = vmatpush3.bf16.msra.mxu0 %v2717_v45 }
 0x59b   : > { %v5108_v51 = vpop.eup %5107 }
 0x59c   : > { %2670 = vadd.xlane.f32.xlu1 %v5108_v51  ;;  %v2693_v57 = vpack.c.bf16 %v5106_v41, %v5108_v51 }
 0x59d   : > { %v5110_v58 = vpop.eup %5109 }
 0x59e   : > { %2674 = vadd.xlane.f32.xlu0 %v5110_v58 }
 0x59f   : > { %v5112_v8 = vpop.eup %5111 }
 0x5a0   : > { %2672 = vadd.xlane.f32.xlu1 %v5106_v41  ;;  %v2694_v37 = vpack.c.bf16 %v5112_v8, %v5110_v58 }
 0x5a1   : > { %v5114_v22 = vpop.eup %5113 }
 0x5a4   : > { %2676 = vadd.xlane.f32.xlu1 %v5112_v8 }
 0x5a8   : > { %2680 = vadd.xlane.f32.xlu1 %v5114_v22 }
 0x5c5   : > { %v2599_v54 = vpop.xlane.xlu1 %2598 }
 0x5c6   : > { %v2620_v56 = vsub.f32 %v6509_v20, %v2599_v54 }
 0x5c7   : > { %v2603_v26 = vpop.xlane.xlu0 %2602 }
 0x5c8   : > { %v2646_v25 = vmul.f32 1.442695, %v2620_v56  ;;  %v2622_v0 = vsub.f32 %v6519_v28, %v2603_v26 }
 0x5c9   : > { %v2605_v63 = vpop.xlane.xlu1 %2604 }
 0x5ca   : > { %5115 = vpow2.f32 %v2646_v25  ;;  %v2650_v9 = vmul.f32 1.442695, %v2622_v0  ;;  %v2623_v3 = vsub.f32 %v6523_v34, %v2605_v63 }
 0x5cb   : > { %v2609_v24 = vpop.xlane.xlu0 %2608 }
 0x5cc   : > { %v2652_v50 = vmul.f32 1.442695, %v2623_v3  ;;  %v2625_v52 = vsub.f32 %v6521_v33, %v2609_v24  ;;  %5117 = vpow2.f32 %v2650_v9 }
 0x5cd   : > { %v2719_v60 = vpop.permute.xlu1 %2718 }
 0x5ce   : > { %5119 = vpow2.f32 %v2652_v50  ;;  %v2656_v39 = vmul.f32 1.442695, %v2625_v52  ;;  %4595 = vmatprep.subr.bf16.mxu0 %v2719_v60 }
 0x5cf   : > { %v2721_v14 = vpop.permute.xlu0 %2720  ;;  %4596 = vmatpush3.bf16.msra.mxu0 %v2719_v60 }
 0x5d0   : > { %4597 = vmatprep.subr.bf16.mxu0 %v2721_v14  ;;  %5121 = vpow2.f32 %v2656_v39 }
 0x5d3   : > { %4598 = vmatpush3.bf16.msra.mxu0 %v2721_v14 }
 0x5d4   : > { %v5116_v20 = vpop.eup %5115  ;;  %4615 = vmatprep.subr.bf16.mxu0 %v4961_v6 }
 0x5d5   : > { %2678 = vadd.xlane.f32.xlu0 %v5116_v20  ;;  %v2695_v28 = vpack.c.bf16 %v5114_v22, %v5116_v20 }
 0x5d6   : > { %4600 = vmatmul.mubr.bf16.vlgmr.msra.gmra.mrb[80].mxu0 %v2691_v48  ;;  %v5118_v34 = vpop.eup %5117 }
 0x5d7   : > { %4603 = vmatprep.mubr.bf16.mxu0 %v2692_v62  ;;  %4616 = vmatpush3.bf16.msra.mxu0 %v4961_v6 }
 0x5d8   : > { %v5120_v33 = vpop.eup %5119  ;;  %4617 = vmatprep.subr.bf16.mxu0 %v4962_v5 }
 0x5d9   : > { %2682 = vadd.xlane.f32.xlu0 %v5118_v34  ;;  %2684 = vadd.xlane.f32.xlu1 %v5120_v33  ;;  %v2696_v35 = vpack.c.bf16 %v5120_v33, %v5118_v34 }
 0x5da   : > { %v5122_v40 = vpop.eup %5121 }
 0x5db   : > { %4618 = vmatpush3.bf16.msra.mxu0 %v4962_v5 }
 0x5dd   : > { %2688 = vadd.xlane.f32.xlu1 %v5122_v40 }
 0x5de   : > { %4604 = vmatmul.mubr.bf16.gmra.mrb[84].mxu0 %v2693_v57 }
 0x5df   : > { %4607 = vmatprep.mubr.bf16.mxu0 %v2694_v37 }
 0x5e1   : > { %3271 = vmax.xlane.f32.xlu1 %v6541_v18 }
 0x5e5   : > { %3273 = vmax.xlane.f32.xlu1 %v6533_v36 }
 0x5e6   : > { %4608 = vmatmul.mubr.bf16.gmra.mrb[88].mxu0 %v2695_v28 }
 0x5e7   : > { %4611 = vmatprep.mubr.bf16.mxu0 %v2696_v35 }
 0x5e9   : > { %3275 = vmax.xlane.f32.xlu1 %v6538_v21 }
 0x5f4   : > { %v6670_v59 = vpop.f32.mrb[76].mxu1 }
 0x5f5   : > { %v6672_v4 = vpop.f32.mrb[77].mxu1 }
 0x5f6   : > { %v6674_v48 = vpop.f32.mrb[78].mxu1 }
 0x5f7   : > { %v6676_v7 = vpop.f32.mrb[79].mxu1 }
 0x5fa   : > { %3399 = vrot.lane.b32.xlu1 %v6010_v29, %s5470_s11 }
 0x5fe   : > { %v2607_v27 = vpop.xlane.xlu1 %2606 }
 0x5ff   : > { %v2624_v62 = vsub.f32 %v6517_v31, %v2607_v27 }
 0x601   : > { %v2654_v13 = vmul.f32 1.442695, %v2624_v62 }
 0x602   : > { %v2661_v29 = vpop.xlane.xlu1 %2660 }
 0x603   : > { %5123 = vpow2.f32 %v2654_v13 }
 0x606   : > { %v2663_v31 = vpop.xlane.xlu1 %2662 }
 0x60a   : > { %v2665_v44 = vpop.xlane.xlu1 %2664 }
 0x60d   : > { %v5124_v55 = vpop.eup %5123 }
 0x60e   : > { %2686 = vadd.xlane.f32.xlu0 %v5124_v55  ;;  %v2697_v32 = vpack.c.bf16 %v5122_v40, %v5124_v55  ;;  %v2667_v19 = vpop.xlane.xlu1 %2666 }
 0x610   : > { %4612 = vmatmul.mubr.bf16.gmra.mrb[92].mxu0 %v2697_v32 }
 0x612   : > { %3269 = vmax.xlane.f32.xlu0 %v6536_v38  ;;  %v2669_v2 = vpop.xlane.xlu1 %2668 }
 0x61e   : > { %3279 = vmax.xlane.f32.xlu1 %v6551_v12 }
 0x622   : > { %3281 = vmax.xlane.f32.xlu1 %v6545_v16 }
 0x626   : > { %3283 = vmax.xlane.f32.xlu1 %v6549_v11 }
 0x628   : > { %3397 = vrot.lane.b32.xlu0 %v6012_v30, %s5470_s11 }
 0x629   : > { %v2671_v45 = vpop.xlane.xlu1 %2670 }
 0x62d   : > { %v2673_v43 = vpop.xlane.xlu1 %2672 }
 0x631   : > { %v6691_v41 = vpop.xlane.xlu1 %2676 }
 0x635   : > { %v6696_v30 = vpop.xlane.xlu1 %2680 }
 0x637   : > { %3403 = vrot.lane.b32.xlu1 %v6026_v46, %s5470_s11 }
 0x647   : > { %3277 = vmax.xlane.f32.xlu0 %v6547_v53 }
 0x65b   : > { %3287 = vmax.xlane.f32.xlu1 %v6587_v49 }
 0x65d   : > { %3401 = vrot.lane.b32.xlu0 %v6029_v47, %s5470_s11 }
 0x65f   : > { %3289 = vmax.xlane.f32.xlu1 %v6575_v42 }
 0x663   : > { %3291 = vmax.xlane.f32.xlu1 %v6583_v10 }
 0x666   : > { %v6699_v46 = vpop.xlane.xlu1 %2684 }
 0x667   : > { %3293 = vmax.xlane.f32.xlu1 %v6672_v4 }
 0x66a   : > { %v6702_v51 = vpop.xlane.xlu1 %2688 }
 0x66e   : > { %v3272_v57 = vpop.xlane.xlu1 %3271 }
 0x66f   : > { %v3302_v58 = vsub.f32 %v6541_v18, %v3272_v57 }
 0x671   : > { %v3319_v9 = vmul.f32 1.442695, %v3302_v58 }
 0x672   : > { %v3274_v8 = vpop.xlane.xlu1 %3273 }
 0x673   : > { %v3303_v37 = vsub.f32 %v6533_v36, %v3274_v8  ;;  %v2659_v36 = vpop.xlane.xlu0 %2658 }
 0x675   : > { %v3321_v22 = vmul.f32 1.442695, %v3303_v37 }
 0x676   : > { %v3276_v47 = vpop.xlane.xlu1 %3275 }
 0x677   : > { %v3304_v54 = vsub.f32 %v6538_v21, %v3276_v47  ;;  %5125 = vpow2.f32 %v3321_v22  ;;  %v2675_v0 = vpop.xlane.xlu0 %2674 }
 0x678   : > { %3409 = vrot.lane.b32.xlu1 %v6057_v17, %s5470_s11 }
 0x679   : > { %v3323_v56 = vmul.f32 1.442695, %v3304_v54 }
 0x67b   : > { %5127 = vpow2.f32 %v3323_v56  ;;  %v2679_v63 = vpop.xlane.xlu0 %2678 }
 0x67c   : > { %3285 = vmax.xlane.f32.xlu0 %v6579_v23  ;;  %5129 = vrcp.f32 %v2659_v36 }
 0x67d   : > { %5131 = vrcp.f32 %v2663_v31 }
 0x67e   : > { %5133 = vrcp.f32 %v2665_v44 }
 0x67f   : > { %v6720_v17 = vpop.xlane.xlu0 %2682  ;;  %5135 = vrcp.f32 %v2661_v29 }
 0x680   : > { %5137 = vpow2.f32 %v3319_v9 }
 0x681   : > { %v6710_v26 = vpop.eup %5125 }
 0x685   : > { %v6712_v25 = vpop.eup %5127 }
 0x686   : > { %v3382_v18 = vpack.c.bf16 %v6712_v25, %v6710_v26  ;;  %v5130_v52 = vpop.eup %5129 }
 0x687   : > { %v5132_v39 = vpop.eup %5131 }
 0x688   : > { %v5134_v14 = vpop.eup %5133 }
 0x689   : > { %v5136_v34 = vpop.eup %5135 }
 0x68a   : > { %v6728_v27 = vpop.eup %5137 }
 0x692   : > { %3405 = vrot.lane.b32.xlu0 %v6043_v1, %s5470_s11 }
 0x696   : > { %3407 = vrot.lane.b32.xlu0 %v6040_v61, %s5470_s11  ;;  %v3400_v61 = vpop.permute.xlu1 %3399 }
 0x69b   : > { %v6722_v21 = vpop.xlane.xlu0 %2686 }
 0x69c   : > { %3297 = vmax.xlane.f32.xlu1 %v6670_v59 }
 0x69f   : > { %v3270_v3 = vpop.xlane.xlu0 %3269 }
 0x6a0   : > { %v3301_v24 = vsub.f32 %v6536_v38, %v3270_v3 }
 0x6a2   : > { %v3317_v50 = vmul.f32 1.442695, %v3301_v24 }
 0x6a3   : > { %v3398_v1 = vpop.permute.xlu0 %3397 }
 0x6a4   : > { %5139 = vpow2.f32 %v3317_v50  ;;  %4667 = vmatprep.subr.bf16.mxu0 %v3398_v1  ;;  %4719 = vmatprep.subr.bf16.mxu1 %v3398_v1 }
 0x6a5   : > { %4727 = vmatpush3.bf16.msra.mxu1 %v3398_v1  ;;  %5141 = vrcp.f32 %v2667_v19 }
 0x6a6   : > { %4720 = vmatprep.subr.bf16.mxu1 %v3400_v61  ;;  %5143 = vrcp.f32 %v2671_v45 }
 0x6a7   : > { %5145 = vrcp.f32 %v2673_v43 }
 0x6a8   : > { %5147 = vrcp.f32 %v2669_v2 }
 0x6a9   : > { %v4601_v60 = vpop.f32.mrb[80].mxu0  ;;  %4728 = vmatpush3.bf16.msra.mxu1 %v3400_v61  ;;  %5149 = vrcp.f32 %v2675_v0 }
 0x6aa   : > { %v2764_v38 = vpop.f32.mrb[81].mxu0  ;;  %v2845_v33 = vmul.f32 %v5132_v39, %v4601_v60  ;;  %5151 = vrcp.f32 %v6696_v30 }
 0x6ab   : > { %v4602_v20 = vpop.f32.mrb[82].mxu0  ;;  %v6726_v28 = vpop.xlane.xlu1 %3279  ;;  %v2843_v62 = vmul.f32 %v5130_v52, %v2764_v38  ;;  %5153 = vrcp.f32 %v2679_v63 }
 0x6ac   : > { %v2846_v35 = vmul.f32 %v5134_v14, %v4602_v20  ;;  %v2767_v40 = vpop.f32.mrb[83].mxu0  ;;  %5155 = vrcp.f32 %v6691_v41 }
 0x6ad   : > { %v2844_v13 = vmul.f32 %v5136_v34, %v2767_v40  ;;  %v3306_v40 = vsub.f32 %v6551_v12, %v6726_v28 }
 0x6ae   : > { %v6730_v55 = vpop.eup %5139  ;;  %v2876_v32 = vpack.c.bf16 %v2846_v35, %v2845_v33 }
 0x6af   : > { %v2875_v6 = vpack.c.bf16 %v2844_v13, %v2843_v62  ;;  %v3282_v5 = vpop.xlane.xlu1 %3281  ;;  %3349 = vadd.xlane.f32.xlu1 %v6730_v55  ;;  %v3381_v29 = vpack.c.bf16 %v6728_v27, %v6730_v55  ;;  %v5142_v44 = vpop.eup %5141  ;;  %v3327_v62 = vmul.f32 1.442695, %v3306_v40 }
 0x6b0   : > { %v3307_v31 = vsub.f32 %v6545_v16, %v3282_v5  ;;  %v5144_v2 = vpop.eup %5143 }
 0x6b1   : > { %v4605_v19 = vpop.f32.mrb[84].mxu0  ;;  %4619 = vmatprep.mubr.msk.bf16.mxu0 %vm1082_vm0, %v2875_v6  ;;  %v5146_v43 = vpop.eup %5145 }
 0x6b2   : > { %v2780_v45 = vpop.f32.mrb[85].mxu0  ;;  %4620 = vmatmul.mubr.msk.bf16.vlgmr.msra.gmra.mrb[48].mxu0 %vm1082_vm0, %v2876_v32  ;;  %v3329_v57 = vmul.f32 1.442695, %v3307_v31  ;;  %v5148_v30 = vpop.eup %5147  ;;  %v2849_v16 = vmul.f32 %v5144_v2, %v4605_v19 }
 0x6b3   : > { %4668 = vmatpush3.bf16.msra.mxu0 %v3398_v1  ;;  %v4606_v58 = vpop.f32.mrb[86].mxu0  ;;  %v3284_v8 = vpop.xlane.xlu1 %3283  ;;  %3353 = vadd.xlane.f32.xlu1 %v6710_v26  ;;  %v2847_v54 = vmul.f32 %v5142_v44, %v2780_v45  ;;  %v4964_v26 = vld [vmem:[#allocation14 + $0x38] sm:$0xff]  }
 0x6b4   : > { %v2850_v37 = vmul.f32 %v5146_v43, %v4606_v58  ;;  %4669 = vmatprep.subr.bf16.mxu0 %v3400_v61  ;;  %v3308_v22 = vsub.f32 %v6549_v11, %v3284_v8  ;;  %v2783_v47 = vpop.f32.mrb[87].mxu0  ;;  %5157 = vpow2.f32 %v3329_v57  ;;  %v5150_v63 = vpop.eup %5149 }
 0x6b5   : > { %v2848_v56 = vmul.f32 %v5148_v30, %v2783_v47  ;;  %3295 = vmax.xlane.f32.xlu0 %v6676_v7  ;;  %v5152_v11 = vpop.eup %5151 }
 0x6b6   : > { %v2878_v41 = vpack.c.bf16 %v2850_v37, %v2849_v16  ;;  %v3331_v36 = vmul.f32 1.442695, %v3308_v22  ;;  %v5154_v24 = vpop.eup %5153 }
 0x6b7   : > { %v2877_v0 = vpack.c.bf16 %v2848_v56, %v2847_v54  ;;  %4670 = vmatpush3.bf16.msra.mxu0 %v3400_v61  ;;  %3355 = vadd.xlane.f32.xlu1 %v6712_v25  ;;  %v5156_v1 = vpop.eup %5155  ;;  %v3404_v31 = vpop.permute.xlu1 %3403 }
 0x6b8   : > { %5159 = vpow2.f32 %v3331_v36 }
 0x6b9   : > { %v4609_v9 = vpop.f32.mrb[88].mxu0  ;;  %4623 = vmatprep.mubr.msk.bf16.mxu0 %vm1082_vm0, %v2877_v0  ;;  %3299 = vmax.xlane.f32.xlu0 %v6674_v48  ;;  %5161 = vrcp.f32 %v6722_v21 }
 0x6ba   : > { %v2796_v3 = vpop.f32.mrb[89].mxu0  ;;  %4624 = vmatmul.mubr.msk.bf16.gmra.mrb[52].mxu0 %vm1082_vm0, %v2878_v41  ;;  %v2853_v52 = vmul.f32 %v5154_v24, %v4609_v9  ;;  %5163 = vpow2.f32 %v3327_v62 }
 0x6bb   : > { %v4610_v50 = vpop.f32.mrb[90].mxu0  ;;  %v2851_v61 = vmul.f32 %v5150_v63, %v2796_v3 }
 0x6bc   : > { %v2854_v60 = vmul.f32 %v5152_v11, %v4610_v50  ;;  %v2799_v39 = vpop.f32.mrb[91].mxu0 }
 0x6bd   : > { %v2852_v38 = vmul.f32 %v5156_v1, %v2799_v39 }
 0x6be   : > { %v2880_v14 = vpack.c.bf16 %v2854_v60, %v2853_v52  ;;  %v6747_v34 = vpop.eup %5157 }
 0x6bf   : > { %v2879_v20 = vpack.c.bf16 %v2852_v38, %v2851_v61 }
 0x6c1   : > { %4627 = vmatprep.mubr.msk.bf16.mxu0 %vm1082_vm0, %v2879_v20 }
 0x6c2   : > { %v6750_v33 = vpop.eup %5159  ;;  %4628 = vmatmul.mubr.msk.bf16.gmra.mrb[56].mxu0 %vm1082_vm0, %v2880_v14 }
 0x6c3   : > { %v3384_v35 = vpack.c.bf16 %v6750_v33, %v6747_v34 }
 0x6cf   : > { %3411 = vrot.lane.b32.xlu0 %v6055_v15, %s5470_s11  ;;  %v5162_v15 = vpop.eup %5161 }
 0x6d4   : > { %v3278_v13 = vpop.xlane.xlu0 %3277 }
 0x6d5   : > { %v3305_v32 = vsub.f32 %v6547_v53, %v3278_v13  ;;  %v6764_v53 = vpop.eup %5163 }
 0x6d7   : > { %v3325_v6 = vmul.f32 1.442695, %v3305_v32 }
 0x6d8   : > { %v3402_v5 = vpop.permute.xlu0 %3401 }
 0x6d9   : > { %5165 = vpow2.f32 %v3325_v6  ;;  %4671 = vmatprep.subr.bf16.mxu0 %v3402_v5  ;;  %4721 = vmatprep.subr.bf16.mxu1 %v3402_v5 }
 0x6da   : > { %5167 = vrcp.f32 %v6720_v17  ;;  %4672 = vmatpush3.bf16.msra.mxu0 %v3402_v5  ;;  %4729 = vmatpush3.bf16.msra.mxu1 %v3402_v5 }
 0x6db   : > { %5169 = vrcp.f32 %v6702_v51  ;;  %4673 = vmatprep.subr.bf16.mxu0 %v3404_v31  ;;  %4722 = vmatprep.subr.bf16.mxu1 %v3404_v31 }
 0x6dc   : > { %5171 = vrcp.f32 %v6699_v46 }
 0x6de   : > { %4674 = vmatpush3.bf16.msra.mxu0 %v3404_v31  ;;  %4730 = vmatpush3.bf16.msra.mxu1 %v3404_v31  ;;  %v4963_v31 = vld [vmem:[#allocation14 + $0x30] sm:$0xff]  }
 0x6e3   : > { %v6766_v12 = vpop.eup %5165  ;;  %v4613_v21 = vpop.f32.mrb[92].mxu0 }
 0x6e4   : > { %v5168_v28 = vpop.eup %5167  ;;  %v2857_v44 = vmul.f32 %v5162_v15, %v4613_v21  ;;  %v2812_v17 = vpop.f32.mrb[93].mxu0  ;;  %3357 = vadd.xlane.f32.xlu1 %v6766_v12  ;;  %v3383_v51 = vpack.c.bf16 %v6764_v53, %v6766_v12 }
 0x6e5   : > { %v5170_v19 = vpop.eup %5169  ;;  %v2855_v2 = vmul.f32 %v5168_v28, %v2812_v17  ;;  %v4614_v45 = vpop.f32.mrb[94].mxu0 }
 0x6e6   : > { %v5172_v46 = vpop.eup %5171  ;;  %v2858_v43 = vmul.f32 %v5170_v19, %v4614_v45  ;;  %v2815_v57 = vpop.f32.mrb[95].mxu0 }
 0x6e7   : > { %v2856_v58 = vmul.f32 %v5172_v46, %v2815_v57 }
 0x6e8   : > { %v2882_v8 = vpack.c.bf16 %v2858_v43, %v2857_v44  ;;  %v3288_v30 = vpop.xlane.xlu1 %3287  ;;  %3359 = vadd.xlane.f32.xlu1 %v6764_v53 }
 0x6e9   : > { %v2881_v16 = vpack.c.bf16 %v2856_v58, %v2855_v2 }
 0x6eb   : > { %4631 = vmatprep.mubr.msk.bf16.mxu0 %vm1082_vm0, %v2881_v16 }
 0x6ec   : > { %4632 = vmatmul.mubr.msk.bf16.gmra.mrb[60].mxu0 %vm1082_vm0, %v2882_v8  ;;  %v3290_v37 = vpop.xlane.xlu1 %3289  ;;  %3361 = vadd.xlane.f32.xlu1 %v6747_v34 }
 0x6ed   : > { %v3311_v22 = vsub.f32 %v6575_v42, %v3290_v37  ;;  %4683 = vmatprep.mubr.bf16.mxu0 %v3381_v29 }
 0x6ee   : > { %3351 = vadd.xlane.f32.xlu0 %v6728_v27  ;;  %v3310_v27 = vsub.f32 %v6587_v49, %v3288_v30 }
 0x6ef   : > { %v3337_v47 = vmul.f32 1.442695, %v3311_v22 }
 0x6f0   : > { %v3292_v54 = vpop.xlane.xlu1 %3291  ;;  %3363 = vadd.xlane.f32.xlu1 %v6750_v33  ;;  %v3335_v11 = vmul.f32 1.442695, %v3310_v27 }
 0x6f1   : > { %5173 = vpow2.f32 %v3337_v47  ;;  %v3312_v56 = vsub.f32 %v6583_v10, %v3292_v54 }
 0x6f3   : > { %v3339_v41 = vmul.f32 1.442695, %v3312_v56 }
 0x6f4   : > { %v3294_v36 = vpop.xlane.xlu1 %3293 }
 0x6f5   : > { %5175 = vpow2.f32 %v3339_v41  ;;  %v3313_v0 = vsub.f32 %v6672_v4, %v3294_v36 }
 0x6f7   : > { %v3341_v63 = vmul.f32 1.442695, %v3313_v0 }
 0x6f8   : > { %v3410_v1 = vpop.permute.xlu1 %3409 }
 0x6f9   : > { %5177 = vpow2.f32 %v3341_v63 }
 0x6fa   : > { %5179 = vpow2.f32 %v3335_v11 }
 0x6fb   : > { %v5174_v42 = vpop.eup %5173 }
 0x6fc   : > { %3369 = vadd.xlane.f32.xlu0 %v5174_v42 }
 0x6ff   : > { %v5176_v55 = vpop.eup %5175 }
 0x700   : > { %v3386_v29 = vpack.c.bf16 %v5176_v55, %v5174_v42 }
 0x703   : > { %v5178_v9 = vpop.eup %5177 }
 0x704   : > { %3373 = vadd.xlane.f32.xlu0 %v5178_v9  ;;  %v5180_v49 = vpop.eup %5179 }
 0x709   : > { %v3286_v3 = vpop.xlane.xlu0 %3285 }
 0x70a   : > { %v3309_v24 = vsub.f32 %v6579_v23, %v3286_v3 }
 0x70c   : > { %v3333_v10 = vmul.f32 1.442695, %v3309_v24 }
 0x70d   : > { %v3406_v50 = vpop.permute.xlu0 %3405 }
 0x70e   : > { %5181 = vpow2.f32 %v3333_v10  ;;  %4675 = vmatprep.subr.bf16.mxu0 %v3406_v50  ;;  %4723 = vmatprep.subr.bf16.mxu1 %v3406_v50 }
 0x70f   : > { %4676 = vmatpush3.bf16.msra.mxu0 %v3406_v50  ;;  %4731 = vmatpush3.bf16.msra.mxu1 %v3406_v50 }
 0x711   : > { %v3408_v4 = vpop.permute.xlu0 %3407 }
 0x712   : > { %4677 = vmatprep.subr.bf16.mxu0 %v3408_v4  ;;  %4724 = vmatprep.subr.bf16.mxu1 %v3408_v4 }
 0x713   : > { %4678 = vmatpush3.bf16.msra.mxu0 %v3408_v4  ;;  %4732 = vmatpush3.bf16.msra.mxu1 %v3408_v4 }
 0x714   : > { %4679 = vmatprep.subr.bf16.mxu0 %v3410_v1  ;;  %4725 = vmatprep.subr.bf16.mxu1 %v3410_v1 }
 0x717   : > { %4680 = vmatpush3.bf16.msra.mxu0 %v3410_v1  ;;  %4733 = vmatpush3.bf16.msra.mxu1 %v3410_v1 }
 0x718   : > { %v5182_v23 = vpop.eup %5181 }
 0x719   : > { %3365 = vadd.xlane.f32.xlu1 %v5182_v23  ;;  %v3385_v52 = vpack.c.bf16 %v5180_v49, %v5182_v23 }
 0x71b   : > { %4691 = vmatprep.mubr.bf16.mxu1 %v3385_v52 }
 0x71d   : > { %3367 = vadd.xlane.f32.xlu1 %v5180_v49 }
 0x721   : > { %3371 = vadd.xlane.f32.xlu1 %v5176_v55 }
 0x729   : > { %v3298_v60 = vpop.xlane.xlu1 %3297 }
 0x72a   : > { %v3315_v39 = vsub.f32 %v6670_v59, %v3298_v60 }
 0x72c   : > { %v3345_v61 = vmul.f32 1.442695, %v3315_v39 }
 0x72e   : > { %5183 = vpow2.f32 %v3345_v61 }
 0x738   : > { %v5184_v38 = vpop.eup %5183 }
 0x739   : > { %3377 = vadd.xlane.f32.xlu0 %v5184_v38 }
 0x73c   : > { %v3350_v25 = vpop.xlane.xlu1 %3349 }
 0x742   : > { %v3296_v14 = vpop.xlane.xlu0 %3295 }
 0x743   : > { %v3314_v20 = vsub.f32 %v6676_v7, %v3296_v14 }
 0x745   : > { %v3343_v40 = vmul.f32 1.442695, %v3314_v20 }
 0x746   : > { %v3300_v62 = vpop.xlane.xlu0 %3299 }
 0x747   : > { %5185 = vpow2.f32 %v3343_v40  ;;  %v3316_v13 = vsub.f32 %v6674_v48, %v3300_v62 }
 0x749   : > { %v3347_v32 = vmul.f32 1.442695, %v3316_v13 }
 0x74a   : > { %v3412_v6 = vpop.permute.xlu0 %3411 }
 0x74b   : > { %5187 = vpow2.f32 %v3347_v32  ;;  %4681 = vmatprep.subr.bf16.mxu0 %v3412_v6  ;;  %4726 = vmatprep.subr.bf16.mxu1 %v3412_v6 }
 0x74c   : > { %4682 = vmatpush3.bf16.msra.mxu0 %v3412_v6  ;;  %4734 = vmatpush3.bf16.msra.mxu1 %v3412_v6  ;;  %5189 = vrcp.f32 %v3350_v25 }
 0x74d   : > { %4699 = vmatprep.subr.bf16.mxu0 %v4963_v31 }
 0x74f   : > { %4684 = vmatmul.mubr.bf16.vlgmr.msra.gmra.mrb[96].mxu0 %v3382_v18  ;;  %4692 = vmatmul.mubr.bf16.vlgmr.msra.gmra.mrb[80].mxu1 %v3386_v29  ;;  %v3354_v18 = vpop.xlane.xlu1 %3353 }
 0x750   : > { %4687 = vmatprep.mubr.bf16.mxu0 %v3383_v51  ;;  %4700 = vmatpush3.bf16.msra.mxu0 %v4963_v31  ;;  %5191 = vrcp.f32 %v3354_v18 }
 0x751   : > { %v5186_v59 = vpop.eup %5185  ;;  %4701 = vmatprep.subr.bf16.mxu0 %v4964_v26 }
 0x752   : > { %3375 = vadd.xlane.f32.xlu1 %v5186_v59  ;;  %v3387_v7 = vpack.c.bf16 %v5186_v59, %v5178_v9 }
 0x753   : > { %v3356_v15 = vpop.xlane.xlu1 %3355 }
 0x754   : > { %4695 = vmatprep.mubr.bf16.mxu1 %v3387_v7  ;;  %4702 = vmatpush3.bf16.msra.mxu0 %v4964_v26  ;;  %5193 = vrcp.f32 %v3356_v15 }
 0x755   : > { %v5188_v48 = vpop.eup %5187 }
 0x756   : > { %3379 = vadd.xlane.f32.xlu1 %v5188_v48  ;;  %v3388_v5 = vpack.c.bf16 %v5188_v48, %v5184_v38  ;;  %v5190_v2 = vpop.eup %5189 }
 0x757   : > { %4688 = vmatmul.mubr.bf16.gmra.mrb[100].mxu0 %v3384_v35 }
 0x758   : > { %4696 = vmatmul.mubr.bf16.gmra.mrb[84].mxu1 %v3388_v5 }
 0x75a   : > { %v5192_v45 = vpop.eup %5191 }
 0x75e   : > { %v5194_v43 = vpop.eup %5193 }
 0x771   : > { %v3358_v53 = vpop.xlane.xlu1 %3357 }
 0x775   : > { %v3360_v12 = vpop.xlane.xlu1 %3359 }
 0x779   : > { %v3362_v21 = vpop.xlane.xlu1 %3361 }
 0x77b   : > { %v3352_v51 = vpop.xlane.xlu0 %3351 }
 0x77c   : > { %5195 = vrcp.f32 %v3352_v51 }
 0x77d   : > { %v3364_v28 = vpop.xlane.xlu1 %3363 }
 0x786   : > { %v5196_v58 = vpop.eup %5195 }
 0x789   : > { %v3370_v34 = vpop.xlane.xlu0 %3369 }
 0x78a   : > { %5197 = vrcp.f32 %v3370_v34 }
 0x791   : > { %v3374_v19 = vpop.xlane.xlu0 %3373 }
 0x794   : > { %v5198_v8 = vpop.eup %5197 }
 0x7a6   : > { %v3366_v44 = vpop.xlane.xlu1 %3365 }
 0x7a7   : > { %5199 = vrcp.f32 %v3366_v44 }
 0x7aa   : > { %v3368_v17 = vpop.xlane.xlu1 %3367 }
 0x7ae   : > { %v3372_v33 = vpop.xlane.xlu1 %3371 }
 0x7af   : > { %5201 = vrcp.f32 %v3372_v33 }
 0x7b0   : > { %5203 = vrcp.f32 %v3368_v17  ;;  %v3989_v17 = vld [vmem:[%s6888_s5 + $0x3] ss:$0 sm:$0xff] }
 0x7b1   : > { %5205 = vrcp.f32 %v3358_v53  ;;  %v5200_v37 = vpop.eup %5199 }
 0x7b2   : > { %5207 = vrcp.f32 %v3360_v12 }
 0x7b3   : > { %5209 = vrcp.f32 %v3362_v21 }
 0x7b4   : > { %5211 = vrcp.f32 %v3364_v28 }
 0x7b5   : > { %5213 = vrcp.f32 %v3374_v19 }
 0x7b9   : > { %v5202_v54 = vpop.eup %5201 }
 0x7ba   : > { %v5204_v36 = vpop.eup %5203 }
 0x7bb   : > { %v5206_v10 = vpop.eup %5205 }
 0x7bc   : > { %v5208_v1 = vpop.eup %5207 }
 0x7bd   : > { %v5210_v52 = vpop.eup %5209 }
 0x7be   : > { %v5212_v60 = vpop.eup %5211 }
 0x7bf   : > { %v5214_v61 = vpop.eup %5213 }
 0x7c6   : > { %v3378_v46 = vpop.xlane.xlu0 %3377 }
 0x7c7   : > { %5215 = vrcp.f32 %v3378_v46 }
 0x7d1   : > { %v5216_v20 = vpop.eup %5215 }
 0x7df   : > { %v3376_v35 = vpop.xlane.xlu1 %3375 }
 0x7e3   : > { %v3380_v57 = vpop.xlane.xlu1 %3379 }
 0x7e4   : > { %5217 = vrcp.f32 %v3380_v57 }
 0x7e5   : > { %5219 = vrcp.f32 %v3376_v35 }
 0x7ee   : > { %v5218_v13 = vpop.eup %5217 }
 0x7ef   : > { %v5220_v48 = vpop.eup %5219 }
 0x822   : > { %v4685_v30 = vpop.f32.mrb[96].mxu0  ;;  %v4693_v16 = vpop.f32.mrb[80].mxu1 }
 0x823   : > { %v3455_v22 = vpop.f32.mrb[97].mxu0  ;;  %v3487_v47 = vpop.f32.mrb[81].mxu1  ;;  %v3536_v0 = vmul.f32 %v5192_v45, %v4685_v30  ;;  %v3544_v63 = vmul.f32 %v5198_v8, %v4693_v16 }
 0x824   : > { %v4686_v56 = vpop.f32.mrb[98].mxu0  ;;  %v4694_v41 = vpop.f32.mrb[82].mxu1  ;;  %v3534_v27 = vmul.f32 %v5190_v2, %v3455_v22  ;;  %v3542_v11 = vmul.f32 %v5200_v37, %v3487_v47 }
 0x825   : > { %v3537_v42 = vmul.f32 %v5194_v43, %v4686_v56  ;;  %v3545_v55 = vmul.f32 %v5202_v54, %v4694_v41  ;;  %v3458_v29 = vpop.f32.mrb[99].mxu0  ;;  %v3490_v9 = vpop.f32.mrb[83].mxu1 }
 0x826   : > { %v3535_v3 = vmul.f32 %v5196_v58, %v3458_v29  ;;  %v3543_v24 = vmul.f32 %v5204_v36, %v3490_v9 }
 0x827   : > { %v3567_v50 = vpack.c.bf16 %v3537_v42, %v3536_v0  ;;  %v3571_v4 = vpack.c.bf16 %v3545_v55, %v3544_v63 }
 0x828   : > { %v3566_v49 = vpack.c.bf16 %v3535_v3, %v3534_v27  ;;  %v3570_v23 = vpack.c.bf16 %v3543_v24, %v3542_v11 }
 0x82a   : > { %v4689_v39 = vpop.f32.mrb[100].mxu0  ;;  %4703 = vmatprep.mubr.msk.bf16.mxu0 %vm1082_vm0, %v3566_v49 }
 0x82b   : > { %v3471_v38 = vpop.f32.mrb[101].mxu0  ;;  %v4697_v14 = vpop.f32.mrb[84].mxu1  ;;  %4704 = vmatmul.mubr.msk.bf16.vlgmr.msra.gmra.mrb[48].mxu0 %vm1082_vm0, %v3567_v50  ;;  %v3540_v32 = vmul.f32 %v5210_v52, %v4689_v39 }
 0x82c   : > { %v4690_v40 = vpop.f32.mrb[102].mxu0  ;;  %v3503_v62 = vpop.f32.mrb[85].mxu1  ;;  %v3538_v5 = vmul.f32 %v5206_v10, %v3471_v38  ;;  %v3548_v31 = vmul.f32 %v5216_v20, %v4697_v14 }
 0x82d   : > { %v3541_v6 = vmul.f32 %v5212_v60, %v4690_v40  ;;  %v3474_v59 = vpop.f32.mrb[103].mxu0  ;;  %v4698_v7 = vpop.f32.mrb[86].mxu1  ;;  %v3546_v53 = vmul.f32 %v5214_v61, %v3503_v62 }
 0x82e   : > { %v3539_v26 = vmul.f32 %v5208_v1, %v3474_v59  ;;  %v3549_v25 = vmul.f32 %v5218_v13, %v4698_v7  ;;  %v3506_v18 = vpop.f32.mrb[87].mxu1 }
 0x82f   : > { %v3569_v15 = vpack.c.bf16 %v3541_v6, %v3540_v32  ;;  %v3547_v12 = vmul.f32 %v5220_v48, %v3506_v18 }
 0x830   : > { %v3568_v21 = vpack.c.bf16 %v3539_v26, %v3538_v5  ;;  %v3573_v28 = vpack.c.bf16 %v3549_v25, %v3548_v31 }
 0x831   : > { %v3572_v44 = vpack.c.bf16 %v3547_v12, %v3546_v53 }
 0x832   : > { %4707 = vmatprep.mubr.msk.bf16.mxu0 %vm1082_vm0, %v3568_v21 }
 0x833   : > { %4708 = vmatmul.mubr.msk.bf16.gmra.mrb[52].mxu0 %vm1082_vm0, %v3569_v15 }
 0x834   : > { %4711 = vmatprep.mubr.msk.bf16.mxu0 %vm1082_vm0, %v3570_v23 }
 0x83b   : > { %4712 = vmatmul.mubr.msk.bf16.gmra.mrb[56].mxu0 %vm1082_vm0, %v3571_v4 }
 0x83c   : > { %4715 = vmatprep.mubr.msk.bf16.mxu0 %vm1082_vm0, %v3572_v44 }
 0x843   : > { %4716 = vmatmul.mubr.msk.bf16.gmra.mrb[60].mxu0 %vm1082_vm0, %v3573_v28 }
 0x8fe   : > { %v4705_v51 = vpop.f32.mrb[48].mxu0 }
 0x8ff   : > { %v4735_v34 = vadd.f32 %v4705_v51, %v3989_v17  ;;  %v3648_v33 = vpop.f32.mrb[49].mxu0 }
 0x900   : > { %v4736_v35 = vadd.f32 %v3989_v17, %v3648_v33  ;;  %v4706_v19 = vpop.f32.mrb[50].mxu0 }
 0x901   : > { %3761 = vst [vmem:[%s6809_s15 + $0x10] sm:$0xff] %v4735_v34  ;;  %v4737_v2 = vadd.f32 %v4706_v19, %v3989_v17  ;;  %v3651_v45 = vpop.f32.mrb[51].mxu0 }
 0x902   : > { %3759 = vst [vmem:[%s6809_s15] sm:$0xff] %v4736_v35  ;;  %v4738_v46 = vadd.f32 %v3989_v17, %v3651_v45 }
 0x903   : > { %3762 = vst [vmem:[%s6809_s15 + $0x18] sm:$0xff] %v4737_v2 }
 0x904   : > { %3760 = vst [vmem:[%s6809_s15 + $0x8] sm:$0xff] %v4738_v46 }
 0x906   : > { %v4709_v43 = vpop.f32.mrb[52].mxu0 }
 0x907   : > { %v4739_v57 = vadd.f32 %v4709_v43, %v3989_v17  ;;  %v3664_v58 = vpop.f32.mrb[53].mxu0 }
 0x908   : > { %v4740_v8 = vadd.f32 %v3989_v17, %v3664_v58  ;;  %v4710_v30 = vpop.f32.mrb[54].mxu0 }
 0x909   : > { %3765 = vst [vmem:[%s6809_s15 + $0x30] sm:$0xff] %v4739_v57  ;;  %v4741_v16 = vadd.f32 %v4710_v30, %v3989_v17  ;;  %v3667_v37 = vpop.f32.mrb[55].mxu0 }
 0x90a   : > { %3763 = vst [vmem:[%s6809_s15 + $0x20] sm:$0xff] %v4740_v8  ;;  %v4742_v22 = vadd.f32 %v3989_v17, %v3667_v37 }
 0x90b   : > { %3766 = vst [vmem:[%s6809_s15 + $0x38] sm:$0xff] %v4741_v16 }
 0x90c   : > { %3764 = vst [vmem:[%s6809_s15 + $0x28] sm:$0xff] %v4742_v22 }
 0x90e   : > { %v4713_v47 = vpop.f32.mrb[56].mxu0 }
 0x90f   : > { %v4743_v54 = vadd.f32 %v4713_v47, %v3989_v17  ;;  %v3680_v56 = vpop.f32.mrb[57].mxu0 }
 0x910   : > { %v4744_v41 = vadd.f32 %v3989_v17, %v3680_v56  ;;  %v4714_v36 = vpop.f32.mrb[58].mxu0 }
 0x911   : > { %3769 = vst [vmem:[%s6809_s15 + $0x50] sm:$0xff] %v4743_v54  ;;  %v4745_v0 = vadd.f32 %v4714_v36, %v3989_v17  ;;  %v3683_v63 = vpop.f32.mrb[59].mxu0 }
 0x912   : > { %3767 = vst [vmem:[%s6809_s15 + $0x40] sm:$0xff] %v4744_v41  ;;  %v4746_v42 = vadd.f32 %v3989_v17, %v3683_v63 }
 0x913   : > { %3770 = vst [vmem:[%s6809_s15 + $0x58] sm:$0xff] %v4745_v0 }
 0x914   : > { %3768 = vst [vmem:[%s6809_s15 + $0x48] sm:$0xff] %v4746_v42 }
 0x916   : > { %v4717_v55 = vpop.f32.mrb[60].mxu0 }
 0x917   : > { %v4747_v29 = vadd.f32 %v4717_v55, %v3989_v17  ;;  %v3696_v9 = vpop.f32.mrb[61].mxu0 }
 0x918   : > { %v4748_v27 = vadd.f32 %v3989_v17, %v3696_v9  ;;  %v4718_v11 = vpop.f32.mrb[62].mxu0 }
 0x919   : > { %3773 = vst [vmem:[%s6809_s15 + $0x70] sm:$0xff] %v4747_v29  ;;  %v4749_v3 = vadd.f32 %v4718_v11, %v3989_v17  ;;  %v3699_v24 = vpop.f32.mrb[63].mxu0 }
 0x91a   : > { %3771 = vst [vmem:[%s6809_s15 + $0x60] sm:$0xff] %v4748_v27  ;;  %v4750_v10 = vadd.f32 %v3989_v17, %v3699_v24 }
 0x91b   : > { %3774 = vst [vmem:[%s6809_s15 + $0x78] sm:$0xff] %v4749_v3 }
 0x91c   : > { %3772 = vst [vmem:[%s6809_s15 + $0x68] sm:$0xff] %v4750_v10 }
 0x91d   : > { %5380 = shalt.err (!%p5377_p9)
}
 0x91e   : > { %s5381_s30 = scalar_lea.hbm %s6829_s9, 2048  ;;  %s5385_s12 = scalar_lea.hbm %s6889_s6, 4096 }
 0x91f   : > { %p5382_p6 = scmp.ne.s32.totalorder %s6829_s9, %s5381_s30  ;;  %p5386_p3 = scmp.lt.u32.totalorder %s6829_s9, %s6889_s6 }
 0x920   : > { %p5387_p7 = scmp.lt.u32.totalorder %s5385_s12, %s5381_s30  ;;  %p5389_p2 = scmp.lt.u32.totalorder %s5381_s30, %s6829_s9 }
 0x921   : > { %p5383_p4 = pnand %p5382_p6, %p6950_p11 }
 0x922   : > { %p5388_p12 = por %p5387_p7, %p5386_p3 }
 0x923   : > { %p5384_p10 = pneg %p5383_p4 }
 0x924   : > { %p5390_p0 = por %p5389_p2, %p5388_p12 }
 0x926   : > { %p5391_p8 = pnand %p5390_p0, %p5384_p10 }
 0x928   : > { %5394 = shalt.err (!%p5391_p8)
}
 0x929   : > { %s5472_s28 = smov 128   ;;  %s5473_s11 = smov 8  }
 0x92a   : > { %4845 = dma.vmem_to_hbm [thread:$0]  (%p6950_p11), %s6831_s18, 2048, %s6829_s9, %s3776_s24, %s5472_s28, %s5472_s28, %s5473_s11  }
 0x92b PF: > { %s6951_s16 = sld [smem:[#allocation22_spill]]  ;;  %s6952_s29 = sld [smem:[#allocation21_spill]] }
 0x92c   : > { %s3806_s15 = sand.u32 1, %s5437_s21  }
 0x92d   : > { %s3807_s3 = scalar_lea.sflag [#allocation8], %s3806_s15 }
 0x931   : > { %p6953_p1 = scmp.ne.s32.totalorder %s6951_s16, 0  ;;  %p6954_p13 = scmp.ge.s32.totalorder %s6952_s29, 2 }
 0x933   : > { %p4865_p5 = pnand %p6954_p13, %p6953_p1 }
 0x935   : > { %5432 = dma.done.wait (!%p4865_p5), %s3807_s3, 2048  }
 0x936   : > { %5434 = vsyncadd (!%p4865_p5), %s3807_s3, 4294965248  ;;  %s26_s26 = sadd.s32 1, %s6952_s29   ;;  %s6955_s8 = sld [smem:[#allocation24_spill]] }
 0x937   : > { %p23_p9 = scmp.ge.s32.totalorder %s26_s26, 4   ;;  %s6956_s24 = sld [smem:[#allocation20_spill]] }
 0x938   : > { %s6957_s25 = sld [smem:[#allocation23_spill]]  ;;  %s6958_s21 = smov %s5441_s22 }
 0x939   : > { %s6959_s22 = smov %s5445_s23  ;;  %25 = sbr.rel (!%p23_p9) target bundleno = 12 (0xc), region = 127 }
 0x93c   : > { %s6960_s23 = smov %s6955_s8 }
 0x940   :  { %3812 = vsyncpa [#allocation7], 1 }
 0x941   :  { %3814 = vsyncpa [#allocation7 + $0x1], 1 }
 0x942   :  { %3815 = vsyncpa [#allocation10], 1 }
 0x943   :  { %3817 = vsyncpa [#allocation10 + $0x1], 1 }
 0x944   :  { %3818 = vsyncpa [#allocation13], 1 }
 0x945   :  { %3819 = vsyncpa [#allocation8], 1 }
 0x946   :  { %3821 = vsyncpa [#allocation8 + $0x1], 1 }

</bundles_post_ra>
